<compile_context>
chip_gen: v5e
topology: v5e:2x2
jax: 0.10.0
libtpu: 0.0.40
codegen_flags: <defaults>
</compile_context>

<pallas_src>
import functools

import jax
import jax.numpy as jnp
from jax import lax
from jax.experimental import pallas as pl
from jax.experimental.pallas import tpu as pltpu


def _round_up(x, m):
    return ((x + m - 1) // m) * m


# --------------------------------------------------------------------------
# fused kernel
# --------------------------------------------------------------------------

def _make_dense_encoder_kernel(*, T, F, C, Cin_in, depth, Wout, IN0, eps,
                               out_dtype):
    S = T * F
    KH = KW = 3                      # dense-block kernel size
    n_rows = (depth + 1) * C         # scratch rows (newest activation first)

    def kernel(*refs):
        x_ref = refs[0]                     # (Cin_in, S)      input, flat spatial
        w1_ref = refs[1]                    # (1, C, Cin_in)   conv1 taps
        wd_refs = refs[2:2 + depth]         # (9, C, (i+1)*C)  dense conv taps
        w2_ref = refs[2 + depth]            # (3, C, C)        conv2 taps
        params_ref = refs[3 + depth]        # (depth+2, C, 4)  [bias, gamma, beta, alpha]
        o_ref = refs[4 + depth]             # (C, S)           output (lane-dense)
        skip_ref = refs[5 + depth]          # (n_rows, 2*IN0 + S) VMEM scratch

        f32 = jnp.float32

        # Halo lanes implement the conv zero-padding along H.  Interior lanes
        # are always written before being read, so only the two halo bands need
        # zeroing.  Done every grid step: with a megacore-parallel batch axis
        # each core owns its own scratch instance, so a pid==0 guard would be
        # unsafe.  Both band starts (0 and IN0+S) are 128-lane aligned.
        halo_zeros = jnp.zeros((n_rows, IN0), f32)
        skip_ref[pl.ds(0, n_rows), pl.ds(0, IN0)] = halo_zeros
        skip_ref[pl.ds(0, n_rows), pl.ds(IN0 + S, IN0)] = halo_zeros

        # Lane-position masks (hoisted, computed once per grid step).
        fpos = lax.broadcasted_iota(jnp.int32, (1, S), 1) % F
        mask_w = {
            -1: (fpos >= 1).astype(f32),       # W tap offset -1 stays in row
            0: None,
            1: (fpos <= F - 2).astype(f32),    # W tap offset +1 stays in row
        }
        # conv2: kernel (1,3), stride (1,2), no padding -> valid output columns.
        valid2 = jnp.logical_and(fpos % 2 == 0,
                                 fpos <= 2 * (Wout - 1)).astype(f32)

        def norm_act(acc, layer, mask=None, count=float(S)):
            """InstanceNorm2d(affine=True, eps) + PReLU on a (C, S) accumulator."""
            p = params_ref[layer].astype(f32)                    # (C, 4)
            bias, gamma, beta, alpha = (p[:, 0:1], p[:, 1:2], p[:, 2:3], p[:, 3:4])
            acc = acc + bias          # (cancels under IN; kept for exact numerics)
            inv_n = 1.0 / count
            if mask is None:
                mean = jnp.sum(acc, axis=1, keepdims=True) * inv_n
                cen = acc - mean
                var = jnp.sum(cen * cen, axis=1, keepdims=True) * inv_n
            else:
                mean = jnp.sum(acc * mask, axis=1, keepdims=True) * inv_n
                cen = acc - mean
                var = jnp.sum(cen * cen * mask, axis=1, keepdims=True) * inv_n
            y = cen * (lax.rsqrt(var + eps) * gamma) + beta
            y = jnp.where(y >= 0.0, y, alpha * y)
            if mask is not None:
                y = y * mask
            return y

        def read_patch(row0, n, shift):
            # Static slice; out-of-range H offsets land in the zero halo.
            return skip_ref[pl.ds(row0, n), pl.ds(IN0 + shift, S)].astype(f32)

        def write_act(row0, y):
            # Lane-aligned (IN0 multiple of 128), sublane-aligned (row0 mult. of 8).
            skip_ref[pl.ds(row0, C), pl.ds(IN0, S)] = y

        # ---- dense_conv_1: Conv2d(Cin_in, C, (1,1)) + IN + PReLU -------------
        acc = jnp.dot(w1_ref[0].astype(f32), x_ref[...].astype(f32),
                      preferred_element_type=f32)                # (C, S)
        write_act(depth * C, norm_act(acc, 0))

        # ---- DenseBlock: dilated 3x3 convs with dense skip concatenation ----
        # Buffer row layout (newest activation first, matching torch.cat order):
        #   y_{i} -> rows [(depth-1-i)*C, (depth-i)*C),  conv1 output -> last C rows.
        for i in range(depth):
            dil = 2 ** i
            cin = (i + 1) * C
            row0 = (depth - i) * C          # skip_i = [y_{i-1}, ..., y_0, x1]
            w_ref = wd_refs[i]

            def tap(kh, kw, _w=w_ref, _dil=dil, _cin=cin, _row0=row0):
                shift = (kh - 1) * _dil * F + (kw - 1)
                return jnp.dot(_w[kh * KW + kw].astype(f32),
                               read_patch(_row0, _cin, shift),
                               preferred_element_type=f32)

            # Group taps by kw so each W-boundary mask is applied once.
            parts = []
            for kw in range(KW):
                a = tap(0, kw) + tap(1, kw) + tap(2, kw)
                m = mask_w[kw - 1]
                parts.append(a if m is None else a * m)
            acc = parts[0] + parts[1] + parts[2]
            write_act((depth - 1 - i) * C, norm_act(acc, 1 + i))

        # ---- dense_conv_2: Conv2d(C, C, (1,3), stride=(1,2)) + IN + PReLU ----
        acc = (jnp.dot(w2_ref[0].astype(f32), read_patch(0, C, 0),
                       preferred_element_type=f32)
               + jnp.dot(w2_ref[1].astype(f32), read_patch(0, C, 1),
                         preferred_element_type=f32)
               + jnp.dot(w2_ref[2].astype(f32), read_patch(0, C, 2),
                         preferred_element_type=f32))
        y = norm_act(acc, depth + 1, mask=valid2, count=float(T * Wout))
        o_ref[...] = y.astype(out_dtype)

    return kernel


# --------------------------------------------------------------------------
# wrapper
# --------------------------------------------------------------------------

def _tapify(w):
    # PyTorch (Cout, Cin, KH, KW) -> per-tap matrices (KH*KW, Cout, Cin).
    Cout, Cin, KH, KW = w.shape
    return jnp.transpose(w, (2, 3, 0, 1)).reshape(KH * KW, Cout, Cin)


def _replicated_spec(shape):
    zeros = (0,) * len(shape)
    return pl.BlockSpec(shape, lambda b, z=zeros: z)


def dense_encoder_forward(params, x_nchw, depth=4, eps=1e-5):
    """x_nchw: (B, in_channel, T, F) float32 -> (B, C, T, (F-3)//2 + 1)."""
    B, Cin_in, T, F = x_nchw.shape
    C = params["conv1"]["weight"].shape[0]
    S = T * F
    Wout = (F - 3) // 2 + 1

    # Flat lane-dense spatial layout (free metadata reshape outside the kernel).
    x_flat = x_nchw.reshape(B, Cin_in, S)

    # Conv weights as per-tap (Cout, Cin) matrices.
    w1 = _tapify(params["conv1"]["weight"])                    # (1, C, Cin_in)
    wds = [_tapify(p["weight"]) for p in params["dense"]]      # (9, C, (i+1)*C)
    w2 = _tapify(params["conv2"]["weight"])                    # (3, C, C)

    # Per-channel params packed as (depth+2, C, 4) = [bias, gamma, beta, alpha].
    layer_ps = [params["conv1"], *params["dense"], params["conv2"]]
    pk = jnp.stack(
        [jnp.stack([p["bias"], p["gamma"], p["beta"], p["alpha"]], axis=-1)
         for p in layer_ps], axis=0).astype(jnp.float32)

    # Scratch layout: interior spatial lanes at [IN0, IN0+S), zero halo on both
    # sides wide enough for the largest dilated-H shift (lane-aligned).
    max_shift = (2 ** (depth - 1)) * F + 1
    IN0 = _round_up(max_shift, 128)
    SPAD = 2 * IN0 + S
    n_rows = (depth + 1) * C

    kernel = _make_dense_encoder_kernel(T=T, F=F, C=C, Cin_in=Cin_in,
                                        depth=depth, Wout=Wout, IN0=IN0,
                                        eps=eps, out_dtype=x_nchw.dtype)

    inputs = [x_flat, w1, *wds, w2, pk]
    in_specs = [pl.BlockSpec((None, Cin_in, S), lambda b: (b, 0, 0))]
    in_specs += [_replicated_spec(a.shape) for a in inputs[1:]]

    out_flat = pl.pallas_call(
        kernel,
        out_shape=jax.ShapeDtypeStruct((B, C, S), x_nchw.dtype),
        grid=(B,),
        in_specs=in_specs,
        out_specs=pl.BlockSpec((None, C, S), lambda b: (b, 0, 0)),
        scratch_shapes=[pltpu.VMEM((n_rows, SPAD), jnp.float32)],
        compiler_params=pltpu.CompilerParams(
            dimension_semantics=("parallel",)),
    )(*inputs)

    # Decimate the stride-(1,2) conv2 output (tiny static strided slice in XLA).
    return out_flat.reshape(B, C, T, F)[:, :, :, 0:2 * Wout - 1:2]


# --------------------------------------------------------------------------
# parameters (deterministic, synthetic) + pure-JAX reference
# --------------------------------------------------------------------------

def init_block_params(key, cin, cout, kh, kw):
    k_w, k_b, k_g, k_be, k_a = jax.random.split(key, 5)
    fan_in = cin * kh * kw
    weight = jax.random.normal(k_w, (cout, cin, kh, kw), jnp.float32) / jnp.sqrt(float(fan_in))
    bias = 0.01 * jax.random.normal(k_b, (cout,), jnp.float32)
    gamma = 1.0 + 0.1 * jax.random.normal(k_g, (cout,), jnp.float32)
    beta = 0.1 * jax.random.normal(k_be, (cout,), jnp.float32)
    alpha = 0.25 + 0.05 * jax.random.normal(k_a, (cout,), jnp.float32)
    return dict(weight=weight, bias=bias, gamma=gamma, beta=beta, alpha=alpha)


def init_dense_encoder_params(key, in_channel, dense_channel, depth=4):
    keys = jax.random.split(key, depth + 2)
    return {
        "conv1": init_block_params(keys[0], in_channel, dense_channel, 1, 1),
        "dense": [init_block_params(keys[1 + i], dense_channel * (i + 1),
                                    dense_channel, 3, 3) for i in range(depth)],
        "conv2": init_block_params(keys[depth + 1], dense_channel, dense_channel, 1, 3),
    }


def _ref_block(x, p, *, dilation=(1, 1), stride=(1, 1),
               padding=((0, 0), (0, 0)), eps=1e-5):
    y = lax.conv_general_dilated(
        x, p["weight"], window_strides=stride, padding=padding,
        rhs_dilation=dilation, dimension_numbers=("NCHW", "OIHW", "NCHW"),
        precision=lax.Precision.HIGHEST)
    y = y + p["bias"][None, :, None, None]
    mean = jnp.mean(y, axis=(2, 3), keepdims=True)
    var = jnp.mean(jnp.square(y - mean), axis=(2, 3), keepdims=True)
    y = (y - mean) / jnp.sqrt(var + eps)
    y = y * p["gamma"][None, :, None, None] + p["beta"][None, :, None, None]
    a = p["alpha"][None, :, None, None]
    return jnp.where(y >= 0, y, a * y)


def dense_encoder_reference(params, x, depth=4):
    x = _ref_block(x, params["conv1"])
    skip = x
    for i in range(depth):
        dil = 2 ** i
        x = _ref_block(skip, params["dense"][i], dilation=(dil, 1),
                       padding=((dil, dil), (1, 1)))
        skip = jnp.concatenate([x, skip], axis=1)
    return _ref_block(x, params["conv2"], stride=(1, 2))


if __name__ == "__main__":
    B, in_ch, C, T, F = 2, 2, 8, 16, 16   # h.dense_channel = 8, in_channel = 2

    key = jax.random.PRNGKey(0)
    kx, kp = jax.random.split(key)
    x = jax.random.normal(kx, (B, in_ch, T, F), jnp.float32)
    params = init_dense_encoder_params(kp, in_ch, C, depth=4)

    fwd = jax.jit(functools.partial(dense_encoder_forward, depth=4))
    out = jax.block_until_ready(fwd(params, x))

    Wout = (F - 3) // 2 + 1
    assert out.shape == (B, C, T, Wout), out.shape
    assert bool(jnp.all(jnp.isfinite(out)))

    ref = dense_encoder_reference(params, x, depth=4)
    max_err = float(jnp.max(jnp.abs(out - ref)))
    assert max_err < 5e-2, max_err

    print("KERNEL_OK")
</pallas_src>

<mosaic_0001>
module attributes {stable_mosaic.version = 11 : i64} {
  func.func @kernel(%arg0: i32, %arg1: memref<1x2x256xf32, #tpu.memory_space<vmem>>, %arg2: memref<1x8x2xf32, #tpu.memory_space<vmem>>, %arg3: memref<9x8x8xf32, #tpu.memory_space<vmem>>, %arg4: memref<9x8x16xf32, #tpu.memory_space<vmem>>, %arg5: memref<9x8x24xf32, #tpu.memory_space<vmem>>, %arg6: memref<9x8x32xf32, #tpu.memory_space<vmem>>, %arg7: memref<3x8x8xf32, #tpu.memory_space<vmem>>, %arg8: memref<6x8x4xf32, #tpu.memory_space<vmem>>, %arg9: memref<1x8x256xf32, #tpu.memory_space<vmem>>, %arg10: memref<40x768xf32, #tpu.memory_space<vmem>>) attributes {dimension_semantics = [#tpu.dimension_semantics<parallel>], iteration_bounds = array<i64: 2>, scalar_prefetch = 0 : i64, scratch_operands = 1 : i64, tpu.core_type = #tpu.core_type<tc>, window_params = [{transform_indices = @transform_0, window_bounds = array<i64: 1, 2, 256>}, {pipeline_mode = #tpu.pipeline_mode<synchronous>, transform_indices = @transform_1, window_bounds = array<i64: 1, 8, 2>}, {pipeline_mode = #tpu.pipeline_mode<synchronous>, transform_indices = @transform_2, window_bounds = array<i64: 9, 8, 8>}, {pipeline_mode = #tpu.pipeline_mode<synchronous>, transform_indices = @transform_3, window_bounds = array<i64: 9, 8, 16>}, {pipeline_mode = #tpu.pipeline_mode<synchronous>, transform_indices = @transform_4, window_bounds = array<i64: 9, 8, 24>}, {pipeline_mode = #tpu.pipeline_mode<synchronous>, transform_indices = @transform_5, window_bounds = array<i64: 9, 8, 32>}, {pipeline_mode = #tpu.pipeline_mode<synchronous>, transform_indices = @transform_6, window_bounds = array<i64: 3, 8, 8>}, {pipeline_mode = #tpu.pipeline_mode<synchronous>, transform_indices = @transform_7, window_bounds = array<i64: 6, 8, 4>}, {transform_indices = @transform_8, window_bounds = array<i64: 1, 8, 256>}]} {
    %cst = arith.constant 0.000000e+00 : f32
    %0 = vector.broadcast %cst : f32 to vector<40x256xf32>
    %c0 = arith.constant 0 : index
    %c0_0 = arith.constant 0 : index
    %1 = vector.load %arg10[%c0, %c0_0] : memref<40x768xf32, #tpu.memory_space<vmem>>, vector<40x256xf32>
    tpu.vector_store %arg10[%c0, %c0_0], %0 {strides = array<i32>} : memref<40x768xf32, #tpu.memory_space<vmem>>, vector<40x256xf32>,
    %c0_1 = arith.constant 0 : index
    %c512 = arith.constant 512 : index
    %2 = vector.load %arg10[%c0_1, %c512] : memref<40x768xf32, #tpu.memory_space<vmem>>, vector<40x256xf32>
    tpu.vector_store %arg10[%c0_1, %c512], %0 {strides = array<i32>} : memref<40x768xf32, #tpu.memory_space<vmem>>, vector<40x256xf32>,
    %3 = tpu.iota {dimensions = array<i32: 1>} : vector<1x256xi32>
    %c16_i32 = arith.constant 16 : i32
    %c0_i32 = arith.constant 0 : i32
    %4 = arith.cmpi eq, %c16_i32, %c0_i32 : i32
    %c1_i32 = arith.constant 1 : i32
    %5 = arith.select %4, %c1_i32, %c16_i32 : i32
    %6 = vector.broadcast %5 : i32 to vector<1x256xi32>
    %7 = arith.remsi %3, %6 : vector<1x256xi32>
    %c0_i32_2 = arith.constant 0 : i32
    %8 = vector.broadcast %c0_i32_2 : i32 to vector<1x256xi32>
    %9 = arith.cmpi ne, %7, %8 : vector<1x256xi32>
    %c0_i32_3 = arith.constant 0 : i32
    %10 = vector.broadcast %c0_i32_3 : i32 to vector<1x256xi32>
    %11 = arith.cmpi slt, %7, %10 : vector<1x256xi32>
    %c0_i32_4 = arith.constant 0 : i32
    %12 = arith.cmpi slt, %5, %c0_i32_4 : i32
    %13 = vector.broadcast %12 : i1 to vector<1x256xi1>
    %14 = vector.broadcast %13 : vector<1x256xi1> to vector<1x256xi1>
    %15 = arith.xori %11, %14 : vector<1x256xi1>
    %16 = arith.andi %15, %9 : vector<1x256xi1>
    %17 = vector.broadcast %5 : i32 to vector<1x256xi32>
    %18 = arith.addi %7, %17 : vector<1x256xi32>
    %19 = arith.select %16, %18, %7 : vector<1x256xi1>, vector<1x256xi32>
    %c1_i32_5 = arith.constant 1 : i32
    %20 = vector.broadcast %c1_i32_5 : i32 to vector<1x256xi32>
    %21 = arith.cmpi sge, %19, %20 : vector<1x256xi32>
    %22 = arith.extui %21 : vector<1x256xi1> to vector<1x256xi32>
    %23 = arith.sitofp %22 : vector<1x256xi32> to vector<1x256xf32>
    %c14_i32 = arith.constant 14 : i32
    %24 = vector.broadcast %c14_i32 : i32 to vector<1x256xi32>
    %25 = arith.cmpi sle, %19, %24 : vector<1x256xi32>
    %26 = arith.extui %25 : vector<1x256xi1> to vector<1x256xi32>
    %27 = arith.sitofp %26 : vector<1x256xi32> to vector<1x256xf32>
    %c2_i32 = arith.constant 2 : i32
    %c0_i32_6 = arith.constant 0 : i32
    %28 = arith.cmpi eq, %c2_i32, %c0_i32_6 : i32
    %c1_i32_7 = arith.constant 1 : i32
    %29 = arith.select %28, %c1_i32_7, %c2_i32 : i32
    %30 = vector.broadcast %29 : i32 to vector<1x256xi32>
    %31 = arith.remsi %19, %30 : vector<1x256xi32>
    %c0_i32_8 = arith.constant 0 : i32
    %32 = vector.broadcast %c0_i32_8 : i32 to vector<1x256xi32>
    %33 = arith.cmpi ne, %31, %32 : vector<1x256xi32>
    %c0_i32_9 = arith.constant 0 : i32
    %34 = vector.broadcast %c0_i32_9 : i32 to vector<1x256xi32>
    %35 = arith.cmpi slt, %31, %34 : vector<1x256xi32>
    %c0_i32_10 = arith.constant 0 : i32
    %36 = arith.cmpi slt, %29, %c0_i32_10 : i32
    %37 = vector.broadcast %36 : i1 to vector<1x256xi1>
    %38 = vector.broadcast %37 : vector<1x256xi1> to vector<1x256xi1>
    %39 = arith.xori %35, %38 : vector<1x256xi1>
    %40 = arith.andi %39, %33 : vector<1x256xi1>
    %41 = vector.broadcast %29 : i32 to vector<1x256xi32>
    %42 = arith.addi %31, %41 : vector<1x256xi32>
    %43 = arith.select %40, %42, %31 : vector<1x256xi1>, vector<1x256xi32>
    %c0_i32_11 = arith.constant 0 : i32
    %44 = vector.broadcast %c0_i32_11 : i32 to vector<1x256xi32>
    %45 = arith.cmpi eq, %43, %44 : vector<1x256xi32>
    %c12_i32 = arith.constant 12 : i32
    %46 = vector.broadcast %c12_i32 : i32 to vector<1x256xi32>
    %47 = arith.cmpi sle, %19, %46 : vector<1x256xi32>
    %48 = arith.andi %45, %47 : vector<1x256xi1>
    %49 = arith.extui %48 : vector<1x256xi1> to vector<1x256xi32>
    %50 = arith.sitofp %49 : vector<1x256xi32> to vector<1x256xf32>
    %c0_12 = arith.constant 0 : index
    %c0_13 = arith.constant 0 : index
    %c0_14 = arith.constant 0 : index
    %51 = vector.load %arg2[%c0_12, %c0_13, %c0_14] : memref<1x8x2xf32, #tpu.memory_space<vmem>>, vector<1x8x2xf32>
    %52 = vector.shape_cast %51 : vector<1x8x2xf32> to vector<8x2xf32>
    %c0_15 = arith.constant 0 : index
    %c0_16 = arith.constant 0 : index
    %c0_17 = arith.constant 0 : index
    %53 = vector.load %arg1[%c0_15, %c0_16, %c0_17] : memref<1x2x256xf32, #tpu.memory_space<vmem>>, vector<1x2x256xf32>
    %54 = vector.shape_cast %53 : vector<1x2x256xf32> to vector<2x256xf32>
    %cst_18 = arith.constant dense<0.000000e+00> : vector<8x256xf32>
    %55 = tpu.matmul %52, %54, %cst_18 {dimension_numbers = #tpu.dot_dimension_numbers<[1], [0], [0], [1], [0, 0, 1, 1], [], []>} : vector<8x2xf32>, vector<2x256xf32>, vector<8x256xf32> -> vector<8x256xf32>
    %c0_19 = arith.constant 0 : index
    %c0_20 = arith.constant 0 : index
    %c0_21 = arith.constant 0 : index
    %56 = vector.load %arg8[%c0_19, %c0_20, %c0_21] : memref<6x8x4xf32, #tpu.memory_space<vmem>>, vector<1x8x4xf32>
    %57 = vector.shape_cast %56 : vector<1x8x4xf32> to vector<8x4xf32>
    %58 = vector.extract_strided_slice %57 {offsets = [0, 0], sizes = [8, 1], strides = [1, 1]} : vector<8x4xf32> to vector<8x1xf32>
    %59 = vector.extract_strided_slice %57 {offsets = [0, 1], sizes = [8, 1], strides = [1, 1]} : vector<8x4xf32> to vector<8x1xf32>
    %60 = vector.extract_strided_slice %57 {offsets = [0, 2], sizes = [8, 1], strides = [1, 1]} : vector<8x4xf32> to vector<8x1xf32>
    %61 = vector.extract_strided_slice %57 {offsets = [0, 3], sizes = [8, 1], strides = [1, 1]} : vector<8x4xf32> to vector<8x1xf32>
    %62 = vector.broadcast %58 : vector<8x1xf32> to vector<8x256xf32>
    %63 = arith.addf %55, %62 : vector<8x256xf32>
    %cst_22 = arith.constant dense<0.000000e+00> : vector<8xf32>
    %64 = vector.multi_reduction <add>, %63, %cst_22 [1] : vector<8x256xf32> to vector<8xf32>
    %65 = vector.shape_cast %64 : vector<8xf32> to vector<8x1xf32>
    %cst_23 = arith.constant 3.906250e-03 : f32
    %66 = vector.broadcast %cst_23 : f32 to vector<8x1xf32>
    %67 = arith.mulf %65, %66 : vector<8x1xf32>
    %68 = vector.broadcast %67 : vector<8x1xf32> to vector<8x256xf32>
    %69 = arith.subf %63, %68 : vector<8x256xf32>
    %70 = arith.mulf %69, %69 : vector<8x256xf32>
    %cst_24 = arith.constant dense<0.000000e+00> : vector<8xf32>
    %71 = vector.multi_reduction <add>, %70, %cst_24 [1] : vector<8x256xf32> to vector<8xf32>
    %72 = vector.shape_cast %71 : vector<8xf32> to vector<8x1xf32>
    %cst_25 = arith.constant 3.906250e-03 : f32
    %73 = vector.broadcast %cst_25 : f32 to vector<8x1xf32>
    %74 = arith.mulf %72, %73 : vector<8x1xf32>
    %cst_26 = arith.constant 9.99999974E-6 : f32
    %75 = vector.broadcast %cst_26 : f32 to vector<8x1xf32>
    %76 = arith.addf %74, %75 : vector<8x1xf32>
    %77 = math.rsqrt %76 : vector<8x1xf32>
    %78 = arith.mulf %77, %59 : vector<8x1xf32>
    %79 = vector.broadcast %78 : vector<8x1xf32> to vector<8x256xf32>
    %80 = arith.mulf %69, %79 : vector<8x256xf32>
    %81 = vector.broadcast %60 : vector<8x1xf32> to vector<8x256xf32>
    %82 = arith.addf %80, %81 : vector<8x256xf32>
    %cst_27 = arith.constant 0.000000e+00 : f32
    %83 = vector.broadcast %cst_27 : f32 to vector<8x256xf32>
    %84 = arith.cmpf oge, %82, %83 : vector<8x256xf32>
    %85 = vector.broadcast %61 : vector<8x1xf32> to vector<8x256xf32>
    %86 = arith.mulf %85, %82 : vector<8x256xf32>
    %87 = arith.select %84, %82, %86 : vector<8x256xi1>, vector<8x256xf32>
    %c32 = arith.constant 32 : index
    %c256 = arith.constant 256 : index
    %88 = vector.load %arg10[%c32, %c256] : memref<40x768xf32, #tpu.memory_space<vmem>>, vector<8x256xf32>
    tpu.vector_store %arg10[%c32, %c256], %87 {strides = array<i32>} : memref<40x768xf32, #tpu.memory_space<vmem>>, vector<8x256xf32>,
    %c0_28 = arith.constant 0 : index
    %c0_29 = arith.constant 0 : index
    %c0_30 = arith.constant 0 : index
    %89 = vector.load %arg3[%c0_28, %c0_29, %c0_30] : memref<9x8x8xf32, #tpu.memory_space<vmem>>, vector<1x8x8xf32>
    %90 = vector.shape_cast %89 : vector<1x8x8xf32> to vector<8x8xf32>
    %c32_31 = arith.constant 32 : index
    %c239 = arith.constant 239 : index
    %91 = vector.load %arg10[%c32_31, %c239] : memref<40x768xf32, #tpu.memory_space<vmem>>, vector<8x256xf32>
    %cst_32 = arith.constant dense<0.000000e+00> : vector<8x256xf32>
    %92 = tpu.matmul %90, %91, %cst_32 {dimension_numbers = #tpu.dot_dimension_numbers<[1], [0], [0], [1], [0, 0, 1, 1], [], []>} : vector<8x8xf32>, vector<8x256xf32>, vector<8x256xf32> -> vector<8x256xf32>
    %c3 = arith.constant 3 : index
    %c0_33 = arith.constant 0 : index
    %c0_34 = arith.constant 0 : index
    %93 = vector.load %arg3[%c3, %c0_33, %c0_34] : memref<9x8x8xf32, #tpu.memory_space<vmem>>, vector<1x8x8xf32>
    %94 = vector.shape_cast %93 : vector<1x8x8xf32> to vector<8x8xf32>
    %c32_35 = arith.constant 32 : index
    %c255 = arith.constant 255 : index
    %95 = vector.load %arg10[%c32_35, %c255] : memref<40x768xf32, #tpu.memory_space<vmem>>, vector<8x256xf32>
    %cst_36 = arith.constant dense<0.000000e+00> : vector<8x256xf32>
    %96 = tpu.matmul %94, %95, %cst_36 {dimension_numbers = #tpu.dot_dimension_numbers<[1], [0], [0], [1], [0, 0, 1, 1], [], []>} : vector<8x8xf32>, vector<8x256xf32>, vector<8x256xf32> -> vector<8x256xf32>
    %97 = arith.addf %92, %96 : vector<8x256xf32>
    %c6 = arith.constant 6 : index
    %c0_37 = arith.constant 0 : index
    %c0_38 = arith.constant 0 : index
    %98 = vector.load %arg3[%c6, %c0_37, %c0_38] : memref<9x8x8xf32, #tpu.memory_space<vmem>>, vector<1x8x8xf32>
    %99 = vector.shape_cast %98 : vector<1x8x8xf32> to vector<8x8xf32>
    %c32_39 = arith.constant 32 : index
    %c271 = arith.constant 271 : index
    %100 = vector.load %arg10[%c32_39, %c271] : memref<40x768xf32, #tpu.memory_space<vmem>>, vector<8x256xf32>
    %cst_40 = arith.constant dense<0.000000e+00> : vector<8x256xf32>
    %101 = tpu.matmul %99, %100, %cst_40 {dimension_numbers = #tpu.dot_dimension_numbers<[1], [0], [0], [1], [0, 0, 1, 1], [], []>} : vector<8x8xf32>, vector<8x256xf32>, vector<8x256xf32> -> vector<8x256xf32>
    %102 = arith.addf %97, %101 : vector<8x256xf32>
    %103 = vector.broadcast %23 : vector<1x256xf32> to vector<8x256xf32>
    %104 = arith.mulf %102, %103 : vector<8x256xf32>
    %c1 = arith.constant 1 : index
    %c0_41 = arith.constant 0 : index
    %c0_42 = arith.constant 0 : index
    %105 = vector.load %arg3[%c1, %c0_41, %c0_42] : memref<9x8x8xf32, #tpu.memory_space<vmem>>, vector<1x8x8xf32>
    %106 = vector.shape_cast %105 : vector<1x8x8xf32> to vector<8x8xf32>
    %c32_43 = arith.constant 32 : index
    %c240 = arith.constant 240 : index
    %107 = vector.load %arg10[%c32_43, %c240] : memref<40x768xf32, #tpu.memory_space<vmem>>, vector<8x256xf32>
    %cst_44 = arith.constant dense<0.000000e+00> : vector<8x256xf32>
    %108 = tpu.matmul %106, %107, %cst_44 {dimension_numbers = #tpu.dot_dimension_numbers<[1], [0], [0], [1], [0, 0, 1, 1], [], []>} : vector<8x8xf32>, vector<8x256xf32>, vector<8x256xf32> -> vector<8x256xf32>
    %c4 = arith.constant 4 : index
    %c0_45 = arith.constant 0 : index
    %c0_46 = arith.constant 0 : index
    %109 = vector.load %arg3[%c4, %c0_45, %c0_46] : memref<9x8x8xf32, #tpu.memory_space<vmem>>, vector<1x8x8xf32>
    %110 = vector.shape_cast %109 : vector<1x8x8xf32> to vector<8x8xf32>
    %c32_47 = arith.constant 32 : index
    %c256_48 = arith.constant 256 : index
    %111 = vector.load %arg10[%c32_47, %c256_48] : memref<40x768xf32, #tpu.memory_space<vmem>>, vector<8x256xf32>
    %cst_49 = arith.constant dense<0.000000e+00> : vector<8x256xf32>
    %112 = tpu.matmul %110, %111, %cst_49 {dimension_numbers = #tpu.dot_dimension_numbers<[1], [0], [0], [1], [0, 0, 1, 1], [], []>} : vector<8x8xf32>, vector<8x256xf32>, vector<8x256xf32> -> vector<8x256xf32>
    %113 = arith.addf %108, %112 : vector<8x256xf32>
    %c7 = arith.constant 7 : index
    %c0_50 = arith.constant 0 : index
    %c0_51 = arith.constant 0 : index
    %114 = vector.load %arg3[%c7, %c0_50, %c0_51] : memref<9x8x8xf32, #tpu.memory_space<vmem>>, vector<1x8x8xf32>
    %115 = vector.shape_cast %114 : vector<1x8x8xf32> to vector<8x8xf32>
    %c32_52 = arith.constant 32 : index
    %c272 = arith.constant 272 : index
    %116 = vector.load %arg10[%c32_52, %c272] : memref<40x768xf32, #tpu.memory_space<vmem>>, vector<8x256xf32>
    %cst_53 = arith.constant dense<0.000000e+00> : vector<8x256xf32>
    %117 = tpu.matmul %115, %116, %cst_53 {dimension_numbers = #tpu.dot_dimension_numbers<[1], [0], [0], [1], [0, 0, 1, 1], [], []>} : vector<8x8xf32>, vector<8x256xf32>, vector<8x256xf32> -> vector<8x256xf32>
    %118 = arith.addf %113, %117 : vector<8x256xf32>
    %c2 = arith.constant 2 : index
    %c0_54 = arith.constant 0 : index
    %c0_55 = arith.constant 0 : index
    %119 = vector.load %arg3[%c2, %c0_54, %c0_55] : memref<9x8x8xf32, #tpu.memory_space<vmem>>, vector<1x8x8xf32>
    %120 = vector.shape_cast %119 : vector<1x8x8xf32> to vector<8x8xf32>
    %c32_56 = arith.constant 32 : index
    %c241 = arith.constant 241 : index
    %121 = vector.load %arg10[%c32_56, %c241] : memref<40x768xf32, #tpu.memory_space<vmem>>, vector<8x256xf32>
    %cst_57 = arith.constant dense<0.000000e+00> : vector<8x256xf32>
    %122 = tpu.matmul %120, %121, %cst_57 {dimension_numbers = #tpu.dot_dimension_numbers<[1], [0], [0], [1], [0, 0, 1, 1], [], []>} : vector<8x8xf32>, vector<8x256xf32>, vector<8x256xf32> -> vector<8x256xf32>
    %c5 = arith.constant 5 : index
    %c0_58 = arith.constant 0 : index
    %c0_59 = arith.constant 0 : index
    %123 = vector.load %arg3[%c5, %c0_58, %c0_59] : memref<9x8x8xf32, #tpu.memory_space<vmem>>, vector<1x8x8xf32>
    %124 = vector.shape_cast %123 : vector<1x8x8xf32> to vector<8x8xf32>
    %c32_60 = arith.constant 32 : index
    %c257 = arith.constant 257 : index
    %125 = vector.load %arg10[%c32_60, %c257] : memref<40x768xf32, #tpu.memory_space<vmem>>, vector<8x256xf32>
    %cst_61 = arith.constant dense<0.000000e+00> : vector<8x256xf32>
    %126 = tpu.matmul %124, %125, %cst_61 {dimension_numbers = #tpu.dot_dimension_numbers<[1], [0], [0], [1], [0, 0, 1, 1], [], []>} : vector<8x8xf32>, vector<8x256xf32>, vector<8x256xf32> -> vector<8x256xf32>
    %127 = arith.addf %122, %126 : vector<8x256xf32>
    %c8 = arith.constant 8 : index
    %c0_62 = arith.constant 0 : index
    %c0_63 = arith.constant 0 : index
    %128 = vector.load %arg3[%c8, %c0_62, %c0_63] : memref<9x8x8xf32, #tpu.memory_space<vmem>>, vector<1x8x8xf32>
    %129 = vector.shape_cast %128 : vector<1x8x8xf32> to vector<8x8xf32>
    %c32_64 = arith.constant 32 : index
    %c273 = arith.constant 273 : index
    %130 = vector.load %arg10[%c32_64, %c273] : memref<40x768xf32, #tpu.memory_space<vmem>>, vector<8x256xf32>
    %cst_65 = arith.constant dense<0.000000e+00> : vector<8x256xf32>
    %131 = tpu.matmul %129, %130, %cst_65 {dimension_numbers = #tpu.dot_dimension_numbers<[1], [0], [0], [1], [0, 0, 1, 1], [], []>} : vector<8x8xf32>, vector<8x256xf32>, vector<8x256xf32> -> vector<8x256xf32>
    %132 = arith.addf %127, %131 : vector<8x256xf32>
    %133 = vector.broadcast %27 : vector<1x256xf32> to vector<8x256xf32>
    %134 = arith.mulf %132, %133 : vector<8x256xf32>
    %135 = arith.addf %104, %118 : vector<8x256xf32>
    %136 = arith.addf %135, %134 : vector<8x256xf32>
    %c1_66 = arith.constant 1 : index
    %c0_67 = arith.constant 0 : index
    %c0_68 = arith.constant 0 : index
    %137 = vector.load %arg8[%c1_66, %c0_67, %c0_68] : memref<6x8x4xf32, #tpu.memory_space<vmem>>, vector<1x8x4xf32>
    %138 = vector.shape_cast %137 : vector<1x8x4xf32> to vector<8x4xf32>
    %139 = vector.extract_strided_slice %138 {offsets = [0, 0], sizes = [8, 1], strides = [1, 1]} : vector<8x4xf32> to vector<8x1xf32>
    %140 = vector.extract_strided_slice %138 {offsets = [0, 1], sizes = [8, 1], strides = [1, 1]} : vector<8x4xf32> to vector<8x1xf32>
    %141 = vector.extract_strided_slice %138 {offsets = [0, 2], sizes = [8, 1], strides = [1, 1]} : vector<8x4xf32> to vector<8x1xf32>
    %142 = vector.extract_strided_slice %138 {offsets = [0, 3], sizes = [8, 1], strides = [1, 1]} : vector<8x4xf32> to vector<8x1xf32>
    %143 = vector.broadcast %139 : vector<8x1xf32> to vector<8x256xf32>
    %144 = arith.addf %136, %143 : vector<8x256xf32>
    %cst_69 = arith.constant dense<0.000000e+00> : vector<8xf32>
    %145 = vector.multi_reduction <add>, %144, %cst_69 [1] : vector<8x256xf32> to vector<8xf32>
    %146 = vector.shape_cast %145 : vector<8xf32> to vector<8x1xf32>
    %cst_70 = arith.constant 3.906250e-03 : f32
    %147 = vector.broadcast %cst_70 : f32 to vector<8x1xf32>
    %148 = arith.mulf %146, %147 : vector<8x1xf32>
    %149 = vector.broadcast %148 : vector<8x1xf32> to vector<8x256xf32>
    %150 = arith.subf %144, %149 : vector<8x256xf32>
    %151 = arith.mulf %150, %150 : vector<8x256xf32>
    %cst_71 = arith.constant dense<0.000000e+00> : vector<8xf32>
    %152 = vector.multi_reduction <add>, %151, %cst_71 [1] : vector<8x256xf32> to vector<8xf32>
    %153 = vector.shape_cast %152 : vector<8xf32> to vector<8x1xf32>
    %cst_72 = arith.constant 3.906250e-03 : f32
    %154 = vector.broadcast %cst_72 : f32 to vector<8x1xf32>
    %155 = arith.mulf %153, %154 : vector<8x1xf32>
    %cst_73 = arith.constant 9.99999974E-6 : f32
    %156 = vector.broadcast %cst_73 : f32 to vector<8x1xf32>
    %157 = arith.addf %155, %156 : vector<8x1xf32>
    %158 = math.rsqrt %157 : vector<8x1xf32>
    %159 = arith.mulf %158, %140 : vector<8x1xf32>
    %160 = vector.broadcast %159 : vector<8x1xf32> to vector<8x256xf32>
    %161 = arith.mulf %150, %160 : vector<8x256xf32>
    %162 = vector.broadcast %141 : vector<8x1xf32> to vector<8x256xf32>
    %163 = arith.addf %161, %162 : vector<8x256xf32>
    %cst_74 = arith.constant 0.000000e+00 : f32
    %164 = vector.broadcast %cst_74 : f32 to vector<8x256xf32>
    %165 = arith.cmpf oge, %163, %164 : vector<8x256xf32>
    %166 = vector.broadcast %142 : vector<8x1xf32> to vector<8x256xf32>
    %167 = arith.mulf %166, %163 : vector<8x256xf32>
    %168 = arith.select %165, %163, %167 : vector<8x256xi1>, vector<8x256xf32>
    %c24 = arith.constant 24 : index
    %c256_75 = arith.constant 256 : index
    %169 = vector.load %arg10[%c24, %c256_75] : memref<40x768xf32, #tpu.memory_space<vmem>>, vector<8x256xf32>
    tpu.vector_store %arg10[%c24, %c256_75], %168 {strides = array<i32>} : memref<40x768xf32, #tpu.memory_space<vmem>>, vector<8x256xf32>,
    %c0_76 = arith.constant 0 : index
    %c0_77 = arith.constant 0 : index
    %c0_78 = arith.constant 0 : index
    %170 = vector.load %arg4[%c0_76, %c0_77, %c0_78] : memref<9x8x16xf32, #tpu.memory_space<vmem>>, vector<1x8x16xf32>
    %171 = vector.shape_cast %170 : vector<1x8x16xf32> to vector<8x16xf32>
    %c24_79 = arith.constant 24 : index
    %c223 = arith.constant 223 : index
    %172 = vector.load %arg10[%c24_79, %c223] : memref<40x768xf32, #tpu.memory_space<vmem>>, vector<16x256xf32>
    %cst_80 = arith.constant dense<0.000000e+00> : vector<8x256xf32>
    %173 = tpu.matmul %171, %172, %cst_80 {dimension_numbers = #tpu.dot_dimension_numbers<[1], [0], [0], [1], [0, 0, 1, 1], [], []>} : vector<8x16xf32>, vector<16x256xf32>, vector<8x256xf32> -> vector<8x256xf32>
    %c3_81 = arith.constant 3 : index
    %c0_82 = arith.constant 0 : index
    %c0_83 = arith.constant 0 : index
    %174 = vector.load %arg4[%c3_81, %c0_82, %c0_83] : memref<9x8x16xf32, #tpu.memory_space<vmem>>, vector<1x8x16xf32>
    %175 = vector.shape_cast %174 : vector<1x8x16xf32> to vector<8x16xf32>
    %c24_84 = arith.constant 24 : index
    %c255_85 = arith.constant 255 : index
    %176 = vector.load %arg10[%c24_84, %c255_85] : memref<40x768xf32, #tpu.memory_space<vmem>>, vector<16x256xf32>
    %cst_86 = arith.constant dense<0.000000e+00> : vector<8x256xf32>
    %177 = tpu.matmul %175, %176, %cst_86 {dimension_numbers = #tpu.dot_dimension_numbers<[1], [0], [0], [1], [0, 0, 1, 1], [], []>} : vector<8x16xf32>, vector<16x256xf32>, vector<8x256xf32> -> vector<8x256xf32>
    %178 = arith.addf %173, %177 : vector<8x256xf32>
    %c6_87 = arith.constant 6 : index
    %c0_88 = arith.constant 0 : index
    %c0_89 = arith.constant 0 : index
    %179 = vector.load %arg4[%c6_87, %c0_88, %c0_89] : memref<9x8x16xf32, #tpu.memory_space<vmem>>, vector<1x8x16xf32>
    %180 = vector.shape_cast %179 : vector<1x8x16xf32> to vector<8x16xf32>
    %c24_90 = arith.constant 24 : index
    %c287 = arith.constant 287 : index
    %181 = vector.load %arg10[%c24_90, %c287] : memref<40x768xf32, #tpu.memory_space<vmem>>, vector<16x256xf32>
    %cst_91 = arith.constant dense<0.000000e+00> : vector<8x256xf32>
    %182 = tpu.matmul %180, %181, %cst_91 {dimension_numbers = #tpu.dot_dimension_numbers<[1], [0], [0], [1], [0, 0, 1, 1], [], []>} : vector<8x16xf32>, vector<16x256xf32>, vector<8x256xf32> -> vector<8x256xf32>
    %183 = arith.addf %178, %182 : vector<8x256xf32>
    %184 = vector.broadcast %23 : vector<1x256xf32> to vector<8x256xf32>
    %185 = arith.mulf %183, %184 : vector<8x256xf32>
    %c1_92 = arith.constant 1 : index
    %c0_93 = arith.constant 0 : index
    %c0_94 = arith.constant 0 : index
    %186 = vector.load %arg4[%c1_92, %c0_93, %c0_94] : memref<9x8x16xf32, #tpu.memory_space<vmem>>, vector<1x8x16xf32>
    %187 = vector.shape_cast %186 : vector<1x8x16xf32> to vector<8x16xf32>
    %c24_95 = arith.constant 24 : index
    %c224 = arith.constant 224 : index
    %188 = vector.load %arg10[%c24_95, %c224] : memref<40x768xf32, #tpu.memory_space<vmem>>, vector<16x256xf32>
    %cst_96 = arith.constant dense<0.000000e+00> : vector<8x256xf32>
    %189 = tpu.matmul %187, %188, %cst_96 {dimension_numbers = #tpu.dot_dimension_numbers<[1], [0], [0], [1], [0, 0, 1, 1], [], []>} : vector<8x16xf32>, vector<16x256xf32>, vector<8x256xf32> -> vector<8x256xf32>
    %c4_97 = arith.constant 4 : index
    %c0_98 = arith.constant 0 : index
    %c0_99 = arith.constant 0 : index
    %190 = vector.load %arg4[%c4_97, %c0_98, %c0_99] : memref<9x8x16xf32, #tpu.memory_space<vmem>>, vector<1x8x16xf32>
    %191 = vector.shape_cast %190 : vector<1x8x16xf32> to vector<8x16xf32>
    %c24_100 = arith.constant 24 : index
    %c256_101 = arith.constant 256 : index
    %192 = vector.load %arg10[%c24_100, %c256_101] : memref<40x768xf32, #tpu.memory_space<vmem>>, vector<16x256xf32>
    %cst_102 = arith.constant dense<0.000000e+00> : vector<8x256xf32>
    %193 = tpu.matmul %191, %192, %cst_102 {dimension_numbers = #tpu.dot_dimension_numbers<[1], [0], [0], [1], [0, 0, 1, 1], [], []>} : vector<8x16xf32>, vector<16x256xf32>, vector<8x256xf32> -> vector<8x256xf32>
    %194 = arith.addf %189, %193 : vector<8x256xf32>
    %c7_103 = arith.constant 7 : index
    %c0_104 = arith.constant 0 : index
    %c0_105 = arith.constant 0 : index
    %195 = vector.load %arg4[%c7_103, %c0_104, %c0_105] : memref<9x8x16xf32, #tpu.memory_space<vmem>>, vector<1x8x16xf32>
    %196 = vector.shape_cast %195 : vector<1x8x16xf32> to vector<8x16xf32>
    %c24_106 = arith.constant 24 : index
    %c288 = arith.constant 288 : index
    %197 = vector.load %arg10[%c24_106, %c288] : memref<40x768xf32, #tpu.memory_space<vmem>>, vector<16x256xf32>
    %cst_107 = arith.constant dense<0.000000e+00> : vector<8x256xf32>
    %198 = tpu.matmul %196, %197, %cst_107 {dimension_numbers = #tpu.dot_dimension_numbers<[1], [0], [0], [1], [0, 0, 1, 1], [], []>} : vector<8x16xf32>, vector<16x256xf32>, vector<8x256xf32> -> vector<8x256xf32>
    %199 = arith.addf %194, %198 : vector<8x256xf32>
    %c2_108 = arith.constant 2 : index
    %c0_109 = arith.constant 0 : index
    %c0_110 = arith.constant 0 : index
    %200 = vector.load %arg4[%c2_108, %c0_109, %c0_110] : memref<9x8x16xf32, #tpu.memory_space<vmem>>, vector<1x8x16xf32>
    %201 = vector.shape_cast %200 : vector<1x8x16xf32> to vector<8x16xf32>
    %c24_111 = arith.constant 24 : index
    %c225 = arith.constant 225 : index
    %202 = vector.load %arg10[%c24_111, %c225] : memref<40x768xf32, #tpu.memory_space<vmem>>, vector<16x256xf32>
    %cst_112 = arith.constant dense<0.000000e+00> : vector<8x256xf32>
    %203 = tpu.matmul %201, %202, %cst_112 {dimension_numbers = #tpu.dot_dimension_numbers<[1], [0], [0], [1], [0, 0, 1, 1], [], []>} : vector<8x16xf32>, vector<16x256xf32>, vector<8x256xf32> -> vector<8x256xf32>
    %c5_113 = arith.constant 5 : index
    %c0_114 = arith.constant 0 : index
    %c0_115 = arith.constant 0 : index
    %204 = vector.load %arg4[%c5_113, %c0_114, %c0_115] : memref<9x8x16xf32, #tpu.memory_space<vmem>>, vector<1x8x16xf32>
    %205 = vector.shape_cast %204 : vector<1x8x16xf32> to vector<8x16xf32>
    %c24_116 = arith.constant 24 : index
    %c257_117 = arith.constant 257 : index
    %206 = vector.load %arg10[%c24_116, %c257_117] : memref<40x768xf32, #tpu.memory_space<vmem>>, vector<16x256xf32>
    %cst_118 = arith.constant dense<0.000000e+00> : vector<8x256xf32>
    %207 = tpu.matmul %205, %206, %cst_118 {dimension_numbers = #tpu.dot_dimension_numbers<[1], [0], [0], [1], [0, 0, 1, 1], [], []>} : vector<8x16xf32>, vector<16x256xf32>, vector<8x256xf32> -> vector<8x256xf32>
    %208 = arith.addf %203, %207 : vector<8x256xf32>
    %c8_119 = arith.constant 8 : index
    %c0_120 = arith.constant 0 : index
    %c0_121 = arith.constant 0 : index
    %209 = vector.load %arg4[%c8_119, %c0_120, %c0_121] : memref<9x8x16xf32, #tpu.memory_space<vmem>>, vector<1x8x16xf32>
    %210 = vector.shape_cast %209 : vector<1x8x16xf32> to vector<8x16xf32>
    %c24_122 = arith.constant 24 : index
    %c289 = arith.constant 289 : index
    %211 = vector.load %arg10[%c24_122, %c289] : memref<40x768xf32, #tpu.memory_space<vmem>>, vector<16x256xf32>
    %cst_123 = arith.constant dense<0.000000e+00> : vector<8x256xf32>
    %212 = tpu.matmul %210, %211, %cst_123 {dimension_numbers = #tpu.dot_dimension_numbers<[1], [0], [0], [1], [0, 0, 1, 1], [], []>} : vector<8x16xf32>, vector<16x256xf32>, vector<8x256xf32> -> vector<8x256xf32>
    %213 = arith.addf %208, %212 : vector<8x256xf32>
    %214 = vector.broadcast %27 : vector<1x256xf32> to vector<8x256xf32>
    %215 = arith.mulf %213, %214 : vector<8x256xf32>
    %216 = arith.addf %185, %199 : vector<8x256xf32>
    %217 = arith.addf %216, %215 : vector<8x256xf32>
    %c2_124 = arith.constant 2 : index
    %c0_125 = arith.constant 0 : index
    %c0_126 = arith.constant 0 : index
    %218 = vector.load %arg8[%c2_124, %c0_125, %c0_126] : memref<6x8x4xf32, #tpu.memory_space<vmem>>, vector<1x8x4xf32>
    %219 = vector.shape_cast %218 : vector<1x8x4xf32> to vector<8x4xf32>
    %220 = vector.extract_strided_slice %219 {offsets = [0, 0], sizes = [8, 1], strides = [1, 1]} : vector<8x4xf32> to vector<8x1xf32>
    %221 = vector.extract_strided_slice %219 {offsets = [0, 1], sizes = [8, 1], strides = [1, 1]} : vector<8x4xf32> to vector<8x1xf32>
    %222 = vector.extract_strided_slice %219 {offsets = [0, 2], sizes = [8, 1], strides = [1, 1]} : vector<8x4xf32> to vector<8x1xf32>
    %223 = vector.extract_strided_slice %219 {offsets = [0, 3], sizes = [8, 1], strides = [1, 1]} : vector<8x4xf32> to vector<8x1xf32>
    %224 = vector.broadcast %220 : vector<8x1xf32> to vector<8x256xf32>
    %225 = arith.addf %217, %224 : vector<8x256xf32>
    %cst_127 = arith.constant dense<0.000000e+00> : vector<8xf32>
    %226 = vector.multi_reduction <add>, %225, %cst_127 [1] : vector<8x256xf32> to vector<8xf32>
    %227 = vector.shape_cast %226 : vector<8xf32> to vector<8x1xf32>
    %cst_128 = arith.constant 3.906250e-03 : f32
    %228 = vector.broadcast %cst_128 : f32 to vector<8x1xf32>
    %229 = arith.mulf %227, %228 : vector<8x1xf32>
    %230 = vector.broadcast %229 : vector<8x1xf32> to vector<8x256xf32>
    %231 = arith.subf %225, %230 : vector<8x256xf32>
    %232 = arith.mulf %231, %231 : vector<8x256xf32>
    %cst_129 = arith.constant dense<0.000000e+00> : vector<8xf32>
    %233 = vector.multi_reduction <add>, %232, %cst_129 [1] : vector<8x256xf32> to vector<8xf32>
    %234 = vector.shape_cast %233 : vector<8xf32> to vector<8x1xf32>
    %cst_130 = arith.constant 3.906250e-03 : f32
    %235 = vector.broadcast %cst_130 : f32 to vector<8x1xf32>
    %236 = arith.mulf %234, %235 : vector<8x1xf32>
    %cst_131 = arith.constant 9.99999974E-6 : f32
    %237 = vector.broadcast %cst_131 : f32 to vector<8x1xf32>
    %238 = arith.addf %236, %237 : vector<8x1xf32>
    %239 = math.rsqrt %238 : vector<8x1xf32>
    %240 = arith.mulf %239, %221 : vector<8x1xf32>
    %241 = vector.broadcast %240 : vector<8x1xf32> to vector<8x256xf32>
    %242 = arith.mulf %231, %241 : vector<8x256xf32>
    %243 = vector.broadcast %222 : vector<8x1xf32> to vector<8x256xf32>
    %244 = arith.addf %242, %243 : vector<8x256xf32>
    %cst_132 = arith.constant 0.000000e+00 : f32
    %245 = vector.broadcast %cst_132 : f32 to vector<8x256xf32>
    %246 = arith.cmpf oge, %244, %245 : vector<8x256xf32>
    %247 = vector.broadcast %223 : vector<8x1xf32> to vector<8x256xf32>
    %248 = arith.mulf %247, %244 : vector<8x256xf32>
    %249 = arith.select %246, %244, %248 : vector<8x256xi1>, vector<8x256xf32>
    %c16 = arith.constant 16 : index
    %c256_133 = arith.constant 256 : index
    %250 = vector.load %arg10[%c16, %c256_133] : memref<40x768xf32, #tpu.memory_space<vmem>>, vector<8x256xf32>
    tpu.vector_store %arg10[%c16, %c256_133], %249 {strides = array<i32>} : memref<40x768xf32, #tpu.memory_space<vmem>>, vector<8x256xf32>,
    %c0_134 = arith.constant 0 : index
    %c0_135 = arith.constant 0 : index
    %c0_136 = arith.constant 0 : index
    %251 = vector.load %arg5[%c0_134, %c0_135, %c0_136] : memref<9x8x24xf32, #tpu.memory_space<vmem>>, vector<1x8x24xf32>
    %252 = vector.shape_cast %251 : vector<1x8x24xf32> to vector<8x24xf32>
    %c16_137 = arith.constant 16 : index
    %c191 = arith.constant 191 : index
    %253 = vector.load %arg10[%c16_137, %c191] : memref<40x768xf32, #tpu.memory_space<vmem>>, vector<24x256xf32>
    %cst_138 = arith.constant dense<0.000000e+00> : vector<8x256xf32>
    %254 = tpu.matmul %252, %253, %cst_138 {dimension_numbers = #tpu.dot_dimension_numbers<[1], [0], [0], [1], [0, 0, 1, 1], [], []>} : vector<8x24xf32>, vector<24x256xf32>, vector<8x256xf32> -> vector<8x256xf32>
    %c3_139 = arith.constant 3 : index
    %c0_140 = arith.constant 0 : index
    %c0_141 = arith.constant 0 : index
    %255 = vector.load %arg5[%c3_139, %c0_140, %c0_141] : memref<9x8x24xf32, #tpu.memory_space<vmem>>, vector<1x8x24xf32>
    %256 = vector.shape_cast %255 : vector<1x8x24xf32> to vector<8x24xf32>
    %c16_142 = arith.constant 16 : index
    %c255_143 = arith.constant 255 : index
    %257 = vector.load %arg10[%c16_142, %c255_143] : memref<40x768xf32, #tpu.memory_space<vmem>>, vector<24x256xf32>
    %cst_144 = arith.constant dense<0.000000e+00> : vector<8x256xf32>
    %258 = tpu.matmul %256, %257, %cst_144 {dimension_numbers = #tpu.dot_dimension_numbers<[1], [0], [0], [1], [0, 0, 1, 1], [], []>} : vector<8x24xf32>, vector<24x256xf32>, vector<8x256xf32> -> vector<8x256xf32>
    %259 = arith.addf %254, %258 : vector<8x256xf32>
    %c6_145 = arith.constant 6 : index
    %c0_146 = arith.constant 0 : index
    %c0_147 = arith.constant 0 : index
    %260 = vector.load %arg5[%c6_145, %c0_146, %c0_147] : memref<9x8x24xf32, #tpu.memory_space<vmem>>, vector<1x8x24xf32>
    %261 = vector.shape_cast %260 : vector<1x8x24xf32> to vector<8x24xf32>
    %c16_148 = arith.constant 16 : index
    %c319 = arith.constant 319 : index
    %262 = vector.load %arg10[%c16_148, %c319] : memref<40x768xf32, #tpu.memory_space<vmem>>, vector<24x256xf32>
    %cst_149 = arith.constant dense<0.000000e+00> : vector<8x256xf32>
    %263 = tpu.matmul %261, %262, %cst_149 {dimension_numbers = #tpu.dot_dimension_numbers<[1], [0], [0], [1], [0, 0, 1, 1], [], []>} : vector<8x24xf32>, vector<24x256xf32>, vector<8x256xf32> -> vector<8x256xf32>
    %264 = arith.addf %259, %263 : vector<8x256xf32>
    %265 = vector.broadcast %23 : vector<1x256xf32> to vector<8x256xf32>
    %266 = arith.mulf %264, %265 : vector<8x256xf32>
    %c1_150 = arith.constant 1 : index
    %c0_151 = arith.constant 0 : index
    %c0_152 = arith.constant 0 : index
    %267 = vector.load %arg5[%c1_150, %c0_151, %c0_152] : memref<9x8x24xf32, #tpu.memory_space<vmem>>, vector<1x8x24xf32>
    %268 = vector.shape_cast %267 : vector<1x8x24xf32> to vector<8x24xf32>
    %c16_153 = arith.constant 16 : index
    %c192 = arith.constant 192 : index
    %269 = vector.load %arg10[%c16_153, %c192] : memref<40x768xf32, #tpu.memory_space<vmem>>, vector<24x256xf32>
    %cst_154 = arith.constant dense<0.000000e+00> : vector<8x256xf32>
    %270 = tpu.matmul %268, %269, %cst_154 {dimension_numbers = #tpu.dot_dimension_numbers<[1], [0], [0], [1], [0, 0, 1, 1], [], []>} : vector<8x24xf32>, vector<24x256xf32>, vector<8x256xf32> -> vector<8x256xf32>
    %c4_155 = arith.constant 4 : index
    %c0_156 = arith.constant 0 : index
    %c0_157 = arith.constant 0 : index
    %271 = vector.load %arg5[%c4_155, %c0_156, %c0_157] : memref<9x8x24xf32, #tpu.memory_space<vmem>>, vector<1x8x24xf32>
    %272 = vector.shape_cast %271 : vector<1x8x24xf32> to vector<8x24xf32>
    %c16_158 = arith.constant 16 : index
    %c256_159 = arith.constant 256 : index
    %273 = vector.load %arg10[%c16_158, %c256_159] : memref<40x768xf32, #tpu.memory_space<vmem>>, vector<24x256xf32>
    %cst_160 = arith.constant dense<0.000000e+00> : vector<8x256xf32>
    %274 = tpu.matmul %272, %273, %cst_160 {dimension_numbers = #tpu.dot_dimension_numbers<[1], [0], [0], [1], [0, 0, 1, 1], [], []>} : vector<8x24xf32>, vector<24x256xf32>, vector<8x256xf32> -> vector<8x256xf32>
    %275 = arith.addf %270, %274 : vector<8x256xf32>
    %c7_161 = arith.constant 7 : index
    %c0_162 = arith.constant 0 : index
    %c0_163 = arith.constant 0 : index
    %276 = vector.load %arg5[%c7_161, %c0_162, %c0_163] : memref<9x8x24xf32, #tpu.memory_space<vmem>>, vector<1x8x24xf32>
    %277 = vector.shape_cast %276 : vector<1x8x24xf32> to vector<8x24xf32>
    %c16_164 = arith.constant 16 : index
    %c320 = arith.constant 320 : index
    %278 = vector.load %arg10[%c16_164, %c320] : memref<40x768xf32, #tpu.memory_space<vmem>>, vector<24x256xf32>
    %cst_165 = arith.constant dense<0.000000e+00> : vector<8x256xf32>
    %279 = tpu.matmul %277, %278, %cst_165 {dimension_numbers = #tpu.dot_dimension_numbers<[1], [0], [0], [1], [0, 0, 1, 1], [], []>} : vector<8x24xf32>, vector<24x256xf32>, vector<8x256xf32> -> vector<8x256xf32>
    %280 = arith.addf %275, %279 : vector<8x256xf32>
    %c2_166 = arith.constant 2 : index
    %c0_167 = arith.constant 0 : index
    %c0_168 = arith.constant 0 : index
    %281 = vector.load %arg5[%c2_166, %c0_167, %c0_168] : memref<9x8x24xf32, #tpu.memory_space<vmem>>, vector<1x8x24xf32>
    %282 = vector.shape_cast %281 : vector<1x8x24xf32> to vector<8x24xf32>
    %c16_169 = arith.constant 16 : index
    %c193 = arith.constant 193 : index
    %283 = vector.load %arg10[%c16_169, %c193] : memref<40x768xf32, #tpu.memory_space<vmem>>, vector<24x256xf32>
    %cst_170 = arith.constant dense<0.000000e+00> : vector<8x256xf32>
    %284 = tpu.matmul %282, %283, %cst_170 {dimension_numbers = #tpu.dot_dimension_numbers<[1], [0], [0], [1], [0, 0, 1, 1], [], []>} : vector<8x24xf32>, vector<24x256xf32>, vector<8x256xf32> -> vector<8x256xf32>
    %c5_171 = arith.constant 5 : index
    %c0_172 = arith.constant 0 : index
    %c0_173 = arith.constant 0 : index
    %285 = vector.load %arg5[%c5_171, %c0_172, %c0_173] : memref<9x8x24xf32, #tpu.memory_space<vmem>>, vector<1x8x24xf32>
    %286 = vector.shape_cast %285 : vector<1x8x24xf32> to vector<8x24xf32>
    %c16_174 = arith.constant 16 : index
    %c257_175 = arith.constant 257 : index
    %287 = vector.load %arg10[%c16_174, %c257_175] : memref<40x768xf32, #tpu.memory_space<vmem>>, vector<24x256xf32>
    %cst_176 = arith.constant dense<0.000000e+00> : vector<8x256xf32>
    %288 = tpu.matmul %286, %287, %cst_176 {dimension_numbers = #tpu.dot_dimension_numbers<[1], [0], [0], [1], [0, 0, 1, 1], [], []>} : vector<8x24xf32>, vector<24x256xf32>, vector<8x256xf32> -> vector<8x256xf32>
    %289 = arith.addf %284, %288 : vector<8x256xf32>
    %c8_177 = arith.constant 8 : index
    %c0_178 = arith.constant 0 : index
    %c0_179 = arith.constant 0 : index
    %290 = vector.load %arg5[%c8_177, %c0_178, %c0_179] : memref<9x8x24xf32, #tpu.memory_space<vmem>>, vector<1x8x24xf32>
    %291 = vector.shape_cast %290 : vector<1x8x24xf32> to vector<8x24xf32>
    %c16_180 = arith.constant 16 : index
    %c321 = arith.constant 321 : index
    %292 = vector.load %arg10[%c16_180, %c321] : memref<40x768xf32, #tpu.memory_space<vmem>>, vector<24x256xf32>
    %cst_181 = arith.constant dense<0.000000e+00> : vector<8x256xf32>
    %293 = tpu.matmul %291, %292, %cst_181 {dimension_numbers = #tpu.dot_dimension_numbers<[1], [0], [0], [1], [0, 0, 1, 1], [], []>} : vector<8x24xf32>, vector<24x256xf32>, vector<8x256xf32> -> vector<8x256xf32>
    %294 = arith.addf %289, %293 : vector<8x256xf32>
    %295 = vector.broadcast %27 : vector<1x256xf32> to vector<8x256xf32>
    %296 = arith.mulf %294, %295 : vector<8x256xf32>
    %297 = arith.addf %266, %280 : vector<8x256xf32>
    %298 = arith.addf %297, %296 : vector<8x256xf32>
    %c3_182 = arith.constant 3 : index
    %c0_183 = arith.constant 0 : index
    %c0_184 = arith.constant 0 : index
    %299 = vector.load %arg8[%c3_182, %c0_183, %c0_184] : memref<6x8x4xf32, #tpu.memory_space<vmem>>, vector<1x8x4xf32>
    %300 = vector.shape_cast %299 : vector<1x8x4xf32> to vector<8x4xf32>
    %301 = vector.extract_strided_slice %300 {offsets = [0, 0], sizes = [8, 1], strides = [1, 1]} : vector<8x4xf32> to vector<8x1xf32>
    %302 = vector.extract_strided_slice %300 {offsets = [0, 1], sizes = [8, 1], strides = [1, 1]} : vector<8x4xf32> to vector<8x1xf32>
    %303 = vector.extract_strided_slice %300 {offsets = [0, 2], sizes = [8, 1], strides = [1, 1]} : vector<8x4xf32> to vector<8x1xf32>
    %304 = vector.extract_strided_slice %300 {offsets = [0, 3], sizes = [8, 1], strides = [1, 1]} : vector<8x4xf32> to vector<8x1xf32>
    %305 = vector.broadcast %301 : vector<8x1xf32> to vector<8x256xf32>
    %306 = arith.addf %298, %305 : vector<8x256xf32>
    %cst_185 = arith.constant dense<0.000000e+00> : vector<8xf32>
    %307 = vector.multi_reduction <add>, %306, %cst_185 [1] : vector<8x256xf32> to vector<8xf32>
    %308 = vector.shape_cast %307 : vector<8xf32> to vector<8x1xf32>
    %cst_186 = arith.constant 3.906250e-03 : f32
    %309 = vector.broadcast %cst_186 : f32 to vector<8x1xf32>
    %310 = arith.mulf %308, %309 : vector<8x1xf32>
    %311 = vector.broadcast %310 : vector<8x1xf32> to vector<8x256xf32>
    %312 = arith.subf %306, %311 : vector<8x256xf32>
    %313 = arith.mulf %312, %312 : vector<8x256xf32>
    %cst_187 = arith.constant dense<0.000000e+00> : vector<8xf32>
    %314 = vector.multi_reduction <add>, %313, %cst_187 [1] : vector<8x256xf32> to vector<8xf32>
    %315 = vector.shape_cast %314 : vector<8xf32> to vector<8x1xf32>
    %cst_188 = arith.constant 3.906250e-03 : f32
    %316 = vector.broadcast %cst_188 : f32 to vector<8x1xf32>
    %317 = arith.mulf %315, %316 : vector<8x1xf32>
    %cst_189 = arith.constant 9.99999974E-6 : f32
    %318 = vector.broadcast %cst_189 : f32 to vector<8x1xf32>
    %319 = arith.addf %317, %318 : vector<8x1xf32>
    %320 = math.rsqrt %319 : vector<8x1xf32>
    %321 = arith.mulf %320, %302 : vector<8x1xf32>
    %322 = vector.broadcast %321 : vector<8x1xf32> to vector<8x256xf32>
    %323 = arith.mulf %312, %322 : vector<8x256xf32>
    %324 = vector.broadcast %303 : vector<8x1xf32> to vector<8x256xf32>
    %325 = arith.addf %323, %324 : vector<8x256xf32>
    %cst_190 = arith.constant 0.000000e+00 : f32
    %326 = vector.broadcast %cst_190 : f32 to vector<8x256xf32>
    %327 = arith.cmpf oge, %325, %326 : vector<8x256xf32>
    %328 = vector.broadcast %304 : vector<8x1xf32> to vector<8x256xf32>
    %329 = arith.mulf %328, %325 : vector<8x256xf32>
    %330 = arith.select %327, %325, %329 : vector<8x256xi1>, vector<8x256xf32>
    %c8_191 = arith.constant 8 : index
    %c256_192 = arith.constant 256 : index
    %331 = vector.load %arg10[%c8_191, %c256_192] : memref<40x768xf32, #tpu.memory_space<vmem>>, vector<8x256xf32>
    tpu.vector_store %arg10[%c8_191, %c256_192], %330 {strides = array<i32>} : memref<40x768xf32, #tpu.memory_space<vmem>>, vector<8x256xf32>,
    %c0_193 = arith.constant 0 : index
    %c0_194 = arith.constant 0 : index
    %c0_195 = arith.constant 0 : index
    %332 = vector.load %arg6[%c0_193, %c0_194, %c0_195] : memref<9x8x32xf32, #tpu.memory_space<vmem>>, vector<1x8x32xf32>
    %333 = vector.shape_cast %332 : vector<1x8x32xf32> to vector<8x32xf32>
    %c8_196 = arith.constant 8 : index
    %c127 = arith.constant 127 : index
    %334 = vector.load %arg10[%c8_196, %c127] : memref<40x768xf32, #tpu.memory_space<vmem>>, vector<32x256xf32>
    %cst_197 = arith.constant dense<0.000000e+00> : vector<8x256xf32>
    %335 = tpu.matmul %333, %334, %cst_197 {dimension_numbers = #tpu.dot_dimension_numbers<[1], [0], [0], [1], [0, 0, 1, 1], [], []>} : vector<8x32xf32>, vector<32x256xf32>, vector<8x256xf32> -> vector<8x256xf32>
    %c3_198 = arith.constant 3 : index
    %c0_199 = arith.constant 0 : index
    %c0_200 = arith.constant 0 : index
    %336 = vector.load %arg6[%c3_198, %c0_199, %c0_200] : memref<9x8x32xf32, #tpu.memory_space<vmem>>, vector<1x8x32xf32>
    %337 = vector.shape_cast %336 : vector<1x8x32xf32> to vector<8x32xf32>
    %c8_201 = arith.constant 8 : index
    %c255_202 = arith.constant 255 : index
    %338 = vector.load %arg10[%c8_201, %c255_202] : memref<40x768xf32, #tpu.memory_space<vmem>>, vector<32x256xf32>
    %cst_203 = arith.constant dense<0.000000e+00> : vector<8x256xf32>
    %339 = tpu.matmul %337, %338, %cst_203 {dimension_numbers = #tpu.dot_dimension_numbers<[1], [0], [0], [1], [0, 0, 1, 1], [], []>} : vector<8x32xf32>, vector<32x256xf32>, vector<8x256xf32> -> vector<8x256xf32>
    %340 = arith.addf %335, %339 : vector<8x256xf32>
    %c6_204 = arith.constant 6 : index
    %c0_205 = arith.constant 0 : index
    %c0_206 = arith.constant 0 : index
    %341 = vector.load %arg6[%c6_204, %c0_205, %c0_206] : memref<9x8x32xf32, #tpu.memory_space<vmem>>, vector<1x8x32xf32>
    %342 = vector.shape_cast %341 : vector<1x8x32xf32> to vector<8x32xf32>
    %c8_207 = arith.constant 8 : index
    %c383 = arith.constant 383 : index
    %343 = vector.load %arg10[%c8_207, %c383] : memref<40x768xf32, #tpu.memory_space<vmem>>, vector<32x256xf32>
    %cst_208 = arith.constant dense<0.000000e+00> : vector<8x256xf32>
    %344 = tpu.matmul %342, %343, %cst_208 {dimension_numbers = #tpu.dot_dimension_numbers<[1], [0], [0], [1], [0, 0, 1, 1], [], []>} : vector<8x32xf32>, vector<32x256xf32>, vector<8x256xf32> -> vector<8x256xf32>
    %345 = arith.addf %340, %344 : vector<8x256xf32>
    %346 = vector.broadcast %23 : vector<1x256xf32> to vector<8x256xf32>
    %347 = arith.mulf %345, %346 : vector<8x256xf32>
    %c1_209 = arith.constant 1 : index
    %c0_210 = arith.constant 0 : index
    %c0_211 = arith.constant 0 : index
    %348 = vector.load %arg6[%c1_209, %c0_210, %c0_211] : memref<9x8x32xf32, #tpu.memory_space<vmem>>, vector<1x8x32xf32>
    %349 = vector.shape_cast %348 : vector<1x8x32xf32> to vector<8x32xf32>
    %c8_212 = arith.constant 8 : index
    %c128 = arith.constant 128 : index
    %350 = vector.load %arg10[%c8_212, %c128] : memref<40x768xf32, #tpu.memory_space<vmem>>, vector<32x256xf32>
    %cst_213 = arith.constant dense<0.000000e+00> : vector<8x256xf32>
    %351 = tpu.matmul %349, %350, %cst_213 {dimension_numbers = #tpu.dot_dimension_numbers<[1], [0], [0], [1], [0, 0, 1, 1], [], []>} : vector<8x32xf32>, vector<32x256xf32>, vector<8x256xf32> -> vector<8x256xf32>
    %c4_214 = arith.constant 4 : index
    %c0_215 = arith.constant 0 : index
    %c0_216 = arith.constant 0 : index
    %352 = vector.load %arg6[%c4_214, %c0_215, %c0_216] : memref<9x8x32xf32, #tpu.memory_space<vmem>>, vector<1x8x32xf32>
    %353 = vector.shape_cast %352 : vector<1x8x32xf32> to vector<8x32xf32>
    %c8_217 = arith.constant 8 : index
    %c256_218 = arith.constant 256 : index
    %354 = vector.load %arg10[%c8_217, %c256_218] : memref<40x768xf32, #tpu.memory_space<vmem>>, vector<32x256xf32>
    %cst_219 = arith.constant dense<0.000000e+00> : vector<8x256xf32>
    %355 = tpu.matmul %353, %354, %cst_219 {dimension_numbers = #tpu.dot_dimension_numbers<[1], [0], [0], [1], [0, 0, 1, 1], [], []>} : vector<8x32xf32>, vector<32x256xf32>, vector<8x256xf32> -> vector<8x256xf32>
    %356 = arith.addf %351, %355 : vector<8x256xf32>
    %c7_220 = arith.constant 7 : index
    %c0_221 = arith.constant 0 : index
    %c0_222 = arith.constant 0 : index
    %357 = vector.load %arg6[%c7_220, %c0_221, %c0_222] : memref<9x8x32xf32, #tpu.memory_space<vmem>>, vector<1x8x32xf32>
    %358 = vector.shape_cast %357 : vector<1x8x32xf32> to vector<8x32xf32>
    %c8_223 = arith.constant 8 : index
    %c384 = arith.constant 384 : index
    %359 = vector.load %arg10[%c8_223, %c384] : memref<40x768xf32, #tpu.memory_space<vmem>>, vector<32x256xf32>
    %cst_224 = arith.constant dense<0.000000e+00> : vector<8x256xf32>
    %360 = tpu.matmul %358, %359, %cst_224 {dimension_numbers = #tpu.dot_dimension_numbers<[1], [0], [0], [1], [0, 0, 1, 1], [], []>} : vector<8x32xf32>, vector<32x256xf32>, vector<8x256xf32> -> vector<8x256xf32>
    %361 = arith.addf %356, %360 : vector<8x256xf32>
    %c2_225 = arith.constant 2 : index
    %c0_226 = arith.constant 0 : index
    %c0_227 = arith.constant 0 : index
    %362 = vector.load %arg6[%c2_225, %c0_226, %c0_227] : memref<9x8x32xf32, #tpu.memory_space<vmem>>, vector<1x8x32xf32>
    %363 = vector.shape_cast %362 : vector<1x8x32xf32> to vector<8x32xf32>
    %c8_228 = arith.constant 8 : index
    %c129 = arith.constant 129 : index
    %364 = vector.load %arg10[%c8_228, %c129] : memref<40x768xf32, #tpu.memory_space<vmem>>, vector<32x256xf32>
    %cst_229 = arith.constant dense<0.000000e+00> : vector<8x256xf32>
    %365 = tpu.matmul %363, %364, %cst_229 {dimension_numbers = #tpu.dot_dimension_numbers<[1], [0], [0], [1], [0, 0, 1, 1], [], []>} : vector<8x32xf32>, vector<32x256xf32>, vector<8x256xf32> -> vector<8x256xf32>
    %c5_230 = arith.constant 5 : index
    %c0_231 = arith.constant 0 : index
    %c0_232 = arith.constant 0 : index
    %366 = vector.load %arg6[%c5_230, %c0_231, %c0_232] : memref<9x8x32xf32, #tpu.memory_space<vmem>>, vector<1x8x32xf32>
    %367 = vector.shape_cast %366 : vector<1x8x32xf32> to vector<8x32xf32>
    %c8_233 = arith.constant 8 : index
    %c257_234 = arith.constant 257 : index
    %368 = vector.load %arg10[%c8_233, %c257_234] : memref<40x768xf32, #tpu.memory_space<vmem>>, vector<32x256xf32>
    %cst_235 = arith.constant dense<0.000000e+00> : vector<8x256xf32>
    %369 = tpu.matmul %367, %368, %cst_235 {dimension_numbers = #tpu.dot_dimension_numbers<[1], [0], [0], [1], [0, 0, 1, 1], [], []>} : vector<8x32xf32>, vector<32x256xf32>, vector<8x256xf32> -> vector<8x256xf32>
    %370 = arith.addf %365, %369 : vector<8x256xf32>
    %c8_236 = arith.constant 8 : index
    %c0_237 = arith.constant 0 : index
    %c0_238 = arith.constant 0 : index
    %371 = vector.load %arg6[%c8_236, %c0_237, %c0_238] : memref<9x8x32xf32, #tpu.memory_space<vmem>>, vector<1x8x32xf32>
    %372 = vector.shape_cast %371 : vector<1x8x32xf32> to vector<8x32xf32>
    %c8_239 = arith.constant 8 : index
    %c385 = arith.constant 385 : index
    %373 = vector.load %arg10[%c8_239, %c385] : memref<40x768xf32, #tpu.memory_space<vmem>>, vector<32x256xf32>
    %cst_240 = arith.constant dense<0.000000e+00> : vector<8x256xf32>
    %374 = tpu.matmul %372, %373, %cst_240 {dimension_numbers = #tpu.dot_dimension_numbers<[1], [0], [0], [1], [0, 0, 1, 1], [], []>} : vector<8x32xf32>, vector<32x256xf32>, vector<8x256xf32> -> vector<8x256xf32>
    %375 = arith.addf %370, %374 : vector<8x256xf32>
    %376 = vector.broadcast %27 : vector<1x256xf32> to vector<8x256xf32>
    %377 = arith.mulf %375, %376 : vector<8x256xf32>
    %378 = arith.addf %347, %361 : vector<8x256xf32>
    %379 = arith.addf %378, %377 : vector<8x256xf32>
    %c4_241 = arith.constant 4 : index
    %c0_242 = arith.constant 0 : index
    %c0_243 = arith.constant 0 : index
    %380 = vector.load %arg8[%c4_241, %c0_242, %c0_243] : memref<6x8x4xf32, #tpu.memory_space<vmem>>, vector<1x8x4xf32>
    %381 = vector.shape_cast %380 : vector<1x8x4xf32> to vector<8x4xf32>
    %382 = vector.extract_strided_slice %381 {offsets = [0, 0], sizes = [8, 1], strides = [1, 1]} : vector<8x4xf32> to vector<8x1xf32>
    %383 = vector.extract_strided_slice %381 {offsets = [0, 1], sizes = [8, 1], strides = [1, 1]} : vector<8x4xf32> to vector<8x1xf32>
    %384 = vector.extract_strided_slice %381 {offsets = [0, 2], sizes = [8, 1], strides = [1, 1]} : vector<8x4xf32> to vector<8x1xf32>
    %385 = vector.extract_strided_slice %381 {offsets = [0, 3], sizes = [8, 1], strides = [1, 1]} : vector<8x4xf32> to vector<8x1xf32>
    %386 = vector.broadcast %382 : vector<8x1xf32> to vector<8x256xf32>
    %387 = arith.addf %379, %386 : vector<8x256xf32>
    %cst_244 = arith.constant dense<0.000000e+00> : vector<8xf32>
    %388 = vector.multi_reduction <add>, %387, %cst_244 [1] : vector<8x256xf32> to vector<8xf32>
    %389 = vector.shape_cast %388 : vector<8xf32> to vector<8x1xf32>
    %cst_245 = arith.constant 3.906250e-03 : f32
    %390 = vector.broadcast %cst_245 : f32 to vector<8x1xf32>
    %391 = arith.mulf %389, %390 : vector<8x1xf32>
    %392 = vector.broadcast %391 : vector<8x1xf32> to vector<8x256xf32>
    %393 = arith.subf %387, %392 : vector<8x256xf32>
    %394 = arith.mulf %393, %393 : vector<8x256xf32>
    %cst_246 = arith.constant dense<0.000000e+00> : vector<8xf32>
    %395 = vector.multi_reduction <add>, %394, %cst_246 [1] : vector<8x256xf32> to vector<8xf32>
    %396 = vector.shape_cast %395 : vector<8xf32> to vector<8x1xf32>
    %cst_247 = arith.constant 3.906250e-03 : f32
    %397 = vector.broadcast %cst_247 : f32 to vector<8x1xf32>
    %398 = arith.mulf %396, %397 : vector<8x1xf32>
    %cst_248 = arith.constant 9.99999974E-6 : f32
    %399 = vector.broadcast %cst_248 : f32 to vector<8x1xf32>
    %400 = arith.addf %398, %399 : vector<8x1xf32>
    %401 = math.rsqrt %400 : vector<8x1xf32>
    %402 = arith.mulf %401, %383 : vector<8x1xf32>
    %403 = vector.broadcast %402 : vector<8x1xf32> to vector<8x256xf32>
    %404 = arith.mulf %393, %403 : vector<8x256xf32>
    %405 = vector.broadcast %384 : vector<8x1xf32> to vector<8x256xf32>
    %406 = arith.addf %404, %405 : vector<8x256xf32>
    %cst_249 = arith.constant 0.000000e+00 : f32
    %407 = vector.broadcast %cst_249 : f32 to vector<8x256xf32>
    %408 = arith.cmpf oge, %406, %407 : vector<8x256xf32>
    %409 = vector.broadcast %385 : vector<8x1xf32> to vector<8x256xf32>
    %410 = arith.mulf %409, %406 : vector<8x256xf32>
    %411 = arith.select %408, %406, %410 : vector<8x256xi1>, vector<8x256xf32>
    %c0_250 = arith.constant 0 : index
    %c256_251 = arith.constant 256 : index
    %412 = vector.load %arg10[%c0_250, %c256_251] : memref<40x768xf32, #tpu.memory_space<vmem>>, vector<8x256xf32>
    tpu.vector_store %arg10[%c0_250, %c256_251], %411 {strides = array<i32>} : memref<40x768xf32, #tpu.memory_space<vmem>>, vector<8x256xf32>,
    %c0_252 = arith.constant 0 : index
    %c0_253 = arith.constant 0 : index
    %c0_254 = arith.constant 0 : index
    %413 = vector.load %arg7[%c0_252, %c0_253, %c0_254] : memref<3x8x8xf32, #tpu.memory_space<vmem>>, vector<1x8x8xf32>
    %414 = vector.shape_cast %413 : vector<1x8x8xf32> to vector<8x8xf32>
    %c0_255 = arith.constant 0 : index
    %c256_256 = arith.constant 256 : index
    %415 = vector.load %arg10[%c0_255, %c256_256] : memref<40x768xf32, #tpu.memory_space<vmem>>, vector<8x256xf32>
    %cst_257 = arith.constant dense<0.000000e+00> : vector<8x256xf32>
    %416 = tpu.matmul %414, %415, %cst_257 {dimension_numbers = #tpu.dot_dimension_numbers<[1], [0], [0], [1], [0, 0, 1, 1], [], []>} : vector<8x8xf32>, vector<8x256xf32>, vector<8x256xf32> -> vector<8x256xf32>
    %c1_258 = arith.constant 1 : index
    %c0_259 = arith.constant 0 : index
    %c0_260 = arith.constant 0 : index
    %417 = vector.load %arg7[%c1_258, %c0_259, %c0_260] : memref<3x8x8xf32, #tpu.memory_space<vmem>>, vector<1x8x8xf32>
    %418 = vector.shape_cast %417 : vector<1x8x8xf32> to vector<8x8xf32>
    %c0_261 = arith.constant 0 : index
    %c257_262 = arith.constant 257 : index
    %419 = vector.load %arg10[%c0_261, %c257_262] : memref<40x768xf32, #tpu.memory_space<vmem>>, vector<8x256xf32>
    %cst_263 = arith.constant dense<0.000000e+00> : vector<8x256xf32>
    %420 = tpu.matmul %418, %419, %cst_263 {dimension_numbers = #tpu.dot_dimension_numbers<[1], [0], [0], [1], [0, 0, 1, 1], [], []>} : vector<8x8xf32>, vector<8x256xf32>, vector<8x256xf32> -> vector<8x256xf32>
    %421 = arith.addf %416, %420 : vector<8x256xf32>
    %c2_264 = arith.constant 2 : index
    %c0_265 = arith.constant 0 : index
    %c0_266 = arith.constant 0 : index
    %422 = vector.load %arg7[%c2_264, %c0_265, %c0_266] : memref<3x8x8xf32, #tpu.memory_space<vmem>>, vector<1x8x8xf32>
    %423 = vector.shape_cast %422 : vector<1x8x8xf32> to vector<8x8xf32>
    %c0_267 = arith.constant 0 : index
    %c258 = arith.constant 258 : index
    %424 = vector.load %arg10[%c0_267, %c258] : memref<40x768xf32, #tpu.memory_space<vmem>>, vector<8x256xf32>
    %cst_268 = arith.constant dense<0.000000e+00> : vector<8x256xf32>
    %425 = tpu.matmul %423, %424, %cst_268 {dimension_numbers = #tpu.dot_dimension_numbers<[1], [0], [0], [1], [0, 0, 1, 1], [], []>} : vector<8x8xf32>, vector<8x256xf32>, vector<8x256xf32> -> vector<8x256xf32>
    %426 = arith.addf %421, %425 : vector<8x256xf32>
    %c5_269 = arith.constant 5 : index
    %c0_270 = arith.constant 0 : index
    %c0_271 = arith.constant 0 : index
    %427 = vector.load %arg8[%c5_269, %c0_270, %c0_271] : memref<6x8x4xf32, #tpu.memory_space<vmem>>, vector<1x8x4xf32>
    %428 = vector.shape_cast %427 : vector<1x8x4xf32> to vector<8x4xf32>
    %429 = vector.extract_strided_slice %428 {offsets = [0, 0], sizes = [8, 1], strides = [1, 1]} : vector<8x4xf32> to vector<8x1xf32>
    %430 = vector.extract_strided_slice %428 {offsets = [0, 1], sizes = [8, 1], strides = [1, 1]} : vector<8x4xf32> to vector<8x1xf32>
    %431 = vector.extract_strided_slice %428 {offsets = [0, 2], sizes = [8, 1], strides = [1, 1]} : vector<8x4xf32> to vector<8x1xf32>
    %432 = vector.extract_strided_slice %428 {offsets = [0, 3], sizes = [8, 1], strides = [1, 1]} : vector<8x4xf32> to vector<8x1xf32>
    %433 = vector.broadcast %429 : vector<8x1xf32> to vector<8x256xf32>
    %434 = arith.addf %426, %433 : vector<8x256xf32>
    %435 = vector.broadcast %50 : vector<1x256xf32> to vector<8x256xf32>
    %436 = arith.mulf %434, %435 : vector<8x256xf32>
    %cst_272 = arith.constant dense<0.000000e+00> : vector<8xf32>
    %437 = vector.multi_reduction <add>, %436, %cst_272 [1] : vector<8x256xf32> to vector<8xf32>
    %438 = vector.shape_cast %437 : vector<8xf32> to vector<8x1xf32>
    %cst_273 = arith.constant 0.00892857183 : f32
    %439 = vector.broadcast %cst_273 : f32 to vector<8x1xf32>
    %440 = arith.mulf %438, %439 : vector<8x1xf32>
    %441 = vector.broadcast %440 : vector<8x1xf32> to vector<8x256xf32>
    %442 = arith.subf %434, %441 : vector<8x256xf32>
    %443 = arith.mulf %442, %442 : vector<8x256xf32>
    %444 = vector.broadcast %50 : vector<1x256xf32> to vector<8x256xf32>
    %445 = arith.mulf %443, %444 : vector<8x256xf32>
    %cst_274 = arith.constant dense<0.000000e+00> : vector<8xf32>
    %446 = vector.multi_reduction <add>, %445, %cst_274 [1] : vector<8x256xf32> to vector<8xf32>
    %447 = vector.shape_cast %446 : vector<8xf32> to vector<8x1xf32>
    %cst_275 = arith.constant 0.00892857183 : f32
    %448 = vector.broadcast %cst_275 : f32 to vector<8x1xf32>
    %449 = arith.mulf %447, %448 : vector<8x1xf32>
    %cst_276 = arith.constant 9.99999974E-6 : f32
    %450 = vector.broadcast %cst_276 : f32 to vector<8x1xf32>
    %451 = arith.addf %449, %450 : vector<8x1xf32>
    %452 = math.rsqrt %451 : vector<8x1xf32>
    %453 = arith.mulf %452, %430 : vector<8x1xf32>
    %454 = vector.broadcast %453 : vector<8x1xf32> to vector<8x256xf32>
    %455 = arith.mulf %442, %454 : vector<8x256xf32>
    %456 = vector.broadcast %431 : vector<8x1xf32> to vector<8x256xf32>
    %457 = arith.addf %455, %456 : vector<8x256xf32>
    %cst_277 = arith.constant 0.000000e+00 : f32
    %458 = vector.broadcast %cst_277 : f32 to vector<8x256xf32>
    %459 = arith.cmpf oge, %457, %458 : vector<8x256xf32>
    %460 = vector.broadcast %432 : vector<8x1xf32> to vector<8x256xf32>
    %461 = arith.mulf %460, %457 : vector<8x256xf32>
    %462 = arith.select %459, %457, %461 : vector<8x256xi1>, vector<8x256xf32>
    %463 = vector.broadcast %50 : vector<1x256xf32> to vector<8x256xf32>
    %464 = arith.mulf %462, %463 : vector<8x256xf32>
    %c0_278 = arith.constant 0 : index
    %c0_279 = arith.constant 0 : index
    %c0_280 = arith.constant 0 : index
    %465 = vector.load %arg9[%c0_278, %c0_279, %c0_280] : memref<1x8x256xf32, #tpu.memory_space<vmem>>, vector<1x8x256xf32>
    %466 = vector.shape_cast %465 : vector<1x8x256xf32> to vector<8x256xf32>
    %467 = vector.shape_cast %464 : vector<8x256xf32> to vector<1x8x256xf32>
    tpu.vector_store %arg9[%c0_278, %c0_279, %c0_280], %467 {strides = array<i32>} : memref<1x8x256xf32, #tpu.memory_space<vmem>>, vector<1x8x256xf32>,
    return
  }
  func.func @transform_0(%arg0: i32) -> (i32, i32, i32) {
    %c0_i32 = arith.constant 0 : i32
    %c0_i32_0 = arith.constant 0 : i32
    %c0_i32_1 = arith.constant 0 : i32
    return %arg0, %c0_i32, %c0_i32_0 : i32, i32, i32
  }
  func.func @transform_1(%arg0: i32) -> (i32, i32, i32) {
    %c0_i32 = arith.constant 0 : i32
    %c0_i32_0 = arith.constant 0 : i32
    %c0_i32_1 = arith.constant 0 : i32
    %c0_i32_2 = arith.constant 0 : i32
    return %c0_i32, %c0_i32_0, %c0_i32_1 : i32, i32, i32
  }
  func.func @transform_2(%arg0: i32) -> (i32, i32, i32) {
    %c0_i32 = arith.constant 0 : i32
    %c0_i32_0 = arith.constant 0 : i32
    %c0_i32_1 = arith.constant 0 : i32
    %c0_i32_2 = arith.constant 0 : i32
    return %c0_i32, %c0_i32_0, %c0_i32_1 : i32, i32, i32
  }
  func.func @transform_3(%arg0: i32) -> (i32, i32, i32) {
    %c0_i32 = arith.constant 0 : i32
    %c0_i32_0 = arith.constant 0 : i32
    %c0_i32_1 = arith.constant 0 : i32
    %c0_i32_2 = arith.constant 0 : i32
    return %c0_i32, %c0_i32_0, %c0_i32_1 : i32, i32, i32
  }
  func.func @transform_4(%arg0: i32) -> (i32, i32, i32) {
    %c0_i32 = arith.constant 0 : i32
    %c0_i32_0 = arith.constant 0 : i32
    %c0_i32_1 = arith.constant 0 : i32
    %c0_i32_2 = arith.constant 0 : i32
    return %c0_i32, %c0_i32_0, %c0_i32_1 : i32, i32, i32
  }
  func.func @transform_5(%arg0: i32) -> (i32, i32, i32) {
    %c0_i32 = arith.constant 0 : i32
    %c0_i32_0 = arith.constant 0 : i32
    %c0_i32_1 = arith.constant 0 : i32
    %c0_i32_2 = arith.constant 0 : i32
    return %c0_i32, %c0_i32_0, %c0_i32_1 : i32, i32, i32
  }
  func.func @transform_6(%arg0: i32) -> (i32, i32, i32) {
    %c0_i32 = arith.constant 0 : i32
    %c0_i32_0 = arith.constant 0 : i32
    %c0_i32_1 = arith.constant 0 : i32
    %c0_i32_2 = arith.constant 0 : i32
    return %c0_i32, %c0_i32_0, %c0_i32_1 : i32, i32, i32
  }
  func.func @transform_7(%arg0: i32) -> (i32, i32, i32) {
    %c0_i32 = arith.constant 0 : i32
    %c0_i32_0 = arith.constant 0 : i32
    %c0_i32_1 = arith.constant 0 : i32
    %c0_i32_2 = arith.constant 0 : i32
    return %c0_i32, %c0_i32_0, %c0_i32_1 : i32, i32, i32
  }
  func.func @transform_8(%arg0: i32) -> (i32, i32, i32) {
    %c0_i32 = arith.constant 0 : i32
    %c0_i32_0 = arith.constant 0 : i32
    %c0_i32_1 = arith.constant 0 : i32
    return %arg0, %c0_i32, %c0_i32_0 : i32, i32, i32
  }
}

</mosaic_0001>

<bundles_post_ra>
// kernel: dense_encoder_forward.1
= control target key start
LH: loop header
LB: loop body
LE: loop exit
PB: predicated region body
PF: predicated region fallthrough
CT: control target
= control target key end

     0   :  { %13 = vsyncpa [#allocation4], 0  ;;  %s5464_s0 = inlined_call_operand.vmem [shape: f32[2,2,256], index: 0, kind: input, shape index: {}]   ;;  %s5465_s1 = inlined_call_operand.vmem [shape: f32[1,8,2], index: 1, kind: input, shape index: {}]   ;;  %s5466_s2 = inlined_call_operand.vmem [shape: f32[9,8,8], index: 2, kind: input, shape index: {}]   ;;  %s5467_s3 = inlined_call_operand.vmem [shape: f32[9,8,16], index: 3, kind: input, shape index: {}]   ;;  %s5468_s4 = inlined_call_operand.hbm [shape: f32[9,8,24], index: 4, kind: input, shape index: {}]   ;;  %s5469_s5 = inlined_call_operand.hbm [shape: f32[9,8,32], index: 5, kind: input, shape index: {}]   ;;  %s5470_s6 = inlined_call_operand.vmem [shape: f32[3,8,8], index: 6, kind: input, shape index: {}]   ;;  %s5471_s7 = inlined_call_operand.vmem [shape: f32[6,8,4], index: 7, kind: input, shape index: {}]   ;;  %s5472_s8 = inlined_call_operand.vmem [shape: f32[2,8,256], index: 8, kind: output, shape index: {}]  }
   0x1   :  { %14 = vsyncpa [#allocation6], 0  ;;  %s4488_s27 = smov 0  }
   0x2 LB: > { %s244_s30 = sshll.u32 %s5468_s4, 4  ;;  %s3618_s9 = sadd.s32 4294967295, %s4414_s27   ;;  %s4414_s27 = sphi %s4488_s27, %s20_s27   ;;  %s245_s30 = int_to_ptr.hbm [resolvable:$true] %s244_s30 }
   0x3   : > { %p3620_p0 = scmp.ge.s32.totalorder %s4414_s27, 1  ;;  %p224_p1 = scmp.lt.s32.totalorder %s4414_s27, 3 }
   0x4   : > { %p3761_p2 = scmp.eq.s32.totalorder %s3618_s9, 0  ;;  %s4416_s11 = smov [#allocation3]  }
   0x5   : > { %p4499_p3 = pnand %p3620_p0, %p224_p1  ;;  %s246_s12 = sshll.u32 %s4416_s11, 4  ;;  %s247_s12 = int_to_ptr.vmem [resolvable:$true] %s246_s12 }
   0x6   : > { %s258_s15 = sshll.u32 %s5469_s5, 4  ;;  %s4417_s16 = smov [#allocation5]   ;;  %s259_s15 = int_to_ptr.hbm [resolvable:$true] %s258_s15 }
   0x7   : > { %p3754_p4 = pneg %p4499_p3  ;;  %s260_s17 = sshll.u32 %s4417_s16, 4  ;;  %s261_s17 = int_to_ptr.vmem [resolvable:$true] %s260_s17 }
   0x8   : > { %s4418_s18 = smov 128   ;;  %s4419_s19 = smov 8  }
   0x9   : > { %p3755_p5 = pnand %p3761_p2, %p3754_p4  ;;  %290 = sbr.rel (%p4499_p3) target bundleno = 3910 (0xf46), region = 52 }
   0xb   : > { %3757 = dma.hbm_to_vmem [thread:$0]  (!%p3755_p5), %s245_s30, 1152, %s247_s12, [#allocation4], %s4418_s18, %s4418_s18, %s4419_s19  }
   0xc   : > { %3760 = dma.hbm_to_vmem [thread:$0]  (!%p3755_p5), %s259_s15, 1152, %s261_s17, [#allocation6], %s4418_s18, %s4418_s18, %s4419_s19  }
   0xe   : > { %4405 = dma.done.wait (%p3761_p2), [#allocation4], 1152  }
   0xf   : > { %4407 = vsyncadd (%p3761_p2), [#allocation4], 4294966144 }
  0x10   : > { %4409 = dma.done.wait (%p3761_p2), [#allocation6], 1152  }
  0x11   : > { %4411 = vsyncadd (%p3761_p2), [#allocation6], 4294966144  ;;  %p330_p6 = scmp.lt.s32.totalorder %s3618_s9, 1  ;;  %v5473_v0 = vmov 0   ;;  %v435_v2 = vld [vmem:[%s5471_s7] sm:$0xff]  ;;  %vm449_vm0 = vcmask 1041408  }
  0x12   : > { %3800 = vset.pattern.permute.xlu0 %v5473_v0  ;;  %v433_v3 = vld [vmem:[%s5465_s1] sm:$0xff]  ;;  %vm445_vm1 = vcmask 15360   ;;  %v4421_v19 = vmov 1   ;;  %v4422_v20 = vmov 2   ;;  %v4423_v24 = vmov 3   ;;  %s4425_s29 = smov 113  }
  0x13   : > { %s5477_s9 = smov (!%p330_p6, %s3618_s9), 1  ;;  %438 = vperm.xlu0 %3800, %v435_v2   ;;  %3801 = vset.pattern.permute.xlu1 %v4421_v19  ;;  %v4424_v33 = vmov 0.0   ;;  %s4426_s30 = smov 17   ;;  %v4558_v47 = vld [vmem:[%s5471_s7 + $0x8] sm:$0xff]  ;;  %vm558_vm7 = vcmask 7168   ;;  %v3641_v51 = vld [vmem:[%s5466_s2 + $0x18] sm:$0xff] }
  0x14   : > { %s3744_s20 = sshll.u32 %s5477_s9, 2  ;;  %3802 = vset.pattern.permute.xlu2 %v4422_v20  ;;  %s4427_s10 = smov 127   ;;  %vm563_vm8 = vcmask 64512   ;;  %vm675_vm9 = vcmask 924672   ;;  %v3646_v59 = vld [vmem:[%s5466_s2 + $0x30] sm:$0xff]  ;;  %vm613_vm10 = vcmask 138240  }
  0x15   : > { %s334_s23 = scalar_lea.vmem %s5464_s0, %s3744_s20  ;;  %526 = vperm.xlu2 %3802, %v435_v2   ;;  %s4428_s11 = smov 1   ;;  %vm780_vm11 = vcmask 130048   ;;  %vm896_vm12 = vcmask 1039360   ;;  %vm836_vm13 = vcmask 916480   ;;  %vm1006_vm14 = vcmask 908288  }
  0x16   : > { %v434_v1 = vld [vmem:[%s334_s23] sm:$0xf]  ;;  %s4429_s12 = smov 16   ;;  %s4430_s13 = smov 111   ;;  %vm950_vm15 = vcmask 121856  }
  0x17   : > { %442 = vst [vmem:[#allocation1] ss:$4 sm:$0xff] %v434_v1  ;;  %s4431_s16 = smov 112   ;;  %s4432_s17 = smov 15  }
  0x18   : > { %s4433_s18 = smov 32   ;;  %s4434_s19 = smov 96  }
  0x19   : > { %s4435_s20 = smov 31   ;;  %s4436_s21 = smov 33  }
  0x1a   : > { %s4437_s22 = smov 97   ;;  %s4438_s23 = smov 95  }
  0x1b   : > { %s4439_s26 = smov 65   ;;  %s4442_s14 = smov 126  }
  0x1d   : > { %3803 = vset.pattern.permute.xlu2 %v4423_v24 }
  0x1e   : > { %v443_v4 = vld.sshfl [vmem:[#allocation1] sm:$0xff pattern:$0x73625140]  ;;  %v444_v5 = vld.sshfl [vmem:[#allocation1 + $0x8] sm:$0xff pattern:$0x73625140]  ;;  %534 = vperm.xlu2 %3803, %v435_v2  }
  0x1f   : > { %3637 = vmatpush.msk.msra.mxu0 %vm449_vm0, %v443_v4  ;;  %3639 = vmatpush.msk.msra.mxu1 %vm449_vm0, %v444_v5 }
  0x20   : > { %3638 = vmatmul.msk.f32.vlgmr.msra.gmra.mxu0 %vm445_vm1, %v433_v3  ;;  %3640 = vmatmul.msk.f32.vlgmr.msra.gmra.mxu1 %vm445_vm1, %v433_v3  ;;  %v543_v3 = vld [vmem:[%s5466_s2] sm:$0xff] }
  0x6f   : > { %v527_v34 = vpop.permute.xlu2 %526 }
  0x78   : > { %v535_v38 = vpop.permute.xlu2 %534 }
  0x85   : > { %v439_v6 = vpop.permute.xlu0 %438 }
  0x9d   : > { %v471_v7 = vpop.f32.mrf.mxu0  ;;  %v491_v8 = vpop.f32.mrf.mxu1 }
  0x9e   : > { %v472_v9 = vadd.f32 %v471_v7, %v439_v6  ;;  %v492_v10 = vadd.f32 %v491_v8, %v439_v6 }
  0xa0   : > { %v494_v11 = vadd.f32 %v492_v10, %v472_v9 }
  0xa2   : > { %495 = vadd.xlane.f32.xlu0 %v494_v11 }
 0x115   : > { %v496_v12 = vpop.xlane.xlu0 %495 }
 0x116   : > { %v497_v13 = vmul.f32 0.00390625, %v496_v12 }
 0x118   : > { %v498_v14 = vsub.f32 %v472_v9, %v497_v13  ;;  %v499_v15 = vsub.f32 %v492_v10, %v497_v13  ;;  %v3650_v13 = vld [vmem:[%s5466_s2 + $0x20] sm:$0xff] }
 0x11a   : > { %v500_v16 = vmul.f32 %v498_v14, %v498_v14  ;;  %v501_v17 = vmul.f32 %v499_v15, %v499_v15 }
 0x11c   : > { %v502_v18 = vadd.f32 %v501_v17, %v500_v16 }
 0x11e   : > { %503 = vadd.xlane.f32.xlu1 %v502_v18 }
 0x191   : > { %v504_v21 = vpop.xlane.xlu1 %503 }
 0x192   : > { %v505_v22 = vmul.f32 0.00390625, %v504_v21 }
 0x194   : > { %v506_v23 = vadd.f32 1e-05, %v505_v22 }
 0x196   : > { %4328 = vrsqrt.f32 %v506_v23  ;;  %vm513_vm3 = vweird.f32 %v506_v23 }
 0x19c   : > { %v4329_v25 = vpop.eup %4328 }
 0x19d   : > { %v508_v26 = vmul.f32 %v4329_v25, %v506_v23  ;;  %vm514_vm2 = vweird.f32 %v4329_v25 }
 0x19e   : > { %vm515_vm4 = vmor %vm513_vm3, %vm514_vm2 }
 0x19f   : > { %v509_v27 = vmul.f32 %v4329_v25, %v508_v26 }
 0x1a1   : > { %v510_v28 = vmul.f32 0.5, %v509_v27  ;;  %v3655_v27 = vld [vmem:[%s5466_s2 + $0x38] sm:$0xff] }
 0x1a3   : > { %v511_v29 = vsub.f32 1.5, %v510_v28  ;;  %v3659_v28 = vld [vmem:[%s5466_s2 + $0x28] sm:$0xff] }
 0x1a5   : > { %v512_v30 = vmul.f32 %v4329_v25, %v511_v29 }
 0x1a7   : > { %v516_v31 = vsel %vm515_vm4, %v4329_v25, %v512_v30 }
 0x1a8   : > { %v517_v32 = vmul.f32 %v516_v31, %v435_v2 }
 0x1aa   : > { %520 = vperm.xlu1 %3801, %v517_v32  }
 0x1b2   : > { %4309 = vset.pattern.permute.xlu1 %v5473_v0 }
 0x1b3   : > { %673 = vrot.lane.b32.xlu1 %v4424_v33, %s4425_s29 }
 0x21c   : > { %v521_v35 = vpop.permute.xlu1 %520 }
 0x21d   : > { %v523_v36 = vmul.f32 %v521_v35, %v498_v14  ;;  %v524_v37 = vmul.f32 %v521_v35, %v499_v15  ;;  %v3649_v14 = vld [vmem:[%s5466_s2 + $0x8] sm:$0xff] }
 0x21f   : > { %v529_v39 = vadd.f32 %v527_v34, %v523_v36  ;;  %v530_v40 = vadd.f32 %v527_v34, %v524_v37 }
 0x221   : > { %vm531_vm5 = vcmp.ge.f32.partialorder %v529_v39, 0.0  ;;  %vm532_vm6 = vcmp.ge.f32.partialorder %v530_v40, 0.0  ;;  %v537_v41 = vmul.f32 %v535_v38, %v529_v39  ;;  %v538_v42 = vmul.f32 %v535_v38, %v530_v40  ;;  %v3664_v38 = vld [vmem:[%s5466_s2 + $0x40] sm:$0xff] }
 0x223   : > { %v4534_v43 = vsel %vm531_vm5, %v529_v39, %v537_v41  ;;  %v4536_v44 = vsel %vm532_vm6, %v530_v40, %v538_v42 }
 0x224   : > { %611 = vrot.lane.b32.xlu1 %v4536_v44, %s4426_s30  ;;  %v4541_v45 = vpack.i.bf16 %v4536_v44, %v4534_v43  ;;  %v4545_v46 = vpack.i.bf16 %v4534_v43, %v4424_v33 }
 0x225   : > { %v674_v55 = vpop.permute.xlu1 %673 }
 0x226   : > { %3825 = vrot.lane.b32.xlu0 %v4541_v45, %s4427_s10  ;;  %3805 = vrot.lane.b32.xlu2 %v4545_v46, %s4428_s11 }
 0x22c   : > { %778 = vrot.lane.b32.xlu1 %v4536_v44, %s4429_s12 }
 0x22e   : > { %1004 = vrot.lane.b32.xlu0 %v4424_v33, %s4430_s13  ;;  %556 = vrot.lane.b32.xlu2 %v4536_v44, %s4428_s11 }
 0x234   : > { %3830 = vrot.lane.b32.xlu1 %v4541_v45, %s4431_s16 }
 0x236   : > { %1066 = vperm.xlu0 %3800, %v4558_v47   ;;  %3810 = vrot.lane.b32.xlu2 %v4541_v45, %s4425_s29  ;;  %s4440_s29 = smov 64  }
 0x23c   : > { %3835 = vrot.lane.b32.xlu1 %v4541_v45, %s4430_s13 }
 0x23e   : > { %3815 = vrot.lane.b32.xlu2 %v4545_v46, %s4426_s30  ;;  %3844 = vset.pattern.permute.xlu0 %v4422_v20  ;;  %s4441_s30 = smov 63  }
 0x23f   : > { %1103 = vperm.xlu0 %3844, %v4558_v47  }
 0x244   : > { %948 = vrot.lane.b32.xlu1 %v4536_v44, %s4432_s17 }
 0x246   : > { %3820 = vrot.lane.b32.xlu2 %v4545_v46, %s4429_s12 }
 0x247   : > { %3845 = vset.pattern.permute.xlu0 %v4421_v19 }
 0x24e   : > { %894 = vrot.lane.b32.xlu2 %v4424_v33, %s4427_s10 }
 0x256   : > { %834 = vrot.lane.b32.xlu2 %v4424_v33, %s4431_s16 }
 0x25e   : > { %3840 = vrot.lane.b32.xlu2 %v4545_v46, %s4432_s17 }
 0x280   : > { %v3806_v48 = vpop.permute.xlu2 %3805 }
 0x281   : > { %v3808_v49 = vunpack.i.h.bf16 %v3806_v48  ;;  %v3807_v50 = vunpack.i.l.bf16 %v3806_v48  ;;  %v3658_v48 = vld [vmem:[%s5466_s2 + $0x10] sm:$0xff] }
 0x283   : > { %v559_v52 = vsel %vm558_vm7, %v3807_v50, %v3808_v49 }
 0x284   : > { %582 = vmatpush.msra.mxu2 %v559_v52 }
 0x285   : > { %3642 = vmatmul.msk.f32.vlgmr.msra.gmra.mxu2 %vm563_vm8, %v3641_v51 }
 0x288   : > { %v557_v53 = vpop.permute.xlu2 %556 }
 0x289   : > { %v560_v54 = vsel %vm558_vm7, %v3808_v49, %v557_v53 }
 0x28a   : > { %602 = vmatpush.msra.mxu3 %v560_v54 }
 0x28b   : > { %3643 = vmatmul.msk.f32.vlgmr.msra.gmra.mxu3 %vm563_vm8, %v3641_v51 }
 0x290   : > { %v3811_v56 = vpop.permute.xlu2 %3810 }
 0x291   : > { %v3813_v57 = vunpack.i.h.bf16 %v3811_v56  ;;  %v3812_v58 = vunpack.i.l.bf16 %v3811_v56 }
 0x293   : > { %v676_v60 = vsel %vm675_vm9, %v3812_v58, %v3813_v57  ;;  %v677_v61 = vsel %vm675_vm9, %v3813_v57, %v674_v55  ;;  %v360_v57 = vlaneseq }
 0x294   : > { %698 = vmatpush.msrb.mxu2 %v676_v60  ;;  %718 = vmatpush.msrb.mxu3 %v677_v61 }
 0x295   : > { %3647 = vmatmul.msk.f32.vlgmr.msrb.gmra.mxu2 %vm563_vm8, %v3646_v59  ;;  %3648 = vmatmul.msk.f32.vlgmr.msrb.gmra.mxu3 %vm563_vm8, %v3646_v59 }
 0x296   : > { %v612_v62 = vpop.permute.xlu1 %611 }
 0x298   : > { %v3816_v63 = vpop.permute.xlu2 %3815  ;;  %v3826_v6 = vpop.permute.xlu0 %3825 }
 0x299   : > { %v3818_v1 = vunpack.i.h.bf16 %v3816_v63  ;;  %v3817_v2 = vunpack.i.l.bf16 %v3816_v63  ;;  %v3828_v9 = vunpack.i.h.bf16 %v3826_v6  ;;  %v3827_v10 = vunpack.i.l.bf16 %v3826_v6 }
 0x29b   : > { %v614_v4 = vsel %vm613_vm10, %v3817_v2, %v3818_v1  ;;  %v615_v5 = vsel %vm613_vm10, %v3818_v1, %v612_v62  ;;  %v897_v17 = vsel %vm896_vm12, %v3827_v10, %v3828_v9  ;;  %v361_v62 = vand.u32 127, %v360_v57 }
 0x29c   : > { %636 = vmatpush.msrb.mxu0 %v614_v4  ;;  %656 = vmatpush.msrb.mxu1 %v615_v5 }
 0x29d   : > { %3644 = vmatmul.msk.f32.vlgmr.msrb.gmra.mxu0 %vm563_vm8, %v543_v3  ;;  %3645 = vmatmul.msk.f32.vlgmr.msrb.gmra.mxu1 %vm563_vm8, %v543_v3  ;;  %v362_v63 = vadd.s32 128, %v361_v62  ;;  %v4630_v5 = vand.u32 15, %v361_v62 }
 0x29e   : > { %769 = vmatpush.msra.mxu1 %v4536_v44  ;;  %749 = vmatpush.msra.mxu0 %v4534_v43  ;;  %v779_v7 = vpop.permute.xlu1 %778 }
 0x29f   : > { %v4632_v6 = vand.u32 15, %v362_v63  ;;  %vm387_vm0 = vcmp.ge.s32.totalorder %v4630_v5, 1  ;;  %vm393_vm2 = vcmp.le.s32.totalorder %v4630_v5, 14 }
 0x2a0   : > { %v3821_v8 = vpop.permute.xlu2 %3820  ;;  %v1005_v32 = vpop.permute.xlu0 %1004 }
 0x2a1   : > { %v3823_v11 = vunpack.i.h.bf16 %v3821_v8  ;;  %v3822_v12 = vunpack.i.l.bf16 %v3821_v8  ;;  %vm388_vm1 = vcmp.ge.s32.totalorder %v4632_v6, 1  ;;  %vm394_vm3 = vcmp.le.s32.totalorder %v4632_v6, 14 }
 0x2a3   : > { %v781_v15 = vsel %vm780_vm11, %v3822_v12, %v3823_v11  ;;  %v782_v16 = vsel %vm780_vm11, %v3823_v11, %v779_v7 }
 0x2a4   : > { %803 = vmatpush.msra.mxu2 %v781_v15  ;;  %823 = vmatpush.msra.mxu3 %v782_v16  ;;  %v4639_v15 = vsel %vm387_vm0, 1.0, %v4424_v33  ;;  %v4642_v16 = vsel %vm388_vm1, 1.0, %v4424_v33  ;;  %vm1403_vm0 = vcmask 261120   ;;  %vm1668_vm1 = vcmask 777216  }
 0x2a5   : > { %3651 = vmatmul.msk.f32.vlgmr.msra.gmra.mxu0 %vm563_vm8, %v3650_v13  ;;  %3653 = vmatmul.msk.f32.vlgmr.msra.gmra.mxu2 %vm563_vm8, %v3649_v14 }
 0x2a6   : > { %919 = vmatpush.msrb.mxu2 %v897_v17  ;;  %v3831_v18 = vpop.permute.xlu1 %3830  ;;  %3654 = vmatmul.msk.f32.vlgmr.msra.gmra.mxu3 %vm563_vm8, %v3649_v14 }
 0x2a7   : > { %v3833_v21 = vunpack.i.h.bf16 %v3831_v18  ;;  %v3832_v22 = vunpack.i.l.bf16 %v3831_v18  ;;  %3652 = vmatmul.msk.f32.vlgmr.msra.gmra.mxu1 %vm563_vm8, %v3650_v13 }
 0x2a8   : > { %v895_v23 = vpop.permute.xlu2 %894 }
 0x2a9   : > { %v898_v25 = vsel %vm896_vm12, %v3828_v9, %v895_v23  ;;  %v837_v26 = vsel %vm836_vm13, %v3832_v22, %v3833_v21 }
 0x2aa   : > { %859 = vmatpush.msrb.mxu0 %v837_v26  ;;  %939 = vmatpush.msrb.mxu3 %v898_v25  ;;  %v4645_v26 = vsel %vm393_vm2, 1.0, %v4424_v33  ;;  %vm1602_vm2 = vcmask 252928  }
 0x2ad   : > { %3656 = vmatmul.msk.f32.vlgmr.msrb.gmra.mxu0 %vm563_vm8, %v3655_v27  ;;  %3660 = vmatmul.msk.f32.vlgmr.msrb.gmra.mxu2 %vm563_vm8, %v3659_v28 }
 0x2ae   : > { %v3836_v29 = vpop.permute.xlu1 %3835  ;;  %3661 = vmatmul.msk.f32.vlgmr.msrb.gmra.mxu3 %vm563_vm8, %v3659_v28 }
 0x2af   : > { %v3838_v30 = vunpack.i.h.bf16 %v3836_v29  ;;  %v3837_v31 = vunpack.i.l.bf16 %v3836_v29 }
 0x2b0   : > { %v835_v34 = vpop.permute.xlu2 %834 }
 0x2b1   : > { %v838_v35 = vsel %vm836_vm13, %v3833_v21, %v835_v34  ;;  %v1007_v36 = vsel %vm1006_vm14, %v3837_v31, %v3838_v30  ;;  %v1008_v37 = vsel %vm1006_vm14, %v3838_v30, %v1005_v32  ;;  %vm1210_vm13 = vcmask 269312  }
 0x2b2   : > { %879 = vmatpush.msrb.mxu1 %v838_v35  ;;  %1029 = vmatpush.msra.mxu2 %v1007_v36  ;;  %vm1288_vm14 = vcmask 793600  }
 0x2b3   : > { %1049 = vmatpush.msra.mxu3 %v1008_v37  ;;  %3657 = vmatmul.msk.f32.vlgmr.msrb.gmra.mxu1 %vm563_vm8, %v3655_v27  ;;  %v4648_v27 = vsel %vm394_vm3, 1.0, %v4424_v33 }
 0x2b5   : > { %3665 = vmatmul.msk.f32.vlgmr.msra.gmra.mxu2 %vm563_vm8, %v3664_v38 }
 0x2b6   : > { %3666 = vmatmul.msk.f32.vlgmr.msra.gmra.mxu3 %vm563_vm8, %v3664_v38  ;;  %v949_v42 = vpop.permute.xlu1 %948 }
 0x2b8   : > { %v3841_v39 = vpop.permute.xlu2 %3840 }
 0x2b9   : > { %v3843_v40 = vunpack.i.h.bf16 %v3841_v39  ;;  %v3842_v41 = vunpack.i.l.bf16 %v3841_v39  ;;  %v1067_v39 = vpop.permute.xlu0 %1066 }
 0x2bb   : > { %v951_v49 = vsel %vm950_vm15, %v3842_v41, %v3843_v40  ;;  %v952_v50 = vsel %vm950_vm15, %v3843_v40, %v949_v42  ;;  %vm1469_vm15 = vcmask 785408  }
 0x2bc   : > { %973 = vmatpush.msra.mxu0 %v951_v49  ;;  %993 = vmatpush.msra.mxu1 %v952_v50 }
 0x2bd   : > { %3662 = vmatmul.msk.f32.vlgmr.msra.gmra.mxu0 %vm563_vm8, %v3658_v48  ;;  %3663 = vmatmul.msk.f32.vlgmr.msra.gmra.mxu1 %vm563_vm8, %v3658_v48  ;;  %v4657_v48 = vpack.i.bf16 0.0, %v4536_v44 }
 0x308   : > { %v584_v51 = vpop.f32.mrf.mxu2 }
 0x30e   : > { %v604_v52 = vpop.f32.mrf.mxu3 }
 0x318   : > { %v700_v55 = vpop.f32.mrf.mxu2  ;;  %v720_v56 = vpop.f32.mrf.mxu3 }
 0x31a   : > { %v638_v53 = vpop.f32.mrf.mxu0  ;;  %v658_v54 = vpop.f32.mrf.mxu1 }
 0x31b   : > { %v639_v7 = vadd.f32 %v638_v53, %v584_v51  ;;  %v659_v8 = vadd.f32 %v658_v54, %v604_v52 }
 0x31d   : > { %v723_v10 = vadd.f32 %v700_v55, %v639_v7  ;;  %v724_v11 = vadd.f32 %v720_v56, %v659_v8 }
 0x31f   : > { %v725_v28 = vmul.f32 %v4639_v15, %v723_v10  ;;  %v726_v29 = vmul.f32 %v4642_v16, %v724_v11 }
 0x322   : > { %v751_v58 = vpop.f32.mrf.mxu0 }
 0x324   : > { %v771_v59 = vpop.f32.mrf.mxu1 }
 0x328   : > { %v805_v60 = vpop.f32.mrf.mxu2 }
 0x329   : > { %v825_v61 = vpop.f32.mrf.mxu3  ;;  %v806_v9 = vadd.f32 %v805_v60, %v751_v58 }
 0x32a   : > { %v861_v3 = vpop.f32.mrf.mxu0  ;;  %v826_v12 = vadd.f32 %v825_v61, %v771_v59 }
 0x32b   : > { %v884_v21 = vadd.f32 %v861_v3, %v806_v9 }
 0x32d   : > { %v1058_v32 = vadd.f32 %v884_v21, %v725_v28 }
 0x330   : > { %v921_v1 = vpop.f32.mrf.mxu2  ;;  %v881_v4 = vpop.f32.mrf.mxu1 }
 0x331   : > { %v941_v2 = vpop.f32.mrf.mxu3  ;;  %v885_v22 = vadd.f32 %v881_v4, %v826_v12 }
 0x333   : > { %v1059_v34 = vadd.f32 %v885_v22, %v726_v29 }
 0x338   : > { %v1031_v13 = vpop.f32.mrf.mxu2 }
 0x339   : > { %v1051_v14 = vpop.f32.mrf.mxu3 }
 0x33a   : > { %v975_v17 = vpop.f32.mrf.mxu0  ;;  %v995_v18 = vpop.f32.mrf.mxu1 }
 0x33b   : > { %v976_v23 = vadd.f32 %v975_v17, %v921_v1  ;;  %v996_v25 = vadd.f32 %v995_v18, %v941_v2 }
 0x33d   : > { %v1054_v30 = vadd.f32 %v1031_v13, %v976_v23  ;;  %v1055_v31 = vadd.f32 %v1051_v14, %v996_v25  ;;  %v1104_v13 = vpop.permute.xlu0 %1103 }
 0x33f   : > { %v1056_v35 = vmul.f32 %v4645_v26, %v1054_v30  ;;  %v1057_v36 = vmul.f32 %v4648_v27, %v1055_v31 }
 0x341   : > { %v1060_v37 = vadd.f32 %v1058_v32, %v1056_v35  ;;  %v1061_v38 = vadd.f32 %v1059_v34, %v1057_v36 }
 0x343   : > { %v1069_v40 = vadd.f32 %v1067_v39, %v1060_v37  ;;  %v1070_v41 = vadd.f32 %v1067_v39, %v1061_v38 }
 0x345   : > { %v1071_v42 = vadd.f32 %v1070_v41, %v1069_v40 }
 0x347   : > { %1072 = vadd.xlane.f32.xlu2 %v1071_v42 }
 0x35f   : > { %3848 = vrot.lane.b32.xlu2 %v4545_v46, %s4428_s11 }
 0x367   : > { %3878 = vrot.lane.b32.xlu2 %v4657_v48, %s4433_s18 }
 0x3ba   : > { %v1073_v49 = vpop.xlane.xlu2 %1072 }
 0x3bb   : > { %v1074_v50 = vmul.f32 0.00390625, %v1073_v49 }
 0x3bd   : > { %v1075_v51 = vsub.f32 %v1069_v40, %v1074_v50  ;;  %v1076_v52 = vsub.f32 %v1070_v41, %v1074_v50  ;;  %v4720_v41 = vld [vmem:[%s5471_s7 + $0x10] sm:$0xff] }
 0x3bf   : > { %v1077_v53 = vmul.f32 %v1075_v51, %v1075_v51  ;;  %v1078_v54 = vmul.f32 %v1076_v52, %v1076_v52 }
 0x3c1   : > { %v1079_v55 = vadd.f32 %v1078_v54, %v1077_v53 }
 0x3c2   : > { %v3849_v56 = vpop.permute.xlu2 %3848 }
 0x3c3   : > { %v3851_v57 = vunpack.i.h.bf16 %v3849_v56  ;;  %v3850_v58 = vunpack.i.l.bf16 %v3849_v56  ;;  %1080 = vadd.xlane.f32.xlu1 %v1079_v55  ;;  %v3668_v56 = vld [vmem:[%s5467_s3 + $0x18] sm:$0xff] }
 0x3c5   : > { %v1149_v59 = vsel %vm558_vm7, %v3850_v58, %v3851_v57 }
 0x3c6   : > { %1172 = vmatpush.msrb.mxu0 %v1149_v59 }
 0x3ca   : > { %v4744_v42 = vpop.permute.xlu2 %3878 }
 0x3dc   : > { %3853 = vrot.lane.b32.xlu1 %v4657_v48, %s4428_s11 }
 0x3e4   : > { %3883 = vrot.lane.b32.xlu1 %v4541_v45, %s4434_s19 }
 0x3ec   : > { %3893 = vrot.lane.b32.xlu1 %v4545_v46, %s4435_s20 }
 0x436   : > { %v1081_v60 = vpop.xlane.xlu1 %1080 }
 0x437   : > { %v1082_v61 = vmul.f32 0.00390625, %v1081_v60 }
 0x439   : > { %v1083_v62 = vadd.f32 1e-05, %v1082_v61 }
 0x43b   : > { %4330 = vrsqrt.f32 %v1083_v62  ;;  %vm1090_vm5 = vweird.f32 %v1083_v62 }
 0x441   : > { %v4331_v63 = vpop.eup %4330 }
 0x442   : > { %v1085_v1 = vmul.f32 %v4331_v63, %v1083_v62  ;;  %vm1091_vm4 = vweird.f32 %v4331_v63 }
 0x443   : > { %vm1092_vm6 = vmor %vm1090_vm5, %vm1091_vm4 }
 0x444   : > { %v1086_v2 = vmul.f32 %v4331_v63, %v1085_v1 }
 0x446   : > { %v1087_v3 = vmul.f32 0.5, %v1086_v2 }
 0x448   : > { %v1088_v4 = vsub.f32 1.5, %v1087_v3 }
 0x44a   : > { %v1089_v7 = vmul.f32 %v4331_v63, %v1088_v4 }
 0x44c   : > { %v1093_v8 = vsel %vm1092_vm6, %v4331_v63, %v1089_v7 }
 0x44d   : > { %v1094_v9 = vmul.f32 %v4558_v47, %v1093_v8 }
 0x44e   : > { %v4669_v10 = vpop.permute.xlu1 %3853 }
 0x44f   : > { %v3855_v11 = vunpack.i.l.bf16 %v4669_v10  ;;  %1097 = vperm.xlu0 %3845, %v1094_v9   ;;  %v3856_v53 = vunpack.i.h.bf16 %v4669_v10 }
 0x451   : > { %v1150_v12 = vsel %vm558_vm7, %v3851_v57, %v3855_v11 }
 0x452   : > { %1192 = vmatpush.msrb.mxu1 %v1150_v12 }
 0x456   : > { %v3884_v60 = vpop.permute.xlu1 %3883 }
 0x457   : > { %3846 = vset.pattern.permute.xlu0 %v4423_v24 }
 0x458   : > { %1111 = vperm.xlu0 %3846, %v4558_v47  }
 0x45e   : > { %v4758_v2 = vpop.permute.xlu1 %3893 }
 0x460   : > { %3858 = vrot.lane.b32.xlu0 %v4545_v46, %s4436_s21 }
 0x461   : > { %3967 = vset.pattern.permute.xlu0 %v5473_v0 }
 0x468   : > { %3863 = vrot.lane.b32.xlu0 %v4657_v48, %s4436_s21 }
 0x470   : > { %3868 = vrot.lane.b32.xlu0 %v4541_v45, %s4437_s22 }
 0x478   : > { %3873 = vrot.lane.b32.xlu0 %v4545_v46, %s4433_s18 }
 0x480   : > { %3888 = vrot.lane.b32.xlu0 %v4541_v45, %s4427_s10 }
 0x4c1   : > { %v1098_v14 = vpop.permute.xlu0 %1097 }
 0x4c2   : > { %v1100_v47 = vmul.f32 %v1098_v14, %v1075_v51  ;;  %v1101_v17 = vmul.f32 %v1098_v14, %v1076_v52 }
 0x4c4   : > { %v1106_v18 = vadd.f32 %v1104_v13, %v1100_v47  ;;  %v1107_v21 = vadd.f32 %v1104_v13, %v1101_v17  ;;  %v1120_v13 = vld [vmem:[%s5467_s3] sm:$0xff]  ;;  %v3886_v17 = vunpack.i.h.bf16 %v3884_v60 }
 0x4c6   : > { %vm1108_vm9 = vcmp.ge.f32.partialorder %v1106_v18, 0.0  ;;  %vm1109_vm10 = vcmp.ge.f32.partialorder %v1107_v21, 0.0 }
 0x4ca   : > { %v1112_v22 = vpop.permute.xlu0 %1111 }
 0x4cb   : > { %v1114_v23 = vmul.f32 %v1112_v22, %v1106_v18  ;;  %v1115_v25 = vmul.f32 %v1112_v22, %v1107_v21 }
 0x4cd   : > { %v4684_v28 = vsel %vm1108_vm9, %v1106_v18, %v1114_v23  ;;  %v4686_v29 = vsel %vm1109_vm10, %v1107_v21, %v1115_v25  ;;  %v3885_v18 = vunpack.i.l.bf16 %v3884_v60  ;;  %v3896_v60 = vunpack.i.h.bf16 %v4758_v2 }
 0x4ce   : > { %v4690_v30 = vpack.i.bf16 %v4684_v28, %v4424_v33  ;;  %v4694_v31 = vpack.i.bf16 %v4686_v29, %v4684_v28  ;;  %v4703_v37 = vpack.i.bf16 0.0, %v4686_v29  ;;  %vm1837_vm10 = vcmask 195584  }
 0x4cf   : > { %v1472_v25 = vsel %vm1469_vm15, %v3885_v18, %v3886_v17 }
 0x4d0   : > { %3918 = vrot.lane.b32.xlu0 %v4690_v30, %s4434_s19  ;;  %3903 = vrot.lane.b32.xlu1 %v4694_v31, %s4436_s21 }
 0x4d1   : > { %3898 = vrot.lane.b32.xlu2 %v4694_v31, %s4428_s11 }
 0x4d2   : > { %v3859_v32 = vpop.permute.xlu0 %3858 }
 0x4d3   : > { %v3861_v34 = vunpack.i.h.bf16 %v3859_v32  ;;  %v3860_v35 = vunpack.i.l.bf16 %v3859_v32 }
 0x4d5   : > { %v1213_v36 = vsel %vm1210_vm13, %v3860_v35, %v3861_v34 }
 0x4d6   : > { %1236 = vmatpush.msrb.mxu2 %v1213_v36 }
 0x4d8   : > { %3923 = vrot.lane.b32.xlu0 %v4657_v48, %s4435_s20  ;;  %3913 = vrot.lane.b32.xlu1 %v4703_v37, %s4437_s22 }
 0x4d9   : > { %3908 = vrot.lane.b32.xlu2 %v4690_v30, %s4437_s22  ;;  %s3745_s22 = sshll.u32 %s5477_s9, 4 }
 0x4da   : > { %v3864_v38 = vpop.permute.xlu0 %3863  ;;  %s339_s25 = scalar_lea.vmem %s5472_s8, %s3745_s22 }
 0x4db   : > { %v3865_v39 = vunpack.i.l.bf16 %v3864_v38  ;;  %v3866_v9 = vunpack.i.h.bf16 %v3864_v38 }
 0x4dd   : > { %v1214_v40 = vsel %vm1210_vm13, %v3861_v34, %v3865_v39 }
 0x4de   : > { %1256 = vmatpush.msrb.mxu3 %v1214_v40 }
 0x4e0   : > { %3928 = vrot.lane.b32.xlu0 %v4541_v45, %s4438_s23  ;;  %3938 = vrot.lane.b32.xlu1 %v4703_v37, %s4434_s19 }
 0x4e1   : > { %3933 = vrot.lane.b32.xlu2 %v4694_v31, %s4433_s18 }
 0x4e2   : > { %v3869_v49 = vpop.permute.xlu0 %3868 }
 0x4e3   : > { %v3871_v50 = vunpack.i.h.bf16 %v3869_v49  ;;  %v3870_v51 = vunpack.i.l.bf16 %v3869_v49  ;;  %v3673_v49 = vld [vmem:[%s5467_s3 + $0x30] sm:$0xff] }
 0x4e5   : > { %v1291_v59 = vsel %vm1288_vm14, %v3870_v51, %v3871_v50 }
 0x4e8   : > { %1732 = vperm.xlu0 %3967, %v4720_v41   ;;  %3953 = vrot.lane.b32.xlu1 %v4694_v31, %s4435_s20 }
 0x4e9   : > { %3943 = vrot.lane.b32.xlu2 %v4690_v30, %s4427_s10 }
 0x4ea   : > { %v4753_v61 = vpop.permute.xlu0 %3873 }
 0x4eb   : > { %v3876_v39 = vunpack.i.h.bf16 %v4753_v61  ;;  %v3875_v40 = vunpack.i.l.bf16 %v4753_v61 }
 0x4ed   : > { %v1406_v61 = vsel %vm1403_vm0, %v3875_v40, %v3876_v39 }
 0x4f0   : > { %3968 = vset.pattern.permute.xlu0 %v4422_v20  ;;  %3963 = vrot.lane.b32.xlu1 %v4703_v37, %s4438_s23 }
 0x4f1   : > { %3948 = vrot.lane.b32.xlu2 %v4703_v37, %s4427_s10  ;;  %1769 = vperm.xlu0 %3968, %v4720_v41  }
 0x4f2   : > { %v4760_v3 = vpop.permute.xlu0 %3888 }
 0x4f3   : > { %v3890_v51 = vunpack.i.l.bf16 %v4760_v3 }
 0x4f9   : > { %3958 = vrot.lane.b32.xlu2 %v4690_v30, %s4438_s23  ;;  %3970 = vrot.lane.b32.xlu0 %v4545_v46, %s4428_s11 }
 0x4fa   : > { %4014 = vset.pattern.permute.xlu0 %v4421_v19 }
 0x501   : > { %3980 = vrot.lane.b32.xlu0 %v4694_v31, %s4428_s11 }
 0x509   : > { %3985 = vrot.lane.b32.xlu0 %v4541_v45, %s4439_s26 }
 0x511   : > { %4000 = vrot.lane.b32.xlu0 %v4545_v46, %s4439_s26 }
 0x519   : > { %4005 = vrot.lane.b32.xlu0 %v4690_v30, %s4439_s26 }
 0x52b   : > { %v3899_v52 = vpop.permute.xlu2 %3898 }
 0x52c   : > { %v3901_v54 = vunpack.i.h.bf16 %v3899_v52  ;;  %v3900_v55 = vunpack.i.l.bf16 %v3899_v52 }
 0x52e   : > { %v1147_v57 = vsel %vm558_vm7, %v3856_v53, %v3900_v55  ;;  %v1148_v58 = vsel %vm558_vm7, %v3900_v55, %v3901_v54  ;;  %v3677_v54 = vld [vmem:[%s5467_s3 + $0x20] sm:$0xff]  ;;  %v3880_v55 = vunpack.i.l.bf16 %v4744_v42 }
 0x52f   : > { %1173 = vmatpush.msrb.mxu0 %v1147_v57  ;;  %1193 = vmatpush.msrb.mxu1 %v1148_v58 }
 0x530   : > { %3670 = vmatmul.msk.f32.vlgmr.msrb.gmra.mxu1 %vm780_vm11, %v3668_v56  ;;  %3669 = vmatmul.msk.f32.vlgmr.msrb.gmra.mxu0 %vm780_vm11, %v3668_v56 }
 0x531   : > { %1314 = vmatpush.msra.mxu0 %v1291_v59  ;;  %v3881_v59 = vunpack.i.h.bf16 %v4744_v42 }
 0x533   : > { %v3909_v62 = vpop.permute.xlu2 %3908 }
 0x534   : > { %v3910_v63 = vunpack.i.l.bf16 %v3909_v62  ;;  %v3911_v34 = vunpack.i.h.bf16 %v3909_v62  ;;  %v1407_v62 = vsel %vm1403_vm0, %v3876_v39, %v3880_v55 }
 0x536   : > { %v1292_v1 = vsel %vm1288_vm14, %v3871_v50, %v3910_v63  ;;  %v3891_v50 = vunpack.i.h.bf16 %v4760_v3  ;;  %v3895_v63 = vunpack.i.l.bf16 %v4758_v2 }
 0x537   : > { %1334 = vmatpush.msra.mxu1 %v1292_v1 }
 0x538   : > { %v1605_v40 = vsel %vm1602_vm2, %v3895_v63, %v3896_v60 }
 0x53b   : > { %v4762_v4 = vpop.permute.xlu2 %3933 }
 0x53c   : > { %v3936_v56 = vunpack.i.h.bf16 %v4762_v4  ;;  %v3935_v57 = vunpack.i.l.bf16 %v4762_v4  ;;  %v1541_v4 = vsel %vm896_vm12, %v3890_v51, %v3891_v50 }
 0x542   : > { %v4764_v7 = vpop.permute.xlu0 %3918  ;;  %v3904_v8 = vpop.permute.xlu1 %3903 }
 0x543   : > { %v3906_v10 = vunpack.i.h.bf16 %v3904_v8  ;;  %v3905_v11 = vunpack.i.l.bf16 %v3904_v8  ;;  %v4766_v12 = vpop.permute.xlu2 %3943  ;;  %v3920_v21 = vunpack.i.l.bf16 %v4764_v7  ;;  %v3921_v42 = vunpack.i.h.bf16 %v4764_v7 }
 0x544   : > { %v3945_v58 = vunpack.i.l.bf16 %v4766_v12  ;;  %v1404_v8 = vsel %vm1403_vm0, %v3881_v59, %v3935_v57 }
 0x545   : > { %v1211_v14 = vsel %vm1210_vm13, %v3866_v9, %v3905_v11  ;;  %v1212_v47 = vsel %vm1210_vm13, %v3905_v11, %v3906_v10  ;;  %v1473_v32 = vsel %vm1469_vm15, %v3886_v17, %v3920_v21  ;;  %v1405_v9 = vsel %vm1403_vm0, %v3935_v57, %v3936_v56  ;;  %v3686_v57 = vld [vmem:[%s5467_s3 + $0x28] sm:$0xff] }
 0x546   : > { %1237 = vmatpush.msrb.mxu2 %v1211_v14  ;;  %1257 = vmatpush.msrb.mxu3 %v1212_v47  ;;  %v1542_v17 = vsel %vm896_vm12, %v3891_v50, %v3945_v58  ;;  %v3685_v58 = vld [vmem:[%s5467_s3 + $0x10] sm:$0xff]  ;;  %vm2117_vm13 = vcmask 523264  }
 0x547   : > { %3671 = vmatmul.msk.f32.vlgmr.msrb.gmra.mxu2 %vm780_vm11, %v1120_v13  ;;  %3672 = vmatmul.msk.f32.vlgmr.msrb.gmra.mxu3 %vm780_vm11, %v1120_v13  ;;  %v3946_v13 = vunpack.i.h.bf16 %v4766_v12 }
 0x548   : > { %1365 = vmatpush.msra.mxu2 %v4534_v43  ;;  %1385 = vmatpush.msra.mxu3 %v4536_v44 }
 0x54a   : > { %1366 = vmatpush.msra.mxu2 %v4684_v28  ;;  %1386 = vmatpush.msra.mxu3 %v4686_v29  ;;  %v4780_v22 = vpop.permute.xlu0 %3923  ;;  %v3914_v23 = vpop.permute.xlu1 %3913 }
 0x54b   : > { %v3916_v35 = vunpack.i.h.bf16 %v3914_v23  ;;  %v3915_v36 = vunpack.i.l.bf16 %v3914_v23  ;;  %v3949_v38 = vpop.permute.xlu2 %3948  ;;  %v3925_v18 = vunpack.i.l.bf16 %v4780_v22 }
 0x54c   : > { %1495 = vmatpush.msrb.mxu2 %v1472_v25  ;;  %1515 = vmatpush.msrb.mxu3 %v1473_v32  ;;  %v3951_v1 = vunpack.i.h.bf16 %v3949_v38  ;;  %v3950_v3 = vunpack.i.l.bf16 %v3949_v38 }
 0x54d   : > { %v1289_v52 = vsel %vm1288_vm14, %v3911_v34, %v3915_v36  ;;  %v1290_v53 = vsel %vm1288_vm14, %v3915_v36, %v3916_v35  ;;  %v3676_v35 = vld [vmem:[%s5467_s3 + $0x8] sm:$0xff]  ;;  %v3682_v36 = vld [vmem:[%s5467_s3 + $0x38] sm:$0xff]  ;;  %vm2345_vm14 = vcmask 515072  }
 0x54e   : > { %1315 = vmatpush.msra.mxu0 %v1289_v52  ;;  %1335 = vmatpush.msra.mxu1 %v1290_v53  ;;  %v1539_v25 = vsel %vm896_vm12, %v3946_v13, %v3950_v3  ;;  %v1540_v32 = vsel %vm896_vm12, %v3950_v3, %v3951_v1  ;;  %v3926_v52 = vunpack.i.h.bf16 %v4780_v22  ;;  %v3691_v3 = vld [vmem:[%s5467_s3 + $0x40] sm:$0xff] }
 0x54f   : > { %3674 = vmatmul.msk.f32.vlgmr.msra.gmra.mxu0 %vm780_vm11, %v3673_v49  ;;  %3675 = vmatmul.msk.f32.vlgmr.msra.gmra.mxu1 %vm780_vm11, %v3673_v49  ;;  %v1606_v49 = vsel %vm1602_vm2, %v3896_v60, %v3925_v18 }
 0x550   : > { %3678 = vmatmul.msk.f32.vlgmr.msra.gmra.mxu2 %vm780_vm11, %v3677_v54  ;;  %3679 = vmatmul.msk.f32.vlgmr.msra.gmra.mxu3 %vm780_vm11, %v3677_v54 }
 0x551   : > { %1429 = vmatpush.msrb.mxu0 %v1406_v61  ;;  %1449 = vmatpush.msrb.mxu1 %v1407_v62 }
 0x552   : > { %v3929_v10 = vpop.permute.xlu0 %3928  ;;  %v3939_v11 = vpop.permute.xlu1 %3938 }
 0x553   : > { %1430 = vmatpush.msrb.mxu0 %v1404_v8  ;;  %1450 = vmatpush.msrb.mxu1 %v1405_v9  ;;  %v3941_v2 = vunpack.i.h.bf16 %v3939_v11  ;;  %v3940_v14 = vunpack.i.l.bf16 %v3939_v11  ;;  %v3959_v47 = vpop.permute.xlu2 %3958  ;;  %v3931_v21 = vunpack.i.h.bf16 %v3929_v10  ;;  %v3930_v7 = vunpack.i.l.bf16 %v3929_v10 }
 0x554   : > { %v3960_v23 = vunpack.i.l.bf16 %v3959_v47  ;;  %v3961_v59 = vunpack.i.h.bf16 %v3959_v47 }
 0x555   : > { %1564 = vmatpush.msra.mxu0 %v1541_v4  ;;  %1584 = vmatpush.msra.mxu1 %v1542_v17  ;;  %v1470_v12 = vsel %vm1469_vm15, %v3921_v42, %v3940_v14  ;;  %v1471_v34 = vsel %vm1469_vm15, %v3940_v14, %v3941_v2  ;;  %v1671_v38 = vsel %vm1668_vm1, %v3930_v7, %v3931_v21 }
 0x556   : > { %1496 = vmatpush.msrb.mxu2 %v1470_v12  ;;  %1516 = vmatpush.msrb.mxu3 %v1471_v34  ;;  %v1672_v39 = vsel %vm1668_vm1, %v3931_v21, %v3960_v23 }
 0x557   : > { %1565 = vmatpush.msra.mxu0 %v1539_v25  ;;  %1585 = vmatpush.msra.mxu1 %v1540_v32 }
 0x558   : > { %3680 = vmatmul.msk.f32.vlgmr.msrb.gmra.mxu0 %vm780_vm11, %v3676_v35  ;;  %3681 = vmatmul.msk.f32.vlgmr.msrb.gmra.mxu1 %vm780_vm11, %v3676_v35 }
 0x559   : > { %3683 = vmatmul.msk.f32.vlgmr.msrb.gmra.mxu2 %vm780_vm11, %v3682_v36  ;;  %3684 = vmatmul.msk.f32.vlgmr.msrb.gmra.mxu3 %vm780_vm11, %v3682_v36 }
 0x55a   : > { %1628 = vmatpush.msra.mxu2 %v1605_v40  ;;  %1648 = vmatpush.msra.mxu3 %v1606_v49  ;;  %v3954_v50 = vpop.permute.xlu1 %3953  ;;  %v4834_v51 = vpop.permute.xlu0 %1732 }
 0x55b   : > { %1694 = vmatpush.msrb.mxu0 %v1671_v38  ;;  %1714 = vmatpush.msrb.mxu1 %v1672_v39  ;;  %v3956_v53 = vunpack.i.h.bf16 %v3954_v50  ;;  %v3955_v54 = vunpack.i.l.bf16 %v3954_v50 }
 0x55d   : > { %v1603_v55 = vsel %vm1602_vm2, %v3926_v52, %v3955_v54  ;;  %v1604_v56 = vsel %vm1602_vm2, %v3955_v54, %v3956_v53 }
 0x55e   : > { %1629 = vmatpush.msra.mxu2 %v1603_v55  ;;  %1649 = vmatpush.msra.mxu3 %v1604_v56 }
 0x560   : > { %3687 = vmatmul.msk.f32.vlgmr.msra.gmra.mxu0 %vm780_vm11, %v3686_v57  ;;  %3688 = vmatmul.msk.f32.vlgmr.msra.gmra.mxu1 %vm780_vm11, %v3686_v57 }
 0x561   : > { %3689 = vmatmul.msk.f32.vlgmr.msra.gmra.mxu2 %vm780_vm11, %v3685_v58  ;;  %3690 = vmatmul.msk.f32.vlgmr.msra.gmra.mxu3 %vm780_vm11, %v3685_v58 }
 0x562   : > { %v3964_v22 = vpop.permute.xlu1 %3963 }
 0x563   : > { %v3966_v60 = vunpack.i.h.bf16 %v3964_v22  ;;  %v3965_v61 = vunpack.i.l.bf16 %v3964_v22  ;;  %v4849_v62 = vpop.permute.xlu0 %1769 }
 0x565   : > { %v1669_v63 = vsel %vm1668_vm1, %v3961_v59, %v3965_v61  ;;  %v1670_v1 = vsel %vm1668_vm1, %v3965_v61, %v3966_v60 }
 0x566   : > { %1695 = vmatpush.msrb.mxu0 %v1669_v63  ;;  %1715 = vmatpush.msrb.mxu1 %v1670_v1 }
 0x568   : > { %3692 = vmatmul.msk.f32.vlgmr.msrb.gmra.mxu0 %vm780_vm11, %v3691_v3  ;;  %3693 = vmatmul.msk.f32.vlgmr.msrb.gmra.mxu1 %vm780_vm11, %v3691_v3  ;;  %vm1899_vm11 = vcmask 531456  }
 0x56b   : > { %v4858_v4 = vpop.permute.xlu0 %3970 }
 0x56c   : > { %v3973_v42 = vunpack.i.h.bf16 %v4858_v4  ;;  %v3972_v8 = vunpack.i.l.bf16 %v4858_v4 }
 0x56e   : > { %v1829_v9 = vsel %vm558_vm7, %v3972_v8, %v3973_v42 }
 0x56f   : > { %1854 = vmatpush.msrb.mxu2 %v1829_v9 }
 0x573   : > { %v4865_v10 = vpop.permute.xlu0 %3980 }
 0x57b   : > { %v4867_v11 = vpop.permute.xlu0 %3985 }
 0x583   : > { %v4869_v13 = vpop.permute.xlu0 %4000 }
 0x584   : > { %v4003_v2 = vunpack.i.h.bf16 %v4869_v13  ;;  %v4002_v14 = vunpack.i.l.bf16 %v4869_v13 }
 0x586   : > { %v1904_v47 = vsel %vm1899_vm11, %v4002_v14, %v4003_v2 }
 0x587   : > { %1928 = vmatpush.msra.mxu0 %v1904_v47 }
 0x58b   : > { %v4876_v17 = vpop.permute.xlu0 %4005 }
 0x58c   : > { %v4008_v18 = vunpack.i.h.bf16 %v4876_v17  ;;  %v4007_v21 = vunpack.i.l.bf16 %v4876_v17 }
 0x58e   : > { %v1902_v7 = vsel %vm1899_vm11, %v4007_v21, %v4008_v18 }
 0x58f   : > { %1929 = vmatpush.msra.mxu0 %v1902_v7 }
 0x5ad   : > { %v1175_v23 = vpop.f32.mrf.mxu0  ;;  %v1195_v25 = vpop.f32.mrf.mxu1 }
 0x5ca   : > { %v1239_v32 = vpop.f32.mrf.mxu2  ;;  %v1259_v12 = vpop.f32.mrf.mxu3 }
 0x5cb   : > { %v1240_v54 = vadd.f32 %v1239_v32, %v1175_v23  ;;  %v1260_v55 = vadd.f32 %v1259_v12, %v1195_v25 }
 0x5cc   : > { %v1317_v34 = vpop.f32.mrf.mxu0  ;;  %v1337_v35 = vpop.f32.mrf.mxu1 }
 0x5cd   : > { %v1340_v56 = vadd.f32 %v1317_v34, %v1240_v54  ;;  %v1341_v57 = vadd.f32 %v1337_v35, %v1260_v55 }
 0x5cf   : > { %v1342_v14 = vmul.f32 %v4639_v15, %v1340_v56  ;;  %v1343_v47 = vmul.f32 %v4642_v16, %v1341_v57 }
 0x5d3   : > { %v1368_v36 = vpop.f32.mrf.mxu2  ;;  %v1388_v38 = vpop.f32.mrf.mxu3 }
 0x5d5   : > { %v1432_v39 = vpop.f32.mrf.mxu0  ;;  %v1452_v40 = vpop.f32.mrf.mxu1 }
 0x5d6   : > { %v1433_v58 = vadd.f32 %v1432_v39, %v1368_v36  ;;  %v1453_v22 = vadd.f32 %v1452_v40, %v1388_v38 }
 0x5dc   : > { %v1498_v49 = vpop.f32.mrf.mxu2  ;;  %v1518_v50 = vpop.f32.mrf.mxu3 }
 0x5dd   : > { %v1567_v52 = vpop.f32.mrf.mxu0  ;;  %v1587_v53 = vpop.f32.mrf.mxu1  ;;  %v1521_v61 = vadd.f32 %v1498_v49, %v1433_v58  ;;  %v1522_v63 = vadd.f32 %v1518_v50, %v1453_v22 }
 0x5df   : > { %v1724_v23 = vadd.f32 %v1521_v61, %v1342_v14  ;;  %v1725_v25 = vadd.f32 %v1522_v63, %v1343_v47  ;;  %v3982_v14 = vunpack.i.l.bf16 %v4865_v10 }
 0x5e4   : > { %v1631_v59 = vpop.f32.mrf.mxu2  ;;  %v1651_v60 = vpop.f32.mrf.mxu3 }
 0x5e5   : > { %v1632_v1 = vadd.f32 %v1631_v59, %v1567_v52  ;;  %v1652_v3 = vadd.f32 %v1651_v60, %v1587_v53  ;;  %v1697_v8 = vpop.f32.mrf.mxu0  ;;  %v1717_v9 = vpop.f32.mrf.mxu1 }
 0x5e7   : > { %v1720_v21 = vadd.f32 %v1697_v8, %v1632_v1  ;;  %v1721_v7 = vadd.f32 %v1717_v9, %v1652_v3  ;;  %v3983_v9 = vunpack.i.h.bf16 %v4865_v10 }
 0x5e9   : > { %v1722_v32 = vmul.f32 %v4645_v26, %v1720_v21  ;;  %v1723_v12 = vmul.f32 %v4648_v27, %v1721_v7 }
 0x5eb   : > { %v1726_v34 = vadd.f32 %v1724_v23, %v1722_v32  ;;  %v1727_v35 = vadd.f32 %v1725_v25, %v1723_v12  ;;  %v1828_v25 = vsel %vm558_vm7, %v3982_v14, %v3983_v9 }
 0x5ed   : > { %v1735_v36 = vadd.f32 %v4834_v51, %v1726_v34  ;;  %v1736_v38 = vadd.f32 %v4834_v51, %v1727_v35 }
 0x5ef   : > { %v1737_v39 = vadd.f32 %v1736_v38, %v1735_v36 }
 0x5f1   : > { %1738 = vadd.xlane.f32.xlu2 %v1737_v39 }
 0x609   : > { %1777 = vperm.xlu2 %3803, %v4720_v41  }
 0x611   : > { %3995 = vrot.lane.b32.xlu2 %v4703_v37, %s4439_s26 }
 0x612   : > { %4145 = vset.pattern.permute.xlu2 %v5473_v0 }
 0x619   : > { %4026 = vrot.lane.b32.xlu2 %v4694_v31, %s4440_s29 }
 0x621   : > { %4031 = vrot.lane.b32.xlu2 %v4541_v45, %s4427_s10 }
 0x629   : > { %4046 = vrot.lane.b32.xlu2 %v4657_v48, %s4440_s29 }
 0x631   : > { %4051 = vrot.lane.b32.xlu2 %v4694_v31, %s4440_s29 }
 0x664   : > { %v1739_v51 = vpop.xlane.xlu2 %1738 }
 0x665   : > { %v1740_v40 = vmul.f32 0.00390625, %v1739_v51 }
 0x667   : > { %v1741_v49 = vsub.f32 %v1735_v36, %v1740_v40  ;;  %v1742_v50 = vsub.f32 %v1736_v38, %v1740_v40 }
 0x669   : > { %v1743_v52 = vmul.f32 %v1741_v49, %v1741_v49  ;;  %v1744_v53 = vmul.f32 %v1742_v50, %v1742_v50 }
 0x66b   : > { %v1745_v54 = vadd.f32 %v1744_v53, %v1743_v52  ;;  %v4972_v52 = vld [vmem:[%s5471_s7 + $0x18] sm:$0xff] }
 0x66c   : > { %v1778_v12 = vpop.permute.xlu2 %1777 }
 0x66d   : > { %1746 = vadd.xlane.f32.xlu1 %v1745_v54 }
 0x686   : > { %3975 = vrot.lane.b32.xlu1 %v4657_v48, %s4428_s11 }
 0x68e   : > { %3990 = vrot.lane.b32.xlu1 %v4690_v30, %s4439_s26 }
 0x696   : > { %4010 = vrot.lane.b32.xlu1 %v4703_v37, %s4439_s26 }
 0x69e   : > { %4021 = vrot.lane.b32.xlu1 %v4657_v48, %s4440_s29 }
 0x6a6   : > { %4041 = vrot.lane.b32.xlu1 %v4703_v37, %s4427_s10 }
 0x6ae   : > { %2258 = vrot.lane.b32.xlu1 %v4424_v33, %s4427_s10 }
 0x6e0   : > { %v1747_v55 = vpop.xlane.xlu1 %1746 }
 0x6e1   : > { %v1748_v56 = vmul.f32 0.00390625, %v1747_v55 }
 0x6e3   : > { %v1749_v57 = vadd.f32 1e-05, %v1748_v56 }
 0x6e5   : > { %4332 = vrsqrt.f32 %v1749_v57  ;;  %vm1756_vm4 = vweird.f32 %v1749_v57 }
 0x6eb   : > { %v4333_v58 = vpop.eup %4332 }
 0x6ec   : > { %v1751_v22 = vmul.f32 %v4333_v58, %v1749_v57  ;;  %vm1757_vm3 = vweird.f32 %v4333_v58 }
 0x6ed   : > { %vm1758_vm5 = vmor %vm1756_vm4, %vm1757_vm3 }
 0x6ee   : > { %v1752_v59 = vmul.f32 %v4333_v58, %v1751_v22 }
 0x6f0   : > { %v1753_v60 = vmul.f32 0.5, %v1752_v59 }
 0x6f2   : > { %v1754_v61 = vsub.f32 1.5, %v1753_v60 }
 0x6f4   : > { %v1755_v63 = vmul.f32 %v4333_v58, %v1754_v61 }
 0x6f6   : > { %v1759_v1 = vsel %vm1758_vm5, %v4333_v58, %v1755_v63 }
 0x6f7   : > { %v1760_v3 = vmul.f32 %v4720_v41, %v1759_v1 }
 0x6f8   : > { %v3976_v8 = vpop.permute.xlu1 %3975 }
 0x6f9   : > { %v3978_v47 = vunpack.i.h.bf16 %v3976_v8  ;;  %v3977_v21 = vunpack.i.l.bf16 %v3976_v8  ;;  %1763 = vperm.xlu0 %4014, %v1760_v3  }
 0x6fb   : > { %v1827_v7 = vsel %vm558_vm7, %v3978_v47, %v3982_v14  ;;  %v1830_v23 = vsel %vm558_vm7, %v3973_v42, %v3977_v21  ;;  %v5008_v47 = vld [vmem:[#allocation3] sm:$0xff] }
 0x6fc   : > { %1855 = vmatpush.msrb.mxu2 %v1827_v7  ;;  %1874 = vmatpush.msrb.mxu3 %v1830_v23  ;;  %v3988_v7 = vunpack.i.h.bf16 %v4867_v11  ;;  %v3987_v23 = vunpack.i.l.bf16 %v4867_v11 }
 0x6fe   : > { %1875 = vmatpush.msrb.mxu3 %v1828_v25 }
 0x700   : > { %v3991_v55 = vpop.permute.xlu1 %3990 }
 0x701   : > { %4016 = vrot.lane.b32.xlu0 %v4545_v46, %s4440_s29 }
 0x702   : > { %4327 = vset.pattern.permute.xlu0 %v4423_v24 }
 0x708   : > { %v4011_v57 = vpop.permute.xlu1 %4010 }
 0x709   : > { %4036 = vrot.lane.b32.xlu0 %v4690_v30, %s4427_s10  ;;  %v4013_v3 = vunpack.i.h.bf16 %v4011_v57 }
 0x710   : > { %v4993_v22 = vpop.permute.xlu1 %4021 }
 0x718   : > { %v4996_v60 = vpop.permute.xlu1 %4041 }
 0x720   : > { %v5002_v1 = vpop.permute.xlu1 %2258 }
 0x76b   : > { %v1764_v41 = vpop.permute.xlu0 %1763 }
 0x76c   : > { %v1766_v10 = vmul.f32 %v1764_v41, %v1741_v49  ;;  %v1767_v32 = vmul.f32 %v1764_v41, %v1742_v50  ;;  %v4966_v50 = vpop.permute.xlu2 %3995 }
 0x76e   : > { %v1772_v4 = vadd.f32 %v4849_v62, %v1766_v10  ;;  %v1773_v42 = vadd.f32 %v4849_v62, %v1767_v32  ;;  %v3992_v10 = vunpack.i.l.bf16 %v3991_v55 }
 0x770   : > { %vm1774_vm6 = vcmp.ge.f32.partialorder %v1772_v4, 0.0  ;;  %vm1775_vm9 = vcmp.ge.f32.partialorder %v1773_v42, 0.0  ;;  %v1780_v34 = vmul.f32 %v1778_v12, %v1772_v4  ;;  %v1781_v35 = vmul.f32 %v1778_v12, %v1773_v42 }
 0x771   : > { %v3998_v12 = vunpack.i.h.bf16 %v4966_v50 }
 0x772   : > { %v4928_v36 = vsel %vm1774_vm6, %v1772_v4, %v1780_v34  ;;  %v4930_v38 = vsel %vm1775_vm9, %v1773_v42, %v1781_v35  ;;  %v3993_v34 = vunpack.i.h.bf16 %v3991_v55  ;;  %v4012_v35 = vunpack.i.l.bf16 %v4011_v57 }
 0x773   : > { %1811 = vrot.lane.b32.xlu2 %v4930_v38, %s4428_s11  ;;  %v4060_v39 = vpack.i.bf16 %v4928_v36, %v4536_v44  ;;  %v4055_v51 = vpack.i.bf16 %v4928_v36, %v4424_v33  ;;  %v4941_v62 = vpack.i.bf16 0.0, %v4930_v38  ;;  %v4949_v40 = vpack.i.bf16 %v4930_v38, %v4928_v36  ;;  %v4998_v61 = vpop.permute.xlu0 %4016 }
 0x774   : > { %v4105_v49 = vpack.i.bf16 %v4534_v43, %v4930_v38  ;;  %v4976_v53 = vpop.permute.xlu2 %4026  ;;  %v4019_v13 = vunpack.i.h.bf16 %v4998_v61  ;;  %vm3427_vm9 = vcmask 1031168  }
 0x775   : > { %4061 = vrot.lane.b32.xlu1 %v4060_v39, %s4439_s26  ;;  %4056 = vrot.lane.b32.xlu0 %v4055_v51, %s4428_s11 }
 0x77b   : > { %4066 = vrot.lane.b32.xlu2 %v4941_v62, %s4439_s26  ;;  %v5004_v9 = vpop.permute.xlu0 %4036 }
 0x77c   : > { %v4980_v54 = vpop.permute.xlu2 %4031 }
 0x77d   : > { %4086 = vrot.lane.b32.xlu1 %v4703_v37, %s4441_s30  ;;  %4081 = vrot.lane.b32.xlu0 %v4690_v30, %s4441_s30 }
 0x783   : > { %4071 = vrot.lane.b32.xlu2 %v4949_v40, %s4439_s26 }
 0x784   : > { %v4984_v56 = vpop.permute.xlu2 %4046 }
 0x785   : > { %4106 = vrot.lane.b32.xlu1 %v4105_v49, %s4440_s29  ;;  %4101 = vrot.lane.b32.xlu0 %v4055_v51, %s4440_s29 }
 0x78b   : > { %4076 = vrot.lane.b32.xlu2 %v4541_v45, %s4441_s30 }
 0x78c   : > { %v4989_v58 = vpop.permute.xlu2 %4051 }
 0x78d   : > { %4121 = vrot.lane.b32.xlu1 %v4941_v62, %s4440_s29  ;;  %4111 = vrot.lane.b32.xlu0 %v4949_v40, %s4427_s10 }
 0x793   : > { %4091 = vrot.lane.b32.xlu2 %v4545_v46, %s4441_s30 }
 0x795   : > { %4136 = vrot.lane.b32.xlu1 %v4941_v62, %s4441_s30  ;;  %4116 = vrot.lane.b32.xlu0 %v4055_v51, %s4440_s29 }
 0x79b   : > { %4096 = vrot.lane.b32.xlu2 %v4690_v30, %s4441_s30 }
 0x79d   : > { %4141 = vrot.lane.b32.xlu1 %v4949_v40, %s4441_s30  ;;  %4126 = vrot.lane.b32.xlu0 %v4060_v39, %s4441_s30  ;;  %v3997_v39 = vunpack.i.l.bf16 %v4966_v50  ;;  %v1998_v50 = vsel %vm1899_vm11, %v3988_v7, %v3992_v10 }
 0x7a3   : > { %2488 = vperm.xlu2 %4145, %v4972_v52  }
 0x7a5   : > { %4131 = vrot.lane.b32.xlu0 %v4703_v37, %s4441_s30 }
 0x7ab   : > { %4146 = vset.pattern.permute.xlu2 %v4422_v20 }
 0x7ac   : > { %2525 = vperm.xlu2 %4146, %v4972_v52  }
 0x7b4   : > { %4147 = vset.pattern.permute.xlu2 %v4423_v24 }
 0x7b5   : > { %2533 = vperm.xlu2 %4147, %v4972_v52  }
 0x7bd   : > { %4149 = vrot.lane.b32.xlu2 %v4545_v46, %s4428_s11 }
 0x7be   : > { %4173 = vset.pattern.permute.xlu2 %v4421_v19 }
 0x7c5   : > { %4154 = vrot.lane.b32.xlu2 %v4657_v48, %s4428_s11 }
 0x7cd   : > { %4169 = vrot.lane.b32.xlu2 %v4055_v51, %s4428_s11  ;;  %v1812_v59 = vpop.permute.xlu2 %1811 }
 0x7d5   : > { %v5000_v63 = vpop.permute.xlu2 %4066 }
 0x7d6   : > { %v4069_v55 = vunpack.i.h.bf16 %v5000_v63  ;;  %v4068_v57 = vunpack.i.l.bf16 %v5000_v63  ;;  %v1996_v63 = vsel %vm1899_vm11, %v3997_v39, %v3998_v12 }
 0x7d8   : > { %v1994_v12 = vsel %vm1899_vm11, %v4068_v57, %v4069_v55 }
 0x7dd   : > { %v4072_v46 = vpop.permute.xlu2 %4071 }
 0x7de   : > { %v4073_v8 = vunpack.i.l.bf16 %v4072_v46 }
 0x7e0   : > { %v1900_v14 = vsel %vm1899_vm11, %v4013_v3, %v4073_v8  ;;  %v1797_v3 = vld [vmem:[#allocation3 + $0x18] sm:$0xff] }
 0x7e1   : > { %1930 = vmatpush.msra.mxu0 %v1900_v14  ;;  %v4074_v14 = vunpack.i.h.bf16 %v4072_v46  ;;  %v1903_v46 = vsel %vm1899_vm11, %v4008_v18, %v4012_v35  ;;  %v1956_v35 = vld [vmem:[#allocation3 + $0x30] sm:$0xff] }
 0x7e2   : > { %3697 = vmatmul.msk.f32.vlgmr.msra.gmra.mxu0 %vm1837_vm10, %v5008_v47 }
 0x7e3   : > { %2072 = vmatpush.msrb.mxu0 %v4534_v43  ;;  %v1901_v17 = vsel %vm1899_vm11, %v4073_v8, %v4074_v14  ;;  %v4048_v8 = vunpack.i.l.bf16 %v4984_v56 }
 0x7e5   : > { %2073 = vmatpush.msrb.mxu0 %v4684_v28  ;;  %v5013_v21 = vpop.permute.xlu2 %4076 }
 0x7e7   : > { %2074 = vmatpush.msrb.mxu0 %v4928_v36  ;;  %v4062_v25 = vpop.permute.xlu1 %4061  ;;  %v4057_v41 = vpop.permute.xlu0 %4056 }
 0x7e8   : > { %v4063_v32 = vunpack.i.l.bf16 %v4062_v25  ;;  %v4059_v4 = vunpack.i.h.bf16 %v4057_v41  ;;  %v4058_v42 = vunpack.i.l.bf16 %v4057_v41  ;;  %v4064_v0 = vunpack.i.h.bf16 %v4062_v25 }
 0x7e9   : > { %v1997_v41 = vsel %vm1899_vm11, %v3987_v23, %v3988_v7  ;;  %v1995_v25 = vsel %vm1899_vm11, %v3993_v34, %v3997_v39  ;;  %v4024_v7 = vunpack.i.h.bf16 %v4993_v22  ;;  %v4049_v34 = vunpack.i.h.bf16 %v4984_v56 }
 0x7ea   : > { %v1825_v51 = vsel %vm558_vm7, %v4058_v42, %v4059_v4  ;;  %v1826_v49 = vsel %vm558_vm7, %v4059_v4, %v1812_v59  ;;  %v1905_v11 = vsel %vm1899_vm11, %v4003_v2, %v4063_v32  ;;  %v5029_v59 = vld [vmem:[#allocation3 + $0x20] sm:$0xff]  ;;  %v4018_v2 = vunpack.i.l.bf16 %v4998_v61 }
 0x7eb   : > { %1856 = vmatpush.msrb.mxu2 %v1825_v51  ;;  %1876 = vmatpush.msrb.mxu3 %v1826_v49  ;;  %v1993_v18 = vsel %vm1899_vm11, %v4064_v0, %v4068_v57  ;;  %v4029_v32 = vunpack.i.h.bf16 %v4976_v53  ;;  %v4028_v4 = vunpack.i.l.bf16 %v4976_v53  ;;  %v4023_v42 = vunpack.i.l.bf16 %v4993_v22 }
 0x7ec   : > { %1948 = vmatpush.msra.mxu1 %v1905_v11  ;;  %3695 = vmatmul.msk.f32.vlgmr.msrb.gmra.mxu2 %vm1837_vm10, %v1797_v3  ;;  %v2122_v0 = vsel %vm2117_vm13, %v4018_v2, %v4019_v13  ;;  %v2198_v51 = vsel %vm2117_vm13, %v4048_v8, %v4049_v34  ;;  %v4034_v49 = vunpack.i.h.bf16 %v4980_v54  ;;  %v4033_v11 = vunpack.i.l.bf16 %v4980_v54 }
 0x7ed   : > { %2021 = vmatpush.msra.mxu2 %v1997_v41  ;;  %2041 = vmatpush.msra.mxu3 %v1998_v50  ;;  %v5036_v23 = vpop.permute.xlu2 %4091  ;;  %v2123_v53 = vsel %vm2117_vm13, %v4019_v13, %v4023_v42  ;;  %v2120_v22 = vsel %vm2117_vm13, %v4024_v7, %v4028_v4  ;;  %v2121_v39 = vsel %vm2117_vm13, %v4028_v4, %v4029_v32  ;;  %v4054_v13 = vunpack.i.h.bf16 %v4989_v58  ;;  %v2053_v4 = vld [vmem:[#allocation3 + $0x8] sm:$0xff] }
 0x7ee   : > { %1949 = vmatpush.msra.mxu1 %v1903_v46  ;;  %3701 = vmatmul.msk.f32.vlgmr.msrb.gmra.mxu0 %vm1837_vm10, %v5029_v59  ;;  %v4053_v2 = vunpack.i.l.bf16 %v4989_v58  ;;  %v4044_v46 = vunpack.i.h.bf16 %v4996_v60  ;;  %v4079_v34 = vunpack.i.h.bf16 %v5013_v21 }
 0x7ef   : > { %2022 = vmatpush.msra.mxu2 %v1995_v25  ;;  %2042 = vmatpush.msra.mxu3 %v1996_v63  ;;  %v5042_v10 = vpop.permute.xlu1 %4086  ;;  %v5044_v61 = vpop.permute.xlu0 %4081  ;;  %v4039_v25 = vunpack.i.h.bf16 %v5004_v9  ;;  %v4043_v63 = vunpack.i.l.bf16 %v4996_v60 }
 0x7f0   : > { %1950 = vmatpush.msra.mxu1 %v1901_v17  ;;  %3696 = vmatmul.msk.f32.vlgmr.msrb.gmra.mxu3 %vm1837_vm10, %v1797_v3  ;;  %v4038_v3 = vunpack.i.l.bf16 %v5004_v9  ;;  %v2195_v60 = vsel %vm2117_vm13, %v4053_v2, %v4054_v13 }
 0x7f1   : > { %2023 = vmatpush.msra.mxu2 %v1993_v18  ;;  %2043 = vmatpush.msra.mxu3 %v1994_v12  ;;  %v2276_v18 = vsel %vm896_vm12, %v4033_v11, %v4034_v49  ;;  %v2274_v9 = vsel %vm896_vm12, %v4039_v25, %v4043_v63  ;;  %v2275_v12 = vsel %vm896_vm12, %v4043_v63, %v4044_v46 }
 0x7f2   : > { %2092 = vmatpush.msrb.mxu1 %v4536_v44  ;;  %v2277_v32 = vsel %vm896_vm12, %v4034_v49, %v4038_v3  ;;  %v4084_v49 = vunpack.i.h.bf16 %v5044_v61 }
 0x7f3   : > { %2146 = vmatpush.msrb.mxu2 %v2122_v0  ;;  %2166 = vmatpush.msrb.mxu3 %v2123_v53  ;;  %v4083_v0 = vunpack.i.l.bf16 %v5044_v61 }
 0x7f4   : > { %2093 = vmatpush.msrb.mxu1 %v4686_v29  ;;  %3699 = vmatmul.msk.f32.vlgmr.msra.gmra.mxu2 %vm1837_vm10, %v1956_v35 }
 0x7f5   : > { %2147 = vmatpush.msrb.mxu2 %v2120_v22  ;;  %3698 = vmatmul.msk.f32.vlgmr.msra.gmra.mxu1 %vm1837_vm10, %v5008_v47  ;;  %v5066_v56 = vpop.permute.xlu2 %4096 }
 0x7f6   : > { %2167 = vmatpush.msrb.mxu3 %v2121_v39  ;;  %2094 = vmatpush.msrb.mxu1 %v4930_v38 }
 0x7f7   : > { %v4107_v14 = vpop.permute.xlu1 %4106  ;;  %v4102_v41 = vpop.permute.xlu0 %4101 }
 0x7f8   : > { %2241 = vmatpush.msra.mxu1 %v2198_v51  ;;  %v4109_v55 = vunpack.i.h.bf16 %v4107_v14  ;;  %v4108_v47 = vunpack.i.l.bf16 %v4107_v14  ;;  %v4104_v57 = vunpack.i.h.bf16 %v4102_v41  ;;  %v4103_v50 = vunpack.i.l.bf16 %v4102_v41  ;;  %3700 = vmatmul.msk.f32.vlgmr.msra.gmra.mxu3 %vm1837_vm10, %v1956_v35  ;;  %v2253_v41 = vld [vmem:[#allocation3 + $0x28] sm:$0xff] }
 0x7f9   : > { %v4088_v51 = vunpack.i.l.bf16 %v5042_v10  ;;  %v2426_v14 = vsel %vm2345_vm14, %v4079_v34, %v4083_v0  ;;  %v2402_v0 = vld [vmem:[#allocation3 + $0x40] sm:$0xff] }
 0x7fa   : > { %v2118_v54 = vsel %vm2117_vm13, %v4103_v50, %v4104_v57  ;;  %v2119_v7 = vsel %vm2117_vm13, %v4104_v57, %v4108_v47  ;;  %v2197_v17 = vsel %vm2117_vm13, %v4109_v55, %v4048_v8  ;;  %v4078_v8 = vunpack.i.l.bf16 %v5013_v21 }
 0x7fb   : > { %2148 = vmatpush.msrb.mxu2 %v2118_v54  ;;  %2168 = vmatpush.msrb.mxu3 %v2119_v7  ;;  %v4093_v47 = vunpack.i.l.bf16 %v5036_v23 }
 0x7fc   : > { %2221 = vmatpush.msra.mxu0 %v2197_v17  ;;  %3703 = vmatmul.msk.f32.vlgmr.msrb.gmra.mxu2 %vm1837_vm10, %v2053_v4  ;;  %v2425_v3 = vsel %vm2345_vm14, %v4078_v8, %v4079_v34  ;;  %v4099_v17 = vunpack.i.h.bf16 %v5066_v56 }
 0x7fd   : > { %2300 = vmatpush.msra.mxu2 %v2276_v18  ;;  %2320 = vmatpush.msra.mxu3 %v2277_v32  ;;  %v5088_v42 = vpop.permute.xlu2 %2488  ;;  %v2174_v18 = vld [vmem:[#allocation3 + $0x38] sm:$0xff]  ;;  %v4098_v32 = vunpack.i.l.bf16 %v5066_v56 }
 0x7fe   : > { %3702 = vmatmul.msk.f32.vlgmr.msrb.gmra.mxu1 %vm1837_vm10, %v5029_v59  ;;  %2222 = vmatpush.msra.mxu0 %v2195_v60  ;;  %v4089_v59 = vunpack.i.h.bf16 %v5042_v10  ;;  %v2423_v10 = vsel %vm2345_vm14, %v4084_v49, %v4088_v51 }
 0x7ff   : > { %2301 = vmatpush.msra.mxu2 %v2274_v9  ;;  %2321 = vmatpush.msra.mxu3 %v2275_v12  ;;  %v4122_v53 = vpop.permute.xlu1 %4121  ;;  %v4112_v22 = vpop.permute.xlu0 %4111  ;;  %v2348_v58 = vsel %vm2345_vm14, %v4098_v32, %v4099_v17 }
 0x800   : > { %v4114_v35 = vunpack.i.h.bf16 %v4112_v22  ;;  %v4113_v39 = vunpack.i.l.bf16 %v4112_v22  ;;  %3704 = vmatmul.msk.f32.vlgmr.msrb.gmra.mxu3 %vm1837_vm10, %v2053_v4  ;;  %v2424_v61 = vsel %vm2345_vm14, %v4088_v51, %v4089_v59  ;;  %v4124_v57 = vunpack.i.h.bf16 %v4122_v53 }
 0x801   : > { %v4123_v50 = vunpack.i.l.bf16 %v4122_v53 }
 0x802   : > { %v2272_v11 = vsel %vm896_vm12, %v4113_v39, %v4114_v35  ;;  %v2273_v21 = vsel %vm896_vm12, %v4114_v35, %v5002_v1  ;;  %v4094_v1 = vunpack.i.h.bf16 %v5036_v23 }
 0x803   : > { %2302 = vmatpush.msra.mxu2 %v2272_v11  ;;  %2322 = vmatpush.msra.mxu3 %v2273_v21  ;;  %v2194_v12 = vsel %vm2117_vm13, %v4123_v50, %v4124_v57 }
 0x804   : > { %3707 = vmatmul.msk.f32.vlgmr.msra.gmra.mxu2 %vm1837_vm10, %v2253_v41  ;;  %v2350_v9 = vsel %vm2345_vm14, %v4093_v47, %v4094_v1 }
 0x805   : > { %2449 = vmatpush.msrb.mxu2 %v2425_v3  ;;  %2469 = vmatpush.msrb.mxu3 %v2426_v14 }
 0x806   : > { %v5108_v55 = vpop.permute.xlu2 %2525 }
 0x807   : > { %2450 = vmatpush.msrb.mxu2 %v2423_v10  ;;  %2470 = vmatpush.msrb.mxu3 %v2424_v61  ;;  %v4137_v2 = vpop.permute.xlu1 %4136  ;;  %v4117_v46 = vpop.permute.xlu0 %4116 }
 0x808   : > { %v4139_v25 = vunpack.i.h.bf16 %v4137_v2  ;;  %v4138_v63 = vunpack.i.l.bf16 %v4137_v2  ;;  %v4119_v54 = vunpack.i.h.bf16 %v4117_v46  ;;  %v4118_v7 = vunpack.i.l.bf16 %v4117_v46  ;;  %3708 = vmatmul.msk.f32.vlgmr.msra.gmra.mxu3 %vm1837_vm10, %v2253_v41  ;;  %v2251_v41 = vld [vmem:[#allocation3 + $0x10] sm:$0xff] }
 0x80a   : > { %v2193_v4 = vsel %vm2117_vm13, %v4119_v54, %v4123_v50  ;;  %v2196_v23 = vsel %vm2117_vm13, %v4054_v13, %v4118_v7  ;;  %v2422_v60 = vsel %vm2345_vm14, %v4138_v63, %v4139_v25 }
 0x80b   : > { %2223 = vmatpush.msra.mxu0 %v2193_v4  ;;  %2242 = vmatpush.msra.mxu1 %v2196_v23 }
 0x80c   : > { %2471 = vmatpush.msrb.mxu3 %v2422_v60  ;;  %3705 = vmatmul.msk.f32.vlgmr.msra.gmra.mxu0 %vm1837_vm10, %v2174_v18 }
 0x80d   : > { %2374 = vmatpush.msrb.mxu0 %v2350_v9  ;;  %2243 = vmatpush.msra.mxu1 %v2194_v12 }
 0x80e   : > { %3706 = vmatmul.msk.f32.vlgmr.msra.gmra.mxu1 %vm1837_vm10, %v2174_v18 }
 0x80f   : > { %2375 = vmatpush.msrb.mxu0 %v2348_v58  ;;  %v4127_v56 = vpop.permute.xlu0 %4126  ;;  %v5126_v8 = vpop.permute.xlu2 %2533 }
 0x810   : > { %v4129_v13 = vunpack.i.h.bf16 %v4127_v56  ;;  %v4128_v34 = vunpack.i.l.bf16 %v4127_v56  ;;  %3712 = vmatmul.msk.f32.vlgmr.msrb.gmra.mxu3 %vm1837_vm10, %v2402_v0  ;;  %v4142_v35 = vpop.permute.xlu1 %4141 }
 0x811   : > { %v4144_v59 = vunpack.i.h.bf16 %v4142_v35  ;;  %v4143_v51 = vunpack.i.l.bf16 %v4142_v35 }
 0x812   : > { %v2351_v53 = vsel %vm2345_vm14, %v4094_v1, %v4128_v34  ;;  %v2421_v22 = vsel %vm2345_vm14, %v4129_v13, %v4138_v63 }
 0x813   : > { %2394 = vmatpush.msrb.mxu1 %v2351_v53  ;;  %2451 = vmatpush.msrb.mxu2 %v2421_v22  ;;  %v2347_v47 = vsel %vm2345_vm14, %v4143_v51, %v4144_v59 }
 0x814   : > { %3711 = vmatmul.msk.f32.vlgmr.msrb.gmra.mxu2 %vm1837_vm10, %v2402_v0 }
 0x817   : > { %v4132_v39 = vpop.permute.xlu0 %4131  ;;  %v4150_v21 = vpop.permute.xlu2 %4149 }
 0x818   : > { %v4134_v49 = vunpack.i.h.bf16 %v4132_v39  ;;  %v4133_v11 = vunpack.i.l.bf16 %v4132_v39  ;;  %v4152_v3 = vunpack.i.h.bf16 %v4150_v21  ;;  %v4151_v14 = vunpack.i.l.bf16 %v4150_v21 }
 0x81a   : > { %v2346_v10 = vsel %vm2345_vm14, %v4134_v49, %v4143_v51  ;;  %v2349_v61 = vsel %vm2345_vm14, %v4099_v17, %v4133_v11  ;;  %v2603_v1 = vsel %vm558_vm7, %v4151_v14, %v4152_v3  ;;  %vm426_vm14 = vcmp.le.s32.totalorder %v4632_v6, 12 }
 0x81b   : > { %2376 = vmatpush.msrb.mxu0 %v2346_v10  ;;  %2395 = vmatpush.msrb.mxu1 %v2349_v61 }
 0x81c   : > { %2711 = vmatpush.msra.mxu3 %v2603_v1  ;;  %3709 = vmatmul.msk.f32.vlgmr.msrb.gmra.mxu0 %vm1837_vm10, %v2251_v41 }
 0x81d   : > { %2628 = vmatpush.msra.mxu0 %v2603_v1  ;;  %2396 = vmatpush.msrb.mxu1 %v2347_v47 }
 0x81e   : > { %3710 = vmatmul.msk.f32.vlgmr.msrb.gmra.mxu1 %vm1837_vm10, %v2251_v41  ;;  %vm425_vm10 = vcmp.le.s32.totalorder %v4630_v5, 12 }
 0x81f   : > { %v4155_v57 = vpop.permute.xlu2 %4154 }
 0x820   : > { %v4157_v50 = vunpack.i.h.bf16 %v4155_v57  ;;  %v4156_v2 = vunpack.i.l.bf16 %v4155_v57 }
 0x822   : > { %v2604_v46 = vsel %vm558_vm7, %v4152_v3, %v4156_v2  ;;  %v2671_v25 = vsel %vm558_vm7, %v4157_v50, %v4151_v14 }
 0x823   : > { %2648 = vmatpush.msra.mxu1 %v2604_v46  ;;  %2691 = vmatpush.msra.mxu2 %v2671_v25 }
 0x85f   : > { %v1932_v7 = vpop.f32.mrf.mxu0 }
 0x86b   : > { %v2076_v4 = vpop.f32.mrf.mxu0 }
 0x86f   : > { %v1858_v63 = vpop.f32.mrf.mxu2 }
 0x870   : > { %v1933_v34 = vadd.f32 %v1932_v7, %v1858_v63 }
 0x872   : > { %v1952_v18 = vpop.f32.mrf.mxu1 }
 0x873   : > { %v1878_v54 = vpop.f32.mrf.mxu3 }
 0x874   : > { %v1953_v0 = vadd.f32 %v1952_v18, %v1878_v54 }
 0x877   : > { %v2025_v17 = vpop.f32.mrf.mxu2 }
 0x878   : > { %v2048_v22 = vadd.f32 %v2025_v17, %v1933_v34 }
 0x87a   : > { %v2050_v14 = vmul.f32 %v4639_v15, %v2048_v22 }
 0x87b   : > { %v2045_v32 = vpop.f32.mrf.mxu3  ;;  %v2096_v60 = vpop.f32.mrf.mxu1 }
 0x87c   : > { %v2049_v51 = vadd.f32 %v2045_v32, %v1953_v0 }
 0x87e   : > { %v2051_v1 = vmul.f32 %v4642_v16, %v2049_v51 }
 0x87f   : > { %v2150_v23 = vpop.f32.mrf.mxu2 }
 0x880   : > { %v2151_v53 = vadd.f32 %v2150_v23, %v2076_v4 }
 0x883   : > { %v2170_v9 = vpop.f32.mrf.mxu3 }
 0x884   : > { %v2171_v35 = vadd.f32 %v2170_v9, %v2096_v60 }
 0x887   : > { %v2304_v12 = vpop.f32.mrf.mxu2 }
 0x889   : > { %v2225_v58 = vpop.f32.mrf.mxu0 }
 0x88a   : > { %v2248_v49 = vadd.f32 %v2225_v58, %v2151_v53 }
 0x88b   : > { %v2324_v56 = vpop.f32.mrf.mxu3  ;;  %v2245_v13 = vpop.f32.mrf.mxu1 }
 0x88c   : > { %v2249_v41 = vadd.f32 %v2245_v13, %v2171_v35  ;;  %v2480_v47 = vadd.f32 %v2248_v49, %v2050_v14 }
 0x88e   : > { %v2481_v2 = vadd.f32 %v2249_v41, %v2051_v1 }
 0x893   : > { %v2473_v3 = vpop.f32.mrf.mxu3 }
 0x897   : > { %v2453_v59 = vpop.f32.mrf.mxu2 }
 0x899   : > { %v2378_v39 = vpop.f32.mrf.mxu0 }
 0x89a   : > { %v2379_v11 = vadd.f32 %v2378_v39, %v2304_v12  ;;  %v5156_v12 = vpop.permute.xlu2 %4169 }
 0x89b   : > { %v2398_v21 = vpop.f32.mrf.mxu1  ;;  %v4171_v13 = vunpack.i.l.bf16 %v5156_v12 }
 0x89c   : > { %v2399_v10 = vadd.f32 %v2398_v21, %v2324_v56  ;;  %v2476_v61 = vadd.f32 %v2453_v59, %v2379_v11  ;;  %v4172_v56 = vunpack.i.h.bf16 %v5156_v12 }
 0x89e   : > { %v2478_v57 = vmul.f32 %v4645_v26, %v2476_v61  ;;  %v2477_v50 = vadd.f32 %v2473_v3, %v2399_v10  ;;  %v2599_v22 = vsel %vm558_vm7, %v4171_v13, %v4172_v56 }
 0x8a0   : > { %v2482_v46 = vadd.f32 %v2480_v47, %v2478_v57  ;;  %v2479_v25 = vmul.f32 %v4648_v27, %v2477_v50 }
 0x8a2   : > { %v2483_v63 = vadd.f32 %v2481_v2, %v2479_v25  ;;  %v2491_v54 = vadd.f32 %v5088_v42, %v2482_v46 }
 0x8a4   : > { %v2492_v7 = vadd.f32 %v5088_v42, %v2483_v63 }
 0x8a6   : > { %v2493_v17 = vadd.f32 %v2492_v7, %v2491_v54 }
 0x8a8   : > { %2494 = vadd.xlane.f32.xlu0 %v2493_v17 }
 0x8bc   : > { %4159 = vrot.lane.b32.xlu0 %v4690_v30, %s4428_s11 }
 0x8c4   : > { %4190 = vrot.lane.b32.xlu0 %v4703_v37, %s4428_s11 }
 0x8cc   : > { %4210 = vrot.lane.b32.xlu0 %v4541_v45, %s4427_s10 }
 0x8d4   : > { %4225 = vrot.lane.b32.xlu0 %v4694_v31, %s4427_s10 }
 0x8dc   : > { %4240 = vrot.lane.b32.xlu0 %v4949_v40, %s4427_s10 }
 0x91b   : > { %v2495_v18 = vpop.xlane.xlu0 %2494 }
 0x91c   : > { %v2496_v32 = vmul.f32 0.00390625, %v2495_v18 }
 0x91e   : > { %v2497_v42 = vsub.f32 %v2491_v54, %v2496_v32  ;;  %v2498_v4 = vsub.f32 %v2492_v7, %v2496_v32  ;;  %v4269_v32 = vpack.i.bf16 %v4686_v29, %v4424_v33 }
 0x920   : > { %v2499_v23 = vmul.f32 %v2497_v42, %v2497_v42  ;;  %v2500_v60 = vmul.f32 %v2498_v4, %v2498_v4 }
 0x922   : > { %v2501_v9 = vadd.f32 %v2500_v60, %v2499_v23 }
 0x924   : > { %2502 = vadd.xlane.f32.xlu1 %v2501_v9 }
 0x92e   : > { %v4160_v58 = vpop.permute.xlu0 %4159 }
 0x92f   : > { %v4162_v34 = vunpack.i.h.bf16 %v4160_v58  ;;  %v4161_v0 = vunpack.i.l.bf16 %v4160_v58 }
 0x931   : > { %v2601_v53 = vsel %vm558_vm7, %v4161_v0, %v4162_v34 }
 0x932   : > { %2629 = vmatpush.msra.mxu0 %v2601_v53  ;;  %2712 = vmatpush.msra.mxu3 %v2601_v53 }
 0x934   : > { %2630 = vmatpush.msra.mxu0 %v2599_v22  ;;  %2713 = vmatpush.msra.mxu3 %v2599_v22 }
 0x936   : > { %v5239_v60 = vpop.permute.xlu0 %4190 }
 0x93d   : > { %4164 = vrot.lane.b32.xlu1 %v4703_v37, %s4428_s11 }
 0x93e   : > { %v5245_v58 = vpop.permute.xlu0 %4210 }
 0x945   : > { %4180 = vrot.lane.b32.xlu1 %v4541_v45, %s4428_s11 }
 0x946   : > { %v5253_v22 = vpop.permute.xlu0 %4225 }
 0x94d   : > { %4195 = vrot.lane.b32.xlu1 %v4949_v40, %s4428_s11 }
 0x955   : > { %4200 = vrot.lane.b32.xlu1 %v4541_v45, %s4427_s10 }
 0x95d   : > { %4215 = vrot.lane.b32.xlu1 %v4694_v31, %s4427_s10 }
 0x965   : > { %4230 = vrot.lane.b32.xlu1 %v4949_v40, %s4427_s10 }
 0x96d   : > { %4265 = vrot.lane.b32.xlu1 %v4657_v48, %s4427_s10 }
 0x997   : > { %v2503_v35 = vpop.xlane.xlu1 %2502 }
 0x998   : > { %v2504_v37 = vmul.f32 0.00390625, %v2503_v35 }
 0x99a   : > { %v2505_v39 = vadd.f32 1e-05, %v2504_v37 }
 0x99c   : > { %4334 = vrsqrt.f32 %v2505_v39  ;;  %vm2512_vm1 = vweird.f32 %v2505_v39 }
 0x9a2   : > { %v4335_v59 = vpop.eup %4334 }
 0x9a3   : > { %v2507_v51 = vmul.f32 %v4335_v59, %v2505_v39  ;;  %vm2513_vm15 = vweird.f32 %v4335_v59 }
 0x9a4   : > { %vm2514_vm2 = vmor %vm2512_vm1, %vm2513_vm15 }
 0x9a5   : > { %v2508_v49 = vmul.f32 %v4335_v59, %v2507_v51 }
 0x9a7   : > { %v2509_v11 = vmul.f32 0.5, %v2508_v49  ;;  %v2556_v49 = vld [vmem:[#allocation5 + $0x18] sm:$0xff] }
 0x9a9   : > { %v2510_v21 = vsub.f32 1.5, %v2509_v11  ;;  %v4192_v11 = vunpack.i.l.bf16 %v5239_v60 }
 0x9ab   : > { %v2511_v45 = vmul.f32 %v4335_v59, %v2510_v21 }
 0x9ad   : > { %v2515_v31 = vsel %vm2514_vm2, %v4335_v59, %v2511_v45  ;;  %v2542_v59 = vld [vmem:[#allocation5] sm:$0xff] }
 0x9ae   : > { %v2516_v3 = vmul.f32 %v4972_v52, %v2515_v31 }
 0x9af   : > { %v4165_v40 = vpop.permute.xlu1 %4164 }
 0x9b0   : > { %v4167_v14 = vunpack.i.h.bf16 %v4165_v40  ;;  %v4166_v41 = vunpack.i.l.bf16 %v4165_v40  ;;  %2519 = vperm.xlu2 %4173, %v2516_v3  }
 0x9b2   : > { %v2602_v48 = vsel %vm558_vm7, %v4162_v34, %v4166_v41  ;;  %v2670_v10 = vsel %vm558_vm7, %v4167_v14, %v4161_v0  ;;  %v4213_v41 = vunpack.i.h.bf16 %v5245_v58 }
 0x9b3   : > { %2649 = vmatpush.msra.mxu1 %v2602_v48  ;;  %2692 = vmatpush.msra.mxu2 %v2670_v10  ;;  %v4212_v48 = vunpack.i.l.bf16 %v5245_v58  ;;  %v5274_v10 = vpop.permute.xlu0 %4240 }
 0x9b7   : > { %v5237_v23 = vpop.permute.xlu1 %4180 }
 0x9b8   : > { %4175 = vrot.lane.b32.xlu2 %v4941_v62, %s4428_s11  ;;  %v4183_v34 = vunpack.i.h.bf16 %v5237_v23  ;;  %v4182_v0 = vunpack.i.l.bf16 %v5237_v23 }
 0x9b9   : > { %4324 = vset.pattern.permute.xlu2 %v4422_v20 }
 0x9ba   : > { %v2775_v31 = vsel %vm558_vm7, %v4182_v0, %v4183_v34 }
 0x9bf   : > { %v5243_v12 = vpop.permute.xlu1 %4195 }
 0x9c0   : > { %4185 = vrot.lane.b32.xlu2 %v4690_v30, %s4428_s11  ;;  %v4198_v21 = vunpack.i.h.bf16 %v5243_v12  ;;  %v4197_v45 = vunpack.i.l.bf16 %v5243_v12 }
 0x9c2   : > { %v2771_v14 = vsel %vm558_vm7, %v4197_v45, %v4198_v21 }
 0x9c8   : > { %4205 = vrot.lane.b32.xlu2 %v4424_v33, %s4427_s10 }
 0x9d0   : > { %4220 = vrot.lane.b32.xlu2 %v4424_v33, %s4427_s10 }
 0x9d8   : > { %4235 = vrot.lane.b32.xlu2 %v4424_v33, %s4427_s10 }
 0xa0a   : > { %v2520_v52 = vpop.permute.xlu2 %2519 }
 0xa0b   : > { %v2522_v61 = vmul.f32 %v2520_v52, %v2497_v42  ;;  %v2523_v1 = vmul.f32 %v2520_v52, %v2498_v4  ;;  %v2835_v52 = vld [vmem:[#allocation5 + $0x20] sm:$0xff] }
 0xa0d   : > { %v2528_v47 = vadd.f32 %v5108_v55, %v2522_v61  ;;  %v2529_v57 = vadd.f32 %v5108_v55, %v2523_v1  ;;  %v4228_v61 = vunpack.i.h.bf16 %v5253_v22  ;;  %v4227_v1 = vunpack.i.l.bf16 %v5253_v22 }
 0xa0f   : > { %vm2530_vm11 = vcmp.ge.f32.partialorder %v2528_v47, 0.0  ;;  %vm2531_vm3 = vcmp.ge.f32.partialorder %v2529_v57, 0.0  ;;  %v2536_v30 = vmul.f32 %v5126_v8, %v2528_v47  ;;  %v2537_v50 = vmul.f32 %v5126_v8, %v2529_v57 }
 0xa11   : > { %v5198_v2 = vsel %vm2530_vm11, %v2528_v47, %v2536_v30  ;;  %v5200_v46 = vsel %vm2531_vm3, %v2529_v57, %v2537_v50  ;;  %v4243_v47 = vunpack.i.h.bf16 %v5274_v10  ;;  %v4242_v57 = vunpack.i.l.bf16 %v5274_v10  ;;  %v2970_v10 = vld [vmem:[#allocation5 + $0x10] sm:$0xff] }
 0xa12   : > { %v4176_v25 = vpop.permute.xlu2 %4175  ;;  %v4249_v63 = vpack.i.bf16 0.0, %v5200_v46  ;;  %v4284_v54 = vpack.i.bf16 %v5200_v46, %v5198_v2  ;;  %v4244_v7 = vpack.i.bf16 %v5198_v2, %v4424_v33  ;;  %v4299_v42 = vpack.i.bf16 %v5200_v46, %v4424_v33 }
 0xa13   : > { %v4178_v55 = vunpack.i.h.bf16 %v4176_v25  ;;  %v4177_v17 = vunpack.i.l.bf16 %v4176_v25  ;;  %v3087_v30 = vsel %vm896_vm12, %v4212_v48, %v4213_v41  ;;  %v3085_v25 = vsel %vm896_vm12, %v4227_v1, %v4228_v61 }
 0xa14   : > { %4250 = vrot.lane.b32.xlu0 %v4249_v63, %s4428_s11  ;;  %4285 = vrot.lane.b32.xlu1 %v4284_v54, %s4427_s10 }
 0xa15   : > { %4245 = vrot.lane.b32.xlu2 %v4244_v7, %s4428_s11  ;;  %v2600_v8 = vsel %vm558_vm7, %v4172_v56, %v4177_v17  ;;  %v2669_v18 = vsel %vm558_vm7, %v4178_v55, %v4171_v13  ;;  %v5249_v13 = vpop.permute.xlu1 %4200 }
 0xa16   : > { %2650 = vmatpush.msra.mxu1 %v2600_v8  ;;  %2693 = vmatpush.msra.mxu2 %v2669_v18  ;;  %v4202_v41 = vunpack.i.l.bf16 %v5249_v13 }
 0xa1c   : > { %4275 = vrot.lane.b32.xlu0 %v4249_v63, %s4428_s11  ;;  %4290 = vrot.lane.b32.xlu1 %v4941_v62, %s4427_s10  ;;  %v5233_v62 = vpop.permute.xlu2 %4185  ;;  %v3083_v63 = vsel %vm896_vm12, %v4242_v57, %v4243_v47 }
 0xa1d   : > { %4255 = vrot.lane.b32.xlu2 %v4244_v7, %s4428_s11  ;;  %v4188_v39 = vunpack.i.h.bf16 %v5233_v62  ;;  %v5262_v3 = vpop.permute.xlu1 %4215  ;;  %v4187_v17 = vunpack.i.l.bf16 %v5233_v62 }
 0xa1e   : > { %v4218_v12 = vunpack.i.h.bf16 %v5262_v3 }
 0xa1f   : > { %v2773_v40 = vsel %vm558_vm7, %v4188_v39, %v4192_v11  ;;  %v2776_v39 = vsel %vm558_vm7, %v4183_v34, %v4187_v17 }
 0xa24   : > { %4280 = vrot.lane.b32.xlu0 %v4424_v33, %s4427_s10  ;;  %v5235_v4 = vpop.permute.xlu2 %4205 }
 0xa25   : > { %4260 = vrot.lane.b32.xlu2 %v4424_v33, %s4427_s10  ;;  %v5286_v50 = vpop.permute.xlu1 %4230  ;;  %v4208_v47 = vunpack.i.h.bf16 %v5235_v4 }
 0xa26   : > { %v4232_v61 = vunpack.i.l.bf16 %v5286_v50 }
 0xa2c   : > { %4295 = vrot.lane.b32.xlu0 %v4284_v54, %s4427_s10  ;;  %v5241_v9 = vpop.permute.xlu2 %4220  ;;  %v5294_v54 = vld [vmem:[#allocation5 + $0x38] sm:$0xff] }
 0xa2d   : > { %4270 = vrot.lane.b32.xlu2 %v4269_v32, %s4427_s10  ;;  %v4193_v32 = vunpack.i.h.bf16 %v5239_v60 }
 0xa2f   : > { %v2774_v60 = vsel %vm558_vm7, %v4192_v11, %v4193_v32 }
 0xa34   : > { %4305 = vrot.lane.b32.xlu0 %v4424_v33, %s4427_s10  ;;  %v5247_v56 = vpop.permute.xlu2 %4235 }
 0xa35   : > { %4300 = vrot.lane.b32.xlu2 %v4299_v42, %s4427_s10  ;;  %v5300_v42 = vpop.permute.xlu1 %4265  ;;  %v4238_v17 = vunpack.i.h.bf16 %v5247_v56 }
 0xa6f   : > { %v4246_v53 = vpop.permute.xlu2 %4245 }
 0xa70   : > { %v4248_v35 = vunpack.i.h.bf16 %v4246_v53  ;;  %v4247_v37 = vunpack.i.l.bf16 %v4246_v53 }
 0xa72   : > { %v2597_v51 = vsel %vm558_vm7, %v4247_v37, %v4248_v35 }
 0xa73   : > { %2631 = vmatpush.msra.mxu0 %v2597_v51  ;;  %2714 = vmatpush.msra.mxu3 %v2597_v51 }
 0xa74   : > { %3717 = vmatmul.msk.f32.vlgmr.msra.gmra.mxu3 %vm1403_vm0, %v2542_v59  ;;  %3714 = vmatmul.msk.f32.vlgmr.msra.gmra.mxu0 %vm1403_vm0, %v2556_v49 }
 0xa75   : > { %2800 = vmatpush.msrb.mxu0 %v2775_v31  ;;  %2871 = vmatpush.msrb.mxu3 %v4536_v44 }
 0xa77   : > { %2801 = vmatpush.msrb.mxu0 %v2773_v40  ;;  %2872 = vmatpush.msrb.mxu3 %v4686_v29  ;;  %v4256_v7 = vpop.permute.xlu2 %4255  ;;  %v2720_v40 = vld [vmem:[#allocation5 + $0x30] sm:$0xff] }
 0xa78   : > { %v4257_v53 = vunpack.i.l.bf16 %v4256_v7  ;;  %v4258_v51 = vunpack.i.h.bf16 %v4256_v7  ;;  %v4223_v7 = vunpack.i.h.bf16 %v5241_v9 }
 0xa79   : > { %2802 = vmatpush.msrb.mxu0 %v2771_v14  ;;  %2873 = vmatpush.msrb.mxu3 %v4930_v38  ;;  %v4203_v14 = vunpack.i.h.bf16 %v5249_v13  ;;  %v4233_v13 = vunpack.i.h.bf16 %v5286_v50 }
 0xa7a   : > { %v2772_v34 = vsel %vm558_vm7, %v4198_v21, %v4257_v53  ;;  %v4217_v21 = vunpack.i.l.bf16 %v5262_v3  ;;  %v3084_v58 = vsel %vm896_vm12, %v4223_v7, %v4227_v1 }
 0xa7b   : > { %2874 = vmatpush.msrb.mxu3 %v5200_v46 }
 0xa7c   : > { %3721 = vmatmul.msk.f32.vlgmr.msrb.gmra.mxu3 %vm1403_vm0, %v2835_v52 }
 0xa7d   : > { %2962 = vmatpush.msra.mxu3 %v4424_v33 }
 0xa7f   : > { %3131 = vmatpush.msrb.mxu3 %v3087_v30  ;;  %v5308_v62 = vpop.permute.xlu2 %4260 }
 0xa80   : > { %v4263_v22 = vunpack.i.h.bf16 %v5308_v62  ;;  %v4262_v1 = vunpack.i.l.bf16 %v5308_v62 }
 0xa81   : > { %3132 = vmatpush.msrb.mxu3 %v3085_v25 }
 0xa83   : > { %3133 = vmatpush.msrb.mxu3 %v3083_v63  ;;  %v4267_v63 = vunpack.i.l.bf16 %v5300_v42 }
 0xa84   : > { %3725 = vmatmul.msk.f32.vlgmr.msra.gmra.mxu3 %vm1403_vm0, %v5294_v54 }
 0xa86   : > { %v4251_v55 = vpop.permute.xlu0 %4250  ;;  %v5322_v11 = vpop.permute.xlu1 %4285 }
 0xa87   : > { %v4253_v8 = vunpack.i.h.bf16 %v4251_v55  ;;  %v4252_v18 = vunpack.i.l.bf16 %v4251_v55  ;;  %v5344_v30 = vpop.permute.xlu2 %4270  ;;  %v4288_v25 = vunpack.i.h.bf16 %v5322_v11  ;;  %v4287_v50 = vunpack.i.l.bf16 %v5322_v11 }
 0xa88   : > { %v4272_v53 = vunpack.i.l.bf16 %v5344_v30 }
 0xa89   : > { %v2598_v23 = vsel %vm558_vm7, %v4248_v35, %v4252_v18  ;;  %v2668_v0 = vsel %vm558_vm7, %v4253_v8, %v4247_v37  ;;  %v5315_v37 = vld [vmem:[%s5471_s7 + $0x20] sm:$0xff]  ;;  %v4273_v18 = vunpack.i.h.bf16 %v5344_v30 }
 0xa8a   : > { %2651 = vmatpush.msra.mxu1 %v2598_v23  ;;  %2694 = vmatpush.msra.mxu2 %v2668_v0 }
 0xa8b   : > { %3715 = vmatmul.msk.f32.vlgmr.msra.gmra.mxu1 %vm1403_vm0, %v2556_v49  ;;  %3716 = vmatmul.msk.f32.vlgmr.msra.gmra.mxu2 %vm1403_vm0, %v2542_v59 }
 0xa8c   : > { %2820 = vmatpush.msrb.mxu1 %v2776_v39  ;;  %2851 = vmatpush.msrb.mxu2 %v4534_v43  ;;  %v3082_v39 = vsel %vm896_vm12, %v4238_v17, %v4242_v57  ;;  %v2998_v57 = vsel %vm896_vm12, %v4288_v25, %v4262_v1 }
 0xa8d   : > { %3260 = vperm.xlu1 %4309, %v5315_v37  }
 0xa8e   : > { %2821 = vmatpush.msrb.mxu1 %v2774_v60  ;;  %2852 = vmatpush.msrb.mxu2 %v4684_v28  ;;  %v4276_v35 = vpop.permute.xlu0 %4275  ;;  %v5364_v55 = vpop.permute.xlu1 %4290 }
 0xa8f   : > { %v4278_v59 = vunpack.i.h.bf16 %v4276_v35  ;;  %v4277_v49 = vunpack.i.l.bf16 %v4276_v35  ;;  %v4292_v32 = vunpack.i.l.bf16 %v5364_v55  ;;  %v4301_v60 = vpop.permute.xlu2 %4300 }
 0xa90   : > { %2822 = vmatpush.msrb.mxu1 %v2772_v34  ;;  %2853 = vmatpush.msrb.mxu2 %v4928_v36  ;;  %v4302_v11 = vunpack.i.l.bf16 %v4301_v60 }
 0xa91   : > { %v2769_v45 = vsel %vm558_vm7, %v4258_v51, %v4277_v49  ;;  %v2770_v31 = vsel %vm558_vm7, %v4277_v49, %v4278_v59  ;;  %v2972_v59 = vld [vmem:[#allocation5 + $0x28] sm:$0xff] }
 0xa92   : > { %2854 = vmatpush.msrb.mxu2 %v5198_v2  ;;  %2803 = vmatpush.msrb.mxu0 %v2769_v45 }
 0xa93   : > { %2823 = vmatpush.msrb.mxu1 %v2770_v31  ;;  %3718 = vmatmul.msk.f32.vlgmr.msrb.gmra.mxu0 %vm1403_vm0, %v2720_v40 }
 0xa94   : > { %2939 = vmatpush.msra.mxu2 %v4536_v44  ;;  %3719 = vmatmul.msk.f32.vlgmr.msrb.gmra.mxu1 %vm1403_vm0, %v2720_v40  ;;  %v3003_v44 = vsel %vm896_vm12, %v4202_v41, %v4203_v14 }
 0xa95   : > { %3720 = vmatmul.msk.f32.vlgmr.msrb.gmra.mxu2 %vm1403_vm0, %v2835_v52  ;;  %2897 = vmatpush.msra.mxu0 %v4424_v33  ;;  %v4207_v52 = vunpack.i.l.bf16 %v5235_v4  ;;  %v4222_v4 = vunpack.i.l.bf16 %v5241_v9  ;;  %v4237_v9 = vunpack.i.l.bf16 %v5247_v56 }
 0xa96   : > { %2914 = vmatpush.msra.mxu1 %v4534_v43  ;;  %2940 = vmatpush.msra.mxu2 %v4686_v29  ;;  %v5342_v3 = vpop.permute.xlu0 %4280  ;;  %v3001_v43 = vsel %vm896_vm12, %v4217_v21, %v4218_v12  ;;  %v4268_v29 = vunpack.i.h.bf16 %v5300_v42 }
 0xa97   : > { %3028 = vmatpush.msrb.mxu0 %v3003_v44  ;;  %4310 = vset.pattern.permute.xlu1 %v4422_v20  ;;  %v2833_v20 = vld [vmem:[#allocation5 + $0x8] sm:$0xff]  ;;  %v4282_v8 = vunpack.i.l.bf16 %v5342_v3  ;;  %v3002_v56 = vsel %vm896_vm12, %v4218_v12, %v4222_v4  ;;  %v3000_v35 = vsel %vm896_vm12, %v4233_v13, %v4237_v9  ;;  %v4283_v49 = vunpack.i.h.bf16 %v5342_v3 }
 0xa98   : > { %2915 = vmatpush.msra.mxu1 %v4684_v28  ;;  %2941 = vmatpush.msra.mxu2 %v4930_v38  ;;  %v2999_v28 = vsel %vm896_vm12, %v4232_v61, %v4233_v13  ;;  %v3086_v38 = vsel %vm896_vm12, %v4208_v47, %v4212_v48  ;;  %v3195_v48 = vsel %vm896_vm12, %v4267_v63, %v4268_v29  ;;  %v3140_v47 = vld [vmem:[#allocation5 + $0x40] sm:$0xff] }
 0xa99   : > { %3029 = vmatpush.msrb.mxu0 %v3001_v43  ;;  %3297 = vperm.xlu1 %4310, %v5315_v37   ;;  %v3196_v45 = vsel %vm896_vm12, %v4268_v29, %v4272_v53  ;;  %v3194_v31 = vsel %vm896_vm12, %v4282_v8, %v4283_v49 }
 0xa9a   : > { %2916 = vmatpush.msra.mxu1 %v4928_v36  ;;  %2942 = vmatpush.msra.mxu2 %v5200_v46  ;;  %v2997_v36 = vsel %vm896_vm12, %v4287_v50, %v4288_v25  ;;  %v3004_v46 = vsel %vm896_vm12, %v4203_v14, %v4207_v52  ;;  %v4303_v14 = vunpack.i.h.bf16 %v4301_v60 }
 0xa9b   : > { %3030 = vmatpush.msrb.mxu0 %v2999_v28 }
 0xa9c   : > { %3111 = vmatpush.msrb.mxu2 %v3086_v38  ;;  %2917 = vmatpush.msra.mxu1 %v5198_v2  ;;  %v4293_v2 = vunpack.i.h.bf16 %v5364_v55 }
 0xa9d   : > { %3722 = vmatmul.msk.f32.vlgmr.msra.gmra.mxu0 %vm1403_vm0, %v2833_v20  ;;  %3723 = vmatmul.msk.f32.vlgmr.msra.gmra.mxu1 %vm1403_vm0, %v2833_v20 }
 0xa9e   : > { %3031 = vmatpush.msrb.mxu0 %v2997_v36  ;;  %3048 = vmatpush.msrb.mxu1 %v3004_v46  ;;  %v4296_v42 = vpop.permute.xlu0 %4295  ;;  %v3191_v34 = vsel %vm896_vm12, %v4292_v32, %v4293_v2  ;;  %v3192_v21 = vsel %vm896_vm12, %v4293_v2, %v4302_v11 }
 0xa9f   : > { %3724 = vmatmul.msk.f32.vlgmr.msra.gmra.mxu2 %vm1403_vm0, %v5294_v54  ;;  %v4298_v23 = vunpack.i.h.bf16 %v4296_v42  ;;  %v4297_v0 = vunpack.i.l.bf16 %v4296_v42  ;;  %v3193_v54 = vsel %vm896_vm12, %v4273_v18, %v4282_v8 }
 0xaa0   : > { %3112 = vmatpush.msrb.mxu2 %v3084_v58  ;;  %3220 = vmatpush.msra.mxu0 %v3195_v48 }
 0xaa1   : > { %3049 = vmatpush.msrb.mxu1 %v3002_v56  ;;  %v3080_v62 = vsel %vm896_vm12, %v4263_v22, %v4297_v0  ;;  %v3081_v51 = vsel %vm896_vm12, %v4297_v0, %v4298_v23  ;;  %4311 = vset.pattern.permute.xlu1 %v4421_v19 }
 0xaa2   : > { %3113 = vmatpush.msrb.mxu2 %v3082_v39  ;;  %3221 = vmatpush.msra.mxu0 %v3193_v54 }
 0xaa3   : > { %3050 = vmatpush.msrb.mxu1 %v3000_v35  ;;  %3134 = vmatpush.msrb.mxu3 %v3081_v51 }
 0xaa4   : > { %3222 = vmatpush.msra.mxu0 %v3191_v34  ;;  %3114 = vmatpush.msrb.mxu2 %v3080_v62 }
 0xaa5   : > { %3051 = vmatpush.msrb.mxu1 %v2998_v57  ;;  %3726 = vmatmul.msk.f32.vlgmr.msrb.gmra.mxu0 %vm1403_vm0, %v2972_v59 }
 0xaa6   : > { %3729 = vmatmul.msk.f32.vlgmr.msrb.gmra.mxu3 %vm1403_vm0, %v2970_v10  ;;  %3727 = vmatmul.msk.f32.vlgmr.msrb.gmra.mxu1 %vm1403_vm0, %v2972_v59  ;;  %v4306_v40 = vpop.permute.xlu0 %4305 }
 0xaa7   : > { %3240 = vmatpush.msra.mxu1 %v3196_v45  ;;  %3728 = vmatmul.msk.f32.vlgmr.msrb.gmra.mxu2 %vm1403_vm0, %v2970_v10  ;;  %v4308_v41 = vunpack.i.h.bf16 %v4306_v40  ;;  %v4307_v12 = vunpack.i.l.bf16 %v4306_v40 }
 0xaa9   : > { %3241 = vmatpush.msra.mxu1 %v3194_v31  ;;  %v3189_v13 = vsel %vm896_vm12, %v4303_v14, %v4307_v12  ;;  %v3190_v61 = vsel %vm896_vm12, %v4307_v12, %v4308_v41 }
 0xaaa   : > { %3223 = vmatpush.msra.mxu0 %v3189_v13 }
 0xaab   : > { %3242 = vmatpush.msra.mxu1 %v3192_v21 }
 0xaad   : > { %3243 = vmatpush.msra.mxu1 %v3190_v61  ;;  %3730 = vmatmul.msk.f32.vlgmr.msra.gmra.mxu0 %vm1403_vm0, %v3140_v47 }
 0xaae   : > { %3731 = vmatmul.msk.f32.vlgmr.msra.gmra.mxu1 %vm1403_vm0, %v3140_v47 }
 0xaf1   : > { %v2633_v44 = vpop.f32.mrf.mxu0 }
 0xaf7   : > { %v2716_v30 = vpop.f32.mrf.mxu3 }
 0xaff   : > { %v2876_v43 = vpop.f32.mrf.mxu3  ;;  %v3261_v62 = vpop.permute.xlu1 %3260 }
 0xb07   : > { %v2964_v20 = vpop.f32.mrf.mxu3 }
 0xb08   : > { %v2653_v3 = vpop.f32.mrf.mxu1 }
 0xb09   : > { %v2717_v17 = vadd.f32 %v2716_v30, %v2653_v3  ;;  %v5475_v30 = vmov 0  }
 0xb0e   : > { %v2696_v52 = vpop.f32.mrf.mxu2 }
 0xb0f   : > { %v2697_v55 = vadd.f32 %v2696_v52, %v2633_v44  ;;  %v3298_v52 = vpop.permute.xlu1 %3297 }
 0xb10   : > { %v2805_v25 = vpop.f32.mrf.mxu0 }
 0xb11   : > { %v2825_v50 = vpop.f32.mrf.mxu1  ;;  %v2828_v36 = vadd.f32 %v2805_v25, %v2697_v55 }
 0xb12   : > { %v2829_v46 = vadd.f32 %v2825_v50, %v2717_v17  ;;  %v5429_v17 = vld [vmem:[%s5471_s7 + $0x28] sm:$0xff] }
 0xb13   : > { %v2830_v1 = vmul.f32 %v4639_v15, %v2828_v36 }
 0xb14   : > { %v2831_v23 = vmul.f32 %v4642_v16, %v2829_v46 }
 0xb18   : > { %v2856_v29 = vpop.f32.mrf.mxu2 }
 0xb1a   : > { %v2899_v63 = vpop.f32.mrf.mxu0  ;;  %v2919_v7 = vpop.f32.mrf.mxu1 }
 0xb1b   : > { %v2920_v8 = vadd.f32 %v2919_v7, %v2876_v43  ;;  %v2900_v9 = vadd.f32 %v2899_v63, %v2856_v29 }
 0xb1d   : > { %v2968_v32 = vadd.f32 %v2964_v20, %v2920_v8 }
 0xb1f   : > { %v3253_v39 = vadd.f32 %v2968_v32, %v2831_v23 }
 0xb22   : > { %v2944_v4 = vpop.f32.mrf.mxu2  ;;  %v3033_v28 = vpop.f32.mrf.mxu0 }
 0xb23   : > { %v3053_v38 = vpop.f32.mrf.mxu1  ;;  %v2967_v56 = vadd.f32 %v2944_v4, %v2900_v9 }
 0xb25   : > { %v3252_v54 = vadd.f32 %v2967_v56, %v2830_v1  ;;  %v3738_v1 = vld [vmem:[%s5470_s6 + $0x10] sm:$0xff] }
 0xb29   : > { %v3136_v58 = vpop.f32.mrf.mxu3 }
 0xb2a   : > { %v3116_v48 = vpop.f32.mrf.mxu2  ;;  %v3137_v18 = vadd.f32 %v3136_v58, %v3053_v38  ;;  %v3225_v2 = vpop.f32.mrf.mxu0 }
 0xb2b   : > { %v3117_v42 = vadd.f32 %v3116_v48, %v3033_v28  ;;  %v3245_v22 = vpop.f32.mrf.mxu1 }
 0xb2c   : > { %v3249_v53 = vadd.f32 %v3245_v22, %v3137_v18 }
 0xb2d   : > { %v3248_v0 = vadd.f32 %v3225_v2, %v3117_v42  ;;  %v3733_v2 = vld [vmem:[%s5470_s6 + $0x8] sm:$0xff] }
 0xb2e   : > { %v3251_v35 = vmul.f32 %v4648_v27, %v3249_v53  ;;  %v403_v53 = vand.u32 1, %v4630_v5 }
 0xb2f   : > { %v3250_v60 = vmul.f32 %v4645_v26, %v3248_v0 }
 0xb30   : > { %v3255_v59 = vadd.f32 %v3253_v39, %v3251_v35 }
 0xb31   : > { %v3254_v51 = vadd.f32 %v3252_v54, %v3250_v60  ;;  %v410_v54 = vand.u32 1, %v4632_v6 }
 0xb32   : > { %v3264_v34 = vadd.f32 %v3261_v62, %v3255_v59 }
 0xb33   : > { %v3263_v49 = vadd.f32 %v3261_v62, %v3254_v51  ;;  %vm424_vm13 = vcmp.eq.s32.totalorder %v410_v54, 0 }
 0xb35   : > { %v3265_v10 = vadd.f32 %v3264_v34, %v3263_v49 }
 0xb37   : > { %3266 = vadd.xlane.f32.xlu2 %v3265_v10 }
 0xbaa   : > { %v3267_v57 = vpop.xlane.xlu2 %3266 }
 0xbab   : > { %v3268_v11 = vmul.f32 0.00390625, %v3267_v57 }
 0xbad   : > { %v3269_v15 = vsub.f32 %v3263_v49, %v3268_v11  ;;  %v3270_v45 = vsub.f32 %v3264_v34, %v3268_v11 }
 0xbaf   : > { %v3271_v16 = vmul.f32 %v3269_v15, %v3269_v15  ;;  %v3272_v31 = vmul.f32 %v3270_v45, %v3270_v45 }
 0xbb1   : > { %v3273_v40 = vadd.f32 %v3272_v31, %v3271_v16 }
 0xbb3   : > { %3274 = vadd.xlane.f32.xlu0 %v3273_v40 }
 0xbc7   : > { %3425 = vrot.lane.b32.xlu0 %v4424_v33, %s4442_s14 }
 0xc26   : > { %v3275_v26 = vpop.xlane.xlu0 %3274 }
 0xc27   : > { %v3276_v27 = vmul.f32 0.00390625, %v3275_v26 }
 0xc29   : > { %v3277_v14 = vadd.f32 1e-05, %v3276_v27 }
 0xc2b   : > { %4336 = vrsqrt.f32 %v3277_v14  ;;  %vm3284_vm0 = vweird.f32 %v3277_v14 }
 0xc31   : > { %v4337_v41 = vpop.eup %4336 }
 0xc32   : > { %v3279_v12 = vmul.f32 %v4337_v41, %v3277_v14  ;;  %vm3285_vm7 = vweird.f32 %v4337_v41 }
 0xc33   : > { %vm3286_vm4 = vmor %vm3284_vm0, %vm3285_vm7 }
 0xc34   : > { %v3280_v21 = vmul.f32 %v4337_v41, %v3279_v12 }
 0xc36   : > { %v3281_v13 = vmul.f32 0.5, %v3280_v21 }
 0xc38   : > { %v3282_v61 = vsub.f32 1.5, %v3281_v13 }
 0xc39   : > { %v3426_v56 = vpop.permute.xlu0 %3425 }
 0xc3a   : > { %v3283_v47 = vmul.f32 %v4337_v41, %v3282_v61 }
 0xc3c   : > { %v3287_v44 = vsel %vm3286_vm4, %v4337_v41, %v3283_v47 }
 0xc3d   : > { %v3288_v3 = vmul.f32 %v5315_v37, %v3287_v44 }
 0xc3f   : > { %3291 = vperm.xlu1 %4311, %v3288_v3  }
 0xc47   : > { %4312 = vset.pattern.permute.xlu1 %v4423_v24 }
 0xc48   : > { %3305 = vperm.xlu1 %4312, %v5315_v37   ;;  %v3314_v37 = vld [vmem:[%s5470_s6] sm:$0xff] }
 0xc50   : > { %4323 = vset.pattern.permute.xlu1 %v5475_v30 }
 0xcb1   : > { %v3292_v25 = vpop.permute.xlu1 %3291 }
 0xcb2   : > { %v3294_v50 = vmul.f32 %v3292_v25, %v3269_v15  ;;  %v3295_v43 = vmul.f32 %v3292_v25, %v3270_v45 }
 0xcb4   : > { %v3300_v29 = vadd.f32 %v3298_v52, %v3294_v50  ;;  %v3301_v63 = vadd.f32 %v3298_v52, %v3295_v43 }
 0xcb6   : > { %vm3302_vm5 = vcmp.ge.f32.partialorder %v3300_v29, 0.0  ;;  %vm3303_vm6 = vcmp.ge.f32.partialorder %v3301_v63, 0.0 }
 0xcba   : > { %v3306_v7 = vpop.permute.xlu1 %3305 }
 0xcbb   : > { %v3308_v20 = vmul.f32 %v3306_v7, %v3300_v29  ;;  %v3309_v4 = vmul.f32 %v3306_v7, %v3301_v63 }
 0xcbd   : > { %v3310_v28 = vsel %vm3302_vm5, %v3300_v29, %v3308_v20  ;;  %v3311_v38 = vsel %vm3303_vm6, %v3301_v63, %v3309_v4 }
 0xcbe   : > { %3394 = vmatpush.msrb.mxu0 %v3310_v28  ;;  %3414 = vmatpush.msrb.mxu1 %v3311_v38  ;;  %v4318_v55 = vpack.i.bf16 %v3311_v38, %v3310_v28 }
 0xcbf   : > { %3736 = vmatmul.msk.f32.vlgmr.msrb.gmra.mxu0 %vm563_vm8, %v3314_v37  ;;  %3737 = vmatmul.msk.f32.vlgmr.msrb.gmra.mxu1 %vm563_vm8, %v3314_v37 }
 0xcc0   : > { %4319 = vrot.lane.b32.xlu2 %v4318_v55, %s4442_s14  ;;  %4314 = vrot.lane.b32.xlu1 %v4318_v55, %s4427_s10 }
 0xcc8   : > { %3327 = vrot.lane.b32.xlu1 %v4424_v33, %s4427_s10  ;;  %3522 = vperm.xlu2 %4324, %v5429_v17  }
 0xcd0   : > { %3481 = vperm.xlu1 %4323, %v5429_v17   ;;  %4325 = vset.pattern.permute.xlu2 %v4421_v19 }
 0xd1a   : > { %v4320_v8 = vpop.permute.xlu2 %4319 }
 0xd1b   : > { %v4322_v36 = vunpack.i.h.bf16 %v4320_v8  ;;  %v4321_v46 = vunpack.i.l.bf16 %v4320_v8 }
 0xd1d   : > { %v3428_v32 = vsel %vm3427_vm9, %v4321_v46, %v4322_v36  ;;  %v3429_v22 = vsel %vm3427_vm9, %v4322_v36, %v3426_v56 }
 0xd22   : > { %v3523_v63 = vpop.permute.xlu2 %3522 }
 0xd32   : > { %v4315_v9 = vpop.permute.xlu1 %4314 }
 0xd33   : > { %v4317_v58 = vunpack.i.h.bf16 %v4315_v9  ;;  %v4316_v48 = vunpack.i.l.bf16 %v4315_v9 }
 0xd35   : > { %v3329_v18 = vsel %vm896_vm12, %v4316_v48, %v4317_v58 }
 0xd36   : > { %3351 = vmatpush.msra.mxu2 %v3329_v18 }
 0xd37   : > { %3734 = vmatmul.msk.f32.vlgmr.msra.gmra.mxu2 %vm563_vm8, %v3733_v2 }
 0xd38   : > { %3450 = vmatpush.msrb.mxu2 %v3428_v32 }
 0xd3a   : > { %v3328_v42 = vpop.permute.xlu1 %3327 }
 0xd3b   : > { %v3330_v19 = vsel %vm896_vm12, %v4317_v58, %v3328_v42  ;;  %vm423_vm12 = vcmp.eq.s32.totalorder %v403_v53, 0 }
 0xd3c   : > { %3371 = vmatpush.msra.mxu3 %v3330_v19  ;;  %v3396_v0 = vpop.f32.mrf.mxu0  ;;  %v3416_v62 = vpop.f32.mrf.mxu1  ;;  %vm427_vm15 = vmand %vm423_vm12, %vm425_vm10 }
 0xd3d   : > { %3735 = vmatmul.msk.f32.vlgmr.msra.gmra.mxu3 %vm563_vm8, %v3733_v2  ;;  %v3635_v11 = vsel %vm427_vm15, 1.0, %v4424_v33 }
 0xd3e   : > { %3470 = vmatpush.msrb.mxu3 %v3429_v22 }
 0xd3f   : > { %3739 = vmatmul.msk.f32.vlgmr.msrb.gmra.mxu2 %vm563_vm8, %v3738_v1 }
 0xd42   : > { %v3482_v59 = vpop.permute.xlu1 %3481 }
 0xd45   : > { %3740 = vmatmul.msk.f32.vlgmr.msrb.gmra.mxu3 %vm563_vm8, %v3738_v1  ;;  %vm428_vm8 = vmand %vm424_vm13, %vm426_vm14 }
 0xd46   : > { %v3636_v15 = vsel %vm428_vm8, 1.0, %v4424_v33 }
 0xdba   : > { %v3353_v23 = vpop.f32.mrf.mxu2 }
 0xdbb   : > { %v3397_v60 = vadd.f32 %v3396_v0, %v3353_v23 }
 0xdc0   : > { %v3373_v39 = vpop.f32.mrf.mxu3 }
 0xdc1   : > { %v3417_v49 = vadd.f32 %v3416_v62, %v3373_v39 }
 0xdc2   : > { %v3452_v35 = vpop.f32.mrf.mxu2 }
 0xdc3   : > { %v3475_v51 = vadd.f32 %v3452_v35, %v3397_v60 }
 0xdc5   : > { %v3484_v57 = vadd.f32 %v3482_v59, %v3475_v51 }
 0xdc7   : > { %v3486_v16 = vmul.f32 %v3635_v11, %v3484_v57 }
 0xdc8   : > { %v3472_v34 = vpop.f32.mrf.mxu3 }
 0xdc9   : > { %v3476_v10 = vadd.f32 %v3472_v34, %v3417_v49 }
 0xdcb   : > { %v3485_v45 = vadd.f32 %v3482_v59, %v3476_v10 }
 0xdcd   : > { %v3487_v31 = vmul.f32 %v3636_v15, %v3485_v45 }
 0xdcf   : > { %v3488_v5 = vadd.f32 %v3487_v31, %v3486_v16 }
 0xdd1   : > { %3489 = vadd.xlane.f32.xlu1 %v3488_v5 }
 0xe44   : > { %v3490_v40 = vpop.xlane.xlu1 %3489 }
 0xe45   : > { %v3491_v26 = vmul.f32 0.008928572, %v3490_v40 }
 0xe47   : > { %v3492_v6 = vsub.f32 %v3484_v57, %v3491_v26  ;;  %v3493_v27 = vsub.f32 %v3485_v45, %v3491_v26 }
 0xe49   : > { %v3494_v14 = vmul.f32 %v3492_v6, %v3492_v6  ;;  %v3495_v41 = vmul.f32 %v3493_v27, %v3493_v27 }
 0xe4b   : > { %v3496_v12 = vmul.f32 %v3635_v11, %v3494_v14  ;;  %v3497_v21 = vmul.f32 %v3636_v15, %v3495_v41 }
 0xe4d   : > { %v3498_v13 = vadd.f32 %v3497_v21, %v3496_v12 }
 0xe4f   : > { %3499 = vadd.xlane.f32.xlu0 %v3498_v13 }
 0xec2   : > { %v3500_v61 = vpop.xlane.xlu0 %3499 }
 0xec3   : > { %v3501_v47 = vmul.f32 0.008928572, %v3500_v61 }
 0xec5   : > { %v3502_v44 = vadd.f32 1e-05, %v3501_v47 }
 0xec7   : > { %4338 = vrsqrt.f32 %v3502_v44  ;;  %vm3509_vm2 = vweird.f32 %v3502_v44 }
 0xecd   : > { %v4339_v33 = vpop.eup %4338 }
 0xece   : > { %v3504_v3 = vmul.f32 %v4339_v33, %v3502_v44  ;;  %vm3510_vm1 = vweird.f32 %v4339_v33 }
 0xecf   : > { %vm3511_vm11 = vmor %vm3509_vm2, %vm3510_vm1 }
 0xed0   : > { %v3505_v30 = vmul.f32 %v4339_v33, %v3504_v3 }
 0xed2   : > { %v3506_v52 = vmul.f32 0.5, %v3505_v30 }
 0xed4   : > { %v3507_v25 = vsub.f32 1.5, %v3506_v52 }
 0xed6   : > { %v3508_v50 = vmul.f32 %v4339_v33, %v3507_v25 }
 0xed8   : > { %v3512_v43 = vsel %vm3511_vm11, %v4339_v33, %v3508_v50 }
 0xed9   : > { %v3513_v29 = vmul.f32 %v5429_v17, %v3512_v43 }
 0xedb   : > { %3516 = vperm.xlu2 %4325, %v3513_v29  }
 0xee3   : > { %4326 = vset.pattern.permute.xlu2 %v4423_v24 }
 0xee4   : > { %3530 = vperm.xlu2 %4326, %v5429_v17  }
 0xf35   : > { %v3517_v7 = vpop.permute.xlu2 %3516 }
 0xf36   : > { %v3519_v20 = vmul.f32 %v3517_v7, %v3492_v6  ;;  %v3520_v4 = vmul.f32 %v3517_v7, %v3493_v27 }
 0xf38   : > { %v3525_v28 = vadd.f32 %v3523_v63, %v3519_v20  ;;  %v3526_v38 = vadd.f32 %v3523_v63, %v3520_v4 }
 0xf3a   : > { %vm3527_vm3 = vcmp.ge.f32.partialorder %v3525_v28, 0.0  ;;  %vm3528_vm7 = vcmp.ge.f32.partialorder %v3526_v38, 0.0 }
 0xf3e   : > { %v3531_v55 = vpop.permute.xlu2 %3530 }
 0xf3f   : > { %v3533_v37 = vmul.f32 %v3531_v55, %v3525_v28  ;;  %v3534_v8 = vmul.f32 %v3531_v55, %v3526_v38 }
 0xf41   : > { %v3535_v36 = vsel %vm3527_vm3, %v3525_v28, %v3533_v37  ;;  %v3536_v24 = vsel %vm3528_vm7, %v3526_v38, %v3534_v8 }
 0xf42   : > { %v3537_v46 = vmul.f32 %v3635_v11, %v3535_v36  ;;  %v3538_v17 = vmul.f32 %v3636_v15, %v3536_v24 }
 0xf44   : > { %3539 = vst [vmem:[%s339_s25] sm:$0xff] %v3537_v46 }
 0xf45   : > { %3540 = vst [vmem:[%s339_s25 + $0x8] sm:$0xff] %v3538_v17 }
 0xf46 PF: > { %s20_s27 = sadd.s32 1, %s4414_s27  }
 0xf47   : > { %p17_p7 = scmp.ge.s32.totalorder %s20_s27, 4  }
 0xf49   :  { %19 = sbr.rel (!%p17_p7) target bundleno = 2 (0x2), region = 130 }
 0xf4e   :  { %3562 = vsyncpa [#allocation4], 1 }
 0xf4f   :  { %3564 = vsyncpa [#allocation4 + $0x1], 1 }
 0xf50   :  { %3565 = vsyncpa [#allocation6], 1 }

</bundles_post_ra>
